<compile_context>
chip_gen: v6e
topology: v6e:2x2x1
jax: 0.10.0
libtpu: 0.0.40
codegen_flags: <defaults>
</compile_context>

<pallas_src>
import functools

import jax
import jax.numpy as jnp
from jax.experimental import pallas as pl
from jax.experimental.pallas import tpu as pltpu


# -----------------------------------------------------------------------------
# helpers
# -----------------------------------------------------------------------------
def _round_up(n, m):
    return ((n + m - 1) // m) * m


def _reorder_ifgo_to_ifog(w):
    """Permute last-axis 4H blocks from PyTorch (i,f,g,o) to (i,f,o,g)."""
    H = w.shape[-1] // 4
    return jnp.concatenate(
        [w[..., :2 * H], w[..., 3 * H:], w[..., 2 * H:3 * H]], axis=-1)


def _pad_gate_cols(w, H, Hp):
    """Pad each of the 4 gate column-blocks (size H, last axis) to Hp."""
    if Hp == H:
        return w
    pad = [(0, 0)] * (w.ndim - 1) + [(0, Hp - H)]
    blocks = [jnp.pad(w[..., k * H:(k + 1) * H], pad) for k in range(4)]
    return jnp.concatenate(blocks, axis=-1)


# -----------------------------------------------------------------------------
# Fused Pallas kernel: all LSTM layers + time loop + final Linear in one call.
# -----------------------------------------------------------------------------
def _make_fused_lstm_kernel(num_layers, seq_len, batch_pad, hidden_pad):
    L, S, Bp, Hp = num_layers, seq_len, batch_pad, hidden_pad
    STATIC_UNROLL_MAX = 16   # fully unroll tiny sequences at trace time

    def kernel(*refs):
        # ---- unpack refs: inputs, outputs, scratch (pallas_call order) ------
        x_ref, h0_ref, c0_ref = refs[0], refs[1], refs[2]
        p = 3
        layer_refs = []
        for _ in range(L):
            layer_refs.append((refs[p], refs[p + 1], refs[p + 2]))
            p += 3
        wlin_ref, blin_ref = refs[p], refs[p + 1]
        p += 2
        out_ref, hn_ref, cn_ref = refs[p], refs[p + 1], refs[p + 2]
        p += 3
        gin_scr = refs[p]
        hseq_scr = refs[p + 1] if L > 1 else None   # only allocated if needed

        h = None
        for l in range(L):
            wih_ref, whh_ref, b_ref = layer_refs[l]

            # -- hoisted input projection: one big MXU matmul per layer -------
            src = x_ref[...] if l == 0 else hseq_scr[...]
            gin_scr[...] = (
                jnp.dot(src, wih_ref[...], preferred_element_type=jnp.float32)
                + b_ref[...])

            whh = whh_ref[...]          # loaded once, resident for the layer
            write_hseq = (l < L - 1)    # only needed as next layer's input

            # TODO(synk): hold whh weight-stationary in the MXU across the
            # recurrence via pltpu.matmul_push_rhs/acc_lhs/pop (MRB accumulate
            # on v7x) instead of a fresh jnp.dot per step.
            def cell_step(row, h, c):
                # row is a multiple of Bp (>= 8): whole-tile sublane access.
                gates = (gin_scr[pl.ds(row, Bp), :]
                         + jnp.dot(h, whh,
                                   preferred_element_type=jnp.float32))
                # gate order (i, f, o, g): one sigmoid slab + one tanh, all
                # slices lane-aligned since Hp % 128 == 0.
                ifo = jax.nn.sigmoid(gates[:, :3 * Hp])
                g = jnp.tanh(gates[:, 3 * Hp:])
                i = ifo[:, :Hp]
                f = ifo[:, Hp:2 * Hp]
                o = ifo[:, 2 * Hp:]
                c = f * c + i * g
                h = o * jnp.tanh(c)
                if write_hseq:
                    hseq_scr[pl.ds(row, Bp), :] = h
                return h, c

            h = h0_ref[l]
            c = c0_ref[l]
            if S <= STATIC_UNROLL_MAX:
                # static unroll: all offsets are compile-time constants
                for t in range(S):
                    h, c = cell_step(t * Bp, h, c)
            else:
                def body(t, carry):
                    row = pl.multiple_of(t * Bp, Bp)
                    return cell_step(row, *carry)
                h, c = jax.lax.fori_loop(0, S, body, (h, c), unroll=8)

            hn_ref[l] = h
            cn_ref[l] = c

        # -- fused final Linear(hidden -> 1): VPU multiply + lane reduction ---
        out_ref[...] = (jnp.sum(h * wlin_ref[...], axis=-1, keepdims=True)
                        + blin_ref[...])

    return kernel


# -----------------------------------------------------------------------------
# pallas_call wrapper (already-padded operands)
# -----------------------------------------------------------------------------
def lstm_fused_forward(x2d, wihs, whhs, bs, h0, c0, w_lin_row, b_lin,
                       *, L, S, B_pad, H_pad):
    kernel = _make_fused_lstm_kernel(L, S, B_pad, H_pad)

    inputs = [x2d, h0, c0]
    for l in range(L):
        inputs += [wihs[l], whhs[l], bs[l]]
    inputs += [w_lin_row, b_lin]

    scratch = [pltpu.VMEM((S * B_pad, 4 * H_pad), jnp.float32)]   # gates_in
    if L > 1:
        scratch.append(pltpu.VMEM((S * B_pad, H_pad), jnp.float32))  # hseq

    # Explicit scoped-VMEM budget (inputs + outputs + scratch, 2x margin),
    # capped well under v7x's 64 MiB physical VMEM.
    def _nbytes(a):
        return int(a.size) * jnp.dtype(a.dtype).itemsize
    needed = sum(_nbytes(a) for a in inputs)
    needed += 4 * (B_pad + 2 * L * B_pad * H_pad)                    # outputs
    needed += 4 * S * B_pad * (4 * H_pad + (H_pad if L > 1 else 0))  # scratch
    vmem_limit = int(min(48 * 2**20, max(2 * needed + (2 << 20), 16 * 2**20)))

    vmem_specs = [pl.BlockSpec(memory_space=pltpu.MemorySpace.VMEM)
                  for _ in inputs]

    return pl.pallas_call(
        kernel,
        out_shape=(jax.ShapeDtypeStruct((B_pad, 1), jnp.float32),
                   jax.ShapeDtypeStruct((L, B_pad, H_pad), jnp.float32),
                   jax.ShapeDtypeStruct((L, B_pad, H_pad), jnp.float32)),
        in_specs=vmem_specs,
        out_specs=(pl.BlockSpec(memory_space=pltpu.MemorySpace.VMEM),
                   pl.BlockSpec(memory_space=pltpu.MemorySpace.VMEM),
                   pl.BlockSpec(memory_space=pltpu.MemorySpace.VMEM)),
        scratch_shapes=scratch,
        compiler_params=pltpu.CompilerParams(vmem_limit_bytes=vmem_limit),
    )(*inputs)


# -----------------------------------------------------------------------------
# Module-level wrapper: padding, gate reordering, output slicing
# -----------------------------------------------------------------------------
def lstm_module_forward(x, params, h0, c0, num_layers):
    """Mirror of LSTM_layer.forward (eval mode). x: (B, S, D) batch-first."""
    # TODO(synk): nn.Dropout on the input is identity here (eval mode);
    # training-mode Bernoulli dropout not implemented.
    B, S, D = x.shape
    L = num_layers
    H = h0.shape[-1]
    Bp = max(8, _round_up(B, 8))      # f32 sublane alignment
    Hp = _round_up(H, 128)            # lane alignment

    # time-major, batch padded, flattened so timestep t occupies
    # rows [t*Bp, (t+1)*Bp) -- every per-step slice is 8-sublane aligned.
    xt = jnp.transpose(x, (1, 0, 2))                       # (S, B, D)
    xt = jnp.pad(xt, ((0, 0), (0, Bp - B), (0, 0)))        # (S, Bp, D)
    x2d = xt.reshape(S * Bp, D)

    h0p = jnp.pad(h0, ((0, 0), (0, Bp - B), (0, Hp - H)))
    c0p = jnp.pad(c0, ((0, 0), (0, Bp - B), (0, Hp - H)))

    wihs, whhs, bs = [], [], []
    for l in range(L):
        wih = _pad_gate_cols(_reorder_ifgo_to_ifog(params[f"wih_{l}"]), H, Hp)
        whh = _pad_gate_cols(_reorder_ifgo_to_ifog(params[f"whh_{l}"]), H, Hp)
        b = _pad_gate_cols(_reorder_ifgo_to_ifog(params[f"b_{l}"]), H, Hp)
        if l > 0:
            wih = jnp.pad(wih, ((0, Hp - H), (0, 0)))      # input dim is H
        whh = jnp.pad(whh, ((0, Hp - H), (0, 0)))
        wihs.append(wih)
        whhs.append(whh)
        bs.append(b)

    w_lin_row = jnp.pad(params["w_lin"].T, ((0, 0), (0, Hp - H)))   # (1, Hp)
    b_lin = params["b_lin"]                                         # (1, 1)

    out_p, hn_p, cn_p = lstm_fused_forward(
        x2d, wihs, whhs, bs, h0p, c0p, w_lin_row, b_lin,
        L=L, S=S, B_pad=Bp, H_pad=Hp)

    # slice padding back off
    out = out_p[:B, :]
    hn = hn_p[:, :B, :H]
    cn = cn_p[:, :B, :H]
    return out, (hn, cn)


# -----------------------------------------------------------------------------
# Pure-JAX reference (correctness check only; original i,f,g,o gate order)
# -----------------------------------------------------------------------------
def lstm_module_ref(x, params, h0, c0, num_layers):
    inp = x  # (B, S, D)
    hns, cns = [], []
    for l in range(num_layers):
        wih, whh, b = params[f"wih_{l}"], params[f"whh_{l}"], params[f"b_{l}"]
        H = whh.shape[0]

        def step(carry, xt, wih=wih, whh=whh, b=b, H=H):
            h, c = carry
            gates = xt @ wih + h @ whh + b[0]
            i = jax.nn.sigmoid(gates[:, 0 * H:1 * H])
            f = jax.nn.sigmoid(gates[:, 1 * H:2 * H])
            g = jnp.tanh(gates[:, 2 * H:3 * H])
            o = jax.nn.sigmoid(gates[:, 3 * H:4 * H])
            c = f * c + i * g
            h = o * jnp.tanh(c)
            return (h, c), h

        (hn, cn), hs = jax.lax.scan(step, (h0[l], c0[l]),
                                    jnp.transpose(inp, (1, 0, 2)))
        inp = jnp.transpose(hs, (1, 0, 2))
        hns.append(hn)
        cns.append(cn)
    out = inp[:, -1, :] @ params["w_lin"] + params["b_lin"]
    return out, (jnp.stack(hns), jnp.stack(cns))


# -----------------------------------------------------------------------------
# Deterministic parameter construction (PyTorch-style U(-1/sqrt(H), 1/sqrt(H)))
# -----------------------------------------------------------------------------
def init_params(key, input_size, hidden_size, num_layers):
    params = {}
    bound = 1.0 / jnp.sqrt(hidden_size)
    for l in range(num_layers):
        in_dim = input_size if l == 0 else hidden_size
        key, k1, k2, k3, k4 = jax.random.split(key, 5)
        # stored transposed: (in_dim, 4H) and (H, 4H) for x @ W form
        params[f"wih_{l}"] = jax.random.uniform(
            k1, (in_dim, 4 * hidden_size), jnp.float32, -bound, bound)
        params[f"whh_{l}"] = jax.random.uniform(
            k2, (hidden_size, 4 * hidden_size), jnp.float32, -bound, bound)
        b_ih = jax.random.uniform(k3, (4 * hidden_size,), jnp.float32, -bound, bound)
        b_hh = jax.random.uniform(k4, (4 * hidden_size,), jnp.float32, -bound, bound)
        params[f"b_{l}"] = (b_ih + b_hh)[None, :]      # (1, 4H)
    key, k5, k6 = jax.random.split(key, 3)
    lin_bound = 1.0 / jnp.sqrt(hidden_size)
    params["w_lin"] = jax.random.uniform(
        k5, (hidden_size, 1), jnp.float32, -lin_bound, lin_bound)
    params["b_lin"] = jax.random.uniform(
        k6, (1, 1), jnp.float32, -lin_bound, lin_bound)
    return params


# -----------------------------------------------------------------------------
if __name__ == "__main__":
    # Small shapes consistent with the module's forward contract.
    batch, seq_len, input_size, hidden_size, num_layers = 2, 8, 16, 32, 2

    key = jax.random.PRNGKey(0)
    key, kx, kh, kc, kp = jax.random.split(key, 5)

    x = jax.random.normal(kx, (batch, seq_len, input_size), jnp.float32)
    # forward() draws h0/c0 with randn each call; generated deterministically here.
    h0 = jax.random.normal(kh, (num_layers, batch, hidden_size), jnp.float32)
    c0 = jax.random.normal(kc, (num_layers, batch, hidden_size), jnp.float32)
    params = init_params(kp, input_size, hidden_size, num_layers)

    fwd = functools.partial(lstm_module_forward, num_layers=num_layers)
    out, (hn, cn) = jax.jit(fwd)(x, params, h0, c0)
    jax.block_until_ready((out, hn, cn))

    # Correctness check against pure-JAX reference.
    out_r, (hn_r, cn_r) = lstm_module_ref(x, params, h0, c0, num_layers)
    assert out.shape == (batch, 1)
    assert hn.shape == (num_layers, batch, hidden_size)
    assert cn.shape == (num_layers, batch, hidden_size)
    assert jnp.allclose(out, out_r, atol=1e-5, rtol=1e-5)
    assert jnp.allclose(hn, hn_r, atol=1e-5, rtol=1e-5)
    assert jnp.allclose(cn, cn_r, atol=1e-5, rtol=1e-5)

    print("KERNEL_OK")
</pallas_src>

<mosaic_0001>
module attributes {stable_mosaic.version = 11 : i64} {
  func.func @kernel(%arg0: memref<64x16xf32, #tpu.memory_space<vmem>>, %arg1: memref<2x8x128xf32, #tpu.memory_space<vmem>>, %arg2: memref<2x8x128xf32, #tpu.memory_space<vmem>>, %arg3: memref<16x512xf32, #tpu.memory_space<vmem>>, %arg4: memref<128x512xf32, #tpu.memory_space<vmem>>, %arg5: memref<1x512xf32, #tpu.memory_space<vmem>>, %arg6: memref<128x512xf32, #tpu.memory_space<vmem>>, %arg7: memref<128x512xf32, #tpu.memory_space<vmem>>, %arg8: memref<1x512xf32, #tpu.memory_space<vmem>>, %arg9: memref<1x128xf32, #tpu.memory_space<vmem>>, %arg10: memref<1x1xf32, #tpu.memory_space<vmem>>, %arg11: memref<8x1xf32, #tpu.memory_space<vmem>>, %arg12: memref<2x8x128xf32, #tpu.memory_space<vmem>>, %arg13: memref<2x8x128xf32, #tpu.memory_space<vmem>>, %arg14: memref<64x512xf32, #tpu.memory_space<vmem>>, %arg15: memref<64x128xf32, #tpu.memory_space<vmem>>) attributes {dimension_semantics = [], scalar_prefetch = 0 : i64, scratch_operands = 2 : i64, tpu.core_type = #tpu.core_type<tc>} {
    %c0 = arith.constant 0 : index
    %c0_0 = arith.constant 0 : index
    %0 = vector.load %arg0[%c0, %c0_0] : memref<64x16xf32, #tpu.memory_space<vmem>>, vector<64x16xf32>
    %c0_1 = arith.constant 0 : index
    %c0_2 = arith.constant 0 : index
    %1 = vector.load %arg3[%c0_1, %c0_2] : memref<16x512xf32, #tpu.memory_space<vmem>>, vector<16x512xf32>
    %cst = arith.constant dense<0.000000e+00> : vector<64x512xf32>
    %2 = tpu.matmul %0, %1, %cst {dimension_numbers = #tpu.dot_dimension_numbers<[1], [0], [0], [1], [0, 0, 1, 1], [], []>} : vector<64x16xf32>, vector<16x512xf32>, vector<64x512xf32> -> vector<64x512xf32>
    %c0_3 = arith.constant 0 : index
    %c0_4 = arith.constant 0 : index
    %3 = vector.load %arg5[%c0_3, %c0_4] : memref<1x512xf32, #tpu.memory_space<vmem>>, vector<1x512xf32>
    %4 = vector.broadcast %3 : vector<1x512xf32> to vector<64x512xf32>
    %5 = arith.addf %2, %4 : vector<64x512xf32>
    %c0_5 = arith.constant 0 : index
    %c0_6 = arith.constant 0 : index
    %6 = vector.load %arg14[%c0_5, %c0_6] : memref<64x512xf32, #tpu.memory_space<vmem>>, vector<64x512xf32>
    tpu.vector_store %arg14[%c0_5, %c0_6], %5 {strides = array<i32>} : memref<64x512xf32, #tpu.memory_space<vmem>>, vector<64x512xf32>,
    %c0_7 = arith.constant 0 : index
    %c0_8 = arith.constant 0 : index
    %7 = vector.load %arg4[%c0_7, %c0_8] : memref<128x512xf32, #tpu.memory_space<vmem>>, vector<128x512xf32>
    %c0_9 = arith.constant 0 : index
    %c0_10 = arith.constant 0 : index
    %c0_11 = arith.constant 0 : index
    %8 = vector.load %arg1[%c0_9, %c0_10, %c0_11] : memref<2x8x128xf32, #tpu.memory_space<vmem>>, vector<1x8x128xf32>
    %9 = vector.shape_cast %8 : vector<1x8x128xf32> to vector<8x128xf32>
    %c0_12 = arith.constant 0 : index
    %c0_13 = arith.constant 0 : index
    %c0_14 = arith.constant 0 : index
    %10 = vector.load %arg2[%c0_12, %c0_13, %c0_14] : memref<2x8x128xf32, #tpu.memory_space<vmem>>, vector<1x8x128xf32>
    %11 = vector.shape_cast %10 : vector<1x8x128xf32> to vector<8x128xf32>
    %c0_15 = arith.constant 0 : index
    %c0_16 = arith.constant 0 : index
    %12 = vector.load %arg14[%c0_15, %c0_16] : memref<64x512xf32, #tpu.memory_space<vmem>>, vector<8x512xf32>
    %cst_17 = arith.constant dense<0.000000e+00> : vector<8x512xf32>
    %13 = tpu.matmul %9, %7, %cst_17 {dimension_numbers = #tpu.dot_dimension_numbers<[1], [0], [0], [1], [0, 0, 1, 1], [], []>} : vector<8x128xf32>, vector<128x512xf32>, vector<8x512xf32> -> vector<8x512xf32>
    %14 = arith.addf %12, %13 : vector<8x512xf32>
    %15 = vector.extract_strided_slice %14 {offsets = [0, 0], sizes = [8, 384], strides = [1, 1]} : vector<8x512xf32> to vector<8x384xf32>
    %16 = arith.negf %15 : vector<8x384xf32>
    %17 = math.exp %16 : vector<8x384xf32>
    %cst_18 = arith.constant 1.000000e+00 : f32
    %18 = vector.broadcast %cst_18 : f32 to vector<8x384xf32>
    %19 = arith.addf %18, %17 : vector<8x384xf32>
    %20 = arith.divf %18, %19 : vector<8x384xf32>
    %21 = vector.extract_strided_slice %14 {offsets = [0, 384], sizes = [8, 128], strides = [1, 1]} : vector<8x512xf32> to vector<8x128xf32>
    %22 = math.tanh %21 : vector<8x128xf32>
    %23 = vector.extract_strided_slice %20 {offsets = [0, 0], sizes = [8, 128], strides = [1, 1]} : vector<8x384xf32> to vector<8x128xf32>
    %24 = vector.extract_strided_slice %20 {offsets = [0, 128], sizes = [8, 128], strides = [1, 1]} : vector<8x384xf32> to vector<8x128xf32>
    %25 = vector.extract_strided_slice %20 {offsets = [0, 256], sizes = [8, 128], strides = [1, 1]} : vector<8x384xf32> to vector<8x128xf32>
    %26 = arith.mulf %24, %11 : vector<8x128xf32>
    %27 = arith.mulf %23, %22 : vector<8x128xf32>
    %28 = arith.addf %26, %27 : vector<8x128xf32>
    %29 = math.tanh %28 : vector<8x128xf32>
    %30 = arith.mulf %25, %29 : vector<8x128xf32>
    %c0_19 = arith.constant 0 : index
    %c0_20 = arith.constant 0 : index
    %31 = vector.load %arg15[%c0_19, %c0_20] : memref<64x128xf32, #tpu.memory_space<vmem>>, vector<8x128xf32>
    tpu.vector_store %arg15[%c0_19, %c0_20], %30 {strides = array<i32>} : memref<64x128xf32, #tpu.memory_space<vmem>>, vector<8x128xf32>,
    %c8 = arith.constant 8 : index
    %c0_21 = arith.constant 0 : index
    %32 = vector.load %arg14[%c8, %c0_21] : memref<64x512xf32, #tpu.memory_space<vmem>>, vector<8x512xf32>
    %cst_22 = arith.constant dense<0.000000e+00> : vector<8x512xf32>
    %33 = tpu.matmul %30, %7, %cst_22 {dimension_numbers = #tpu.dot_dimension_numbers<[1], [0], [0], [1], [0, 0, 1, 1], [], []>} : vector<8x128xf32>, vector<128x512xf32>, vector<8x512xf32> -> vector<8x512xf32>
    %34 = arith.addf %32, %33 : vector<8x512xf32>
    %35 = vector.extract_strided_slice %34 {offsets = [0, 0], sizes = [8, 384], strides = [1, 1]} : vector<8x512xf32> to vector<8x384xf32>
    %36 = arith.negf %35 : vector<8x384xf32>
    %37 = math.exp %36 : vector<8x384xf32>
    %cst_23 = arith.constant 1.000000e+00 : f32
    %38 = vector.broadcast %cst_23 : f32 to vector<8x384xf32>
    %39 = arith.addf %38, %37 : vector<8x384xf32>
    %40 = arith.divf %38, %39 : vector<8x384xf32>
    %41 = vector.extract_strided_slice %34 {offsets = [0, 384], sizes = [8, 128], strides = [1, 1]} : vector<8x512xf32> to vector<8x128xf32>
    %42 = math.tanh %41 : vector<8x128xf32>
    %43 = vector.extract_strided_slice %40 {offsets = [0, 0], sizes = [8, 128], strides = [1, 1]} : vector<8x384xf32> to vector<8x128xf32>
    %44 = vector.extract_strided_slice %40 {offsets = [0, 128], sizes = [8, 128], strides = [1, 1]} : vector<8x384xf32> to vector<8x128xf32>
    %45 = vector.extract_strided_slice %40 {offsets = [0, 256], sizes = [8, 128], strides = [1, 1]} : vector<8x384xf32> to vector<8x128xf32>
    %46 = arith.mulf %44, %28 : vector<8x128xf32>
    %47 = arith.mulf %43, %42 : vector<8x128xf32>
    %48 = arith.addf %46, %47 : vector<8x128xf32>
    %49 = math.tanh %48 : vector<8x128xf32>
    %50 = arith.mulf %45, %49 : vector<8x128xf32>
    %c8_24 = arith.constant 8 : index
    %c0_25 = arith.constant 0 : index
    %51 = vector.load %arg15[%c8_24, %c0_25] : memref<64x128xf32, #tpu.memory_space<vmem>>, vector<8x128xf32>
    tpu.vector_store %arg15[%c8_24, %c0_25], %50 {strides = array<i32>} : memref<64x128xf32, #tpu.memory_space<vmem>>, vector<8x128xf32>,
    %c16 = arith.constant 16 : index
    %c0_26 = arith.constant 0 : index
    %52 = vector.load %arg14[%c16, %c0_26] : memref<64x512xf32, #tpu.memory_space<vmem>>, vector<8x512xf32>
    %cst_27 = arith.constant dense<0.000000e+00> : vector<8x512xf32>
    %53 = tpu.matmul %50, %7, %cst_27 {dimension_numbers = #tpu.dot_dimension_numbers<[1], [0], [0], [1], [0, 0, 1, 1], [], []>} : vector<8x128xf32>, vector<128x512xf32>, vector<8x512xf32> -> vector<8x512xf32>
    %54 = arith.addf %52, %53 : vector<8x512xf32>
    %55 = vector.extract_strided_slice %54 {offsets = [0, 0], sizes = [8, 384], strides = [1, 1]} : vector<8x512xf32> to vector<8x384xf32>
    %56 = arith.negf %55 : vector<8x384xf32>
    %57 = math.exp %56 : vector<8x384xf32>
    %cst_28 = arith.constant 1.000000e+00 : f32
    %58 = vector.broadcast %cst_28 : f32 to vector<8x384xf32>
    %59 = arith.addf %58, %57 : vector<8x384xf32>
    %60 = arith.divf %58, %59 : vector<8x384xf32>
    %61 = vector.extract_strided_slice %54 {offsets = [0, 384], sizes = [8, 128], strides = [1, 1]} : vector<8x512xf32> to vector<8x128xf32>
    %62 = math.tanh %61 : vector<8x128xf32>
    %63 = vector.extract_strided_slice %60 {offsets = [0, 0], sizes = [8, 128], strides = [1, 1]} : vector<8x384xf32> to vector<8x128xf32>
    %64 = vector.extract_strided_slice %60 {offsets = [0, 128], sizes = [8, 128], strides = [1, 1]} : vector<8x384xf32> to vector<8x128xf32>
    %65 = vector.extract_strided_slice %60 {offsets = [0, 256], sizes = [8, 128], strides = [1, 1]} : vector<8x384xf32> to vector<8x128xf32>
    %66 = arith.mulf %64, %48 : vector<8x128xf32>
    %67 = arith.mulf %63, %62 : vector<8x128xf32>
    %68 = arith.addf %66, %67 : vector<8x128xf32>
    %69 = math.tanh %68 : vector<8x128xf32>
    %70 = arith.mulf %65, %69 : vector<8x128xf32>
    %c16_29 = arith.constant 16 : index
    %c0_30 = arith.constant 0 : index
    %71 = vector.load %arg15[%c16_29, %c0_30] : memref<64x128xf32, #tpu.memory_space<vmem>>, vector<8x128xf32>
    tpu.vector_store %arg15[%c16_29, %c0_30], %70 {strides = array<i32>} : memref<64x128xf32, #tpu.memory_space<vmem>>, vector<8x128xf32>,
    %c24 = arith.constant 24 : index
    %c0_31 = arith.constant 0 : index
    %72 = vector.load %arg14[%c24, %c0_31] : memref<64x512xf32, #tpu.memory_space<vmem>>, vector<8x512xf32>
    %cst_32 = arith.constant dense<0.000000e+00> : vector<8x512xf32>
    %73 = tpu.matmul %70, %7, %cst_32 {dimension_numbers = #tpu.dot_dimension_numbers<[1], [0], [0], [1], [0, 0, 1, 1], [], []>} : vector<8x128xf32>, vector<128x512xf32>, vector<8x512xf32> -> vector<8x512xf32>
    %74 = arith.addf %72, %73 : vector<8x512xf32>
    %75 = vector.extract_strided_slice %74 {offsets = [0, 0], sizes = [8, 384], strides = [1, 1]} : vector<8x512xf32> to vector<8x384xf32>
    %76 = arith.negf %75 : vector<8x384xf32>
    %77 = math.exp %76 : vector<8x384xf32>
    %cst_33 = arith.constant 1.000000e+00 : f32
    %78 = vector.broadcast %cst_33 : f32 to vector<8x384xf32>
    %79 = arith.addf %78, %77 : vector<8x384xf32>
    %80 = arith.divf %78, %79 : vector<8x384xf32>
    %81 = vector.extract_strided_slice %74 {offsets = [0, 384], sizes = [8, 128], strides = [1, 1]} : vector<8x512xf32> to vector<8x128xf32>
    %82 = math.tanh %81 : vector<8x128xf32>
    %83 = vector.extract_strided_slice %80 {offsets = [0, 0], sizes = [8, 128], strides = [1, 1]} : vector<8x384xf32> to vector<8x128xf32>
    %84 = vector.extract_strided_slice %80 {offsets = [0, 128], sizes = [8, 128], strides = [1, 1]} : vector<8x384xf32> to vector<8x128xf32>
    %85 = vector.extract_strided_slice %80 {offsets = [0, 256], sizes = [8, 128], strides = [1, 1]} : vector<8x384xf32> to vector<8x128xf32>
    %86 = arith.mulf %84, %68 : vector<8x128xf32>
    %87 = arith.mulf %83, %82 : vector<8x128xf32>
    %88 = arith.addf %86, %87 : vector<8x128xf32>
    %89 = math.tanh %88 : vector<8x128xf32>
    %90 = arith.mulf %85, %89 : vector<8x128xf32>
    %c24_34 = arith.constant 24 : index
    %c0_35 = arith.constant 0 : index
    %91 = vector.load %arg15[%c24_34, %c0_35] : memref<64x128xf32, #tpu.memory_space<vmem>>, vector<8x128xf32>
    tpu.vector_store %arg15[%c24_34, %c0_35], %90 {strides = array<i32>} : memref<64x128xf32, #tpu.memory_space<vmem>>, vector<8x128xf32>,
    %c32 = arith.constant 32 : index
    %c0_36 = arith.constant 0 : index
    %92 = vector.load %arg14[%c32, %c0_36] : memref<64x512xf32, #tpu.memory_space<vmem>>, vector<8x512xf32>
    %cst_37 = arith.constant dense<0.000000e+00> : vector<8x512xf32>
    %93 = tpu.matmul %90, %7, %cst_37 {dimension_numbers = #tpu.dot_dimension_numbers<[1], [0], [0], [1], [0, 0, 1, 1], [], []>} : vector<8x128xf32>, vector<128x512xf32>, vector<8x512xf32> -> vector<8x512xf32>
    %94 = arith.addf %92, %93 : vector<8x512xf32>
    %95 = vector.extract_strided_slice %94 {offsets = [0, 0], sizes = [8, 384], strides = [1, 1]} : vector<8x512xf32> to vector<8x384xf32>
    %96 = arith.negf %95 : vector<8x384xf32>
    %97 = math.exp %96 : vector<8x384xf32>
    %cst_38 = arith.constant 1.000000e+00 : f32
    %98 = vector.broadcast %cst_38 : f32 to vector<8x384xf32>
    %99 = arith.addf %98, %97 : vector<8x384xf32>
    %100 = arith.divf %98, %99 : vector<8x384xf32>
    %101 = vector.extract_strided_slice %94 {offsets = [0, 384], sizes = [8, 128], strides = [1, 1]} : vector<8x512xf32> to vector<8x128xf32>
    %102 = math.tanh %101 : vector<8x128xf32>
    %103 = vector.extract_strided_slice %100 {offsets = [0, 0], sizes = [8, 128], strides = [1, 1]} : vector<8x384xf32> to vector<8x128xf32>
    %104 = vector.extract_strided_slice %100 {offsets = [0, 128], sizes = [8, 128], strides = [1, 1]} : vector<8x384xf32> to vector<8x128xf32>
    %105 = vector.extract_strided_slice %100 {offsets = [0, 256], sizes = [8, 128], strides = [1, 1]} : vector<8x384xf32> to vector<8x128xf32>
    %106 = arith.mulf %104, %88 : vector<8x128xf32>
    %107 = arith.mulf %103, %102 : vector<8x128xf32>
    %108 = arith.addf %106, %107 : vector<8x128xf32>
    %109 = math.tanh %108 : vector<8x128xf32>
    %110 = arith.mulf %105, %109 : vector<8x128xf32>
    %c32_39 = arith.constant 32 : index
    %c0_40 = arith.constant 0 : index
    %111 = vector.load %arg15[%c32_39, %c0_40] : memref<64x128xf32, #tpu.memory_space<vmem>>, vector<8x128xf32>
    tpu.vector_store %arg15[%c32_39, %c0_40], %110 {strides = array<i32>} : memref<64x128xf32, #tpu.memory_space<vmem>>, vector<8x128xf32>,
    %c40 = arith.constant 40 : index
    %c0_41 = arith.constant 0 : index
    %112 = vector.load %arg14[%c40, %c0_41] : memref<64x512xf32, #tpu.memory_space<vmem>>, vector<8x512xf32>
    %cst_42 = arith.constant dense<0.000000e+00> : vector<8x512xf32>
    %113 = tpu.matmul %110, %7, %cst_42 {dimension_numbers = #tpu.dot_dimension_numbers<[1], [0], [0], [1], [0, 0, 1, 1], [], []>} : vector<8x128xf32>, vector<128x512xf32>, vector<8x512xf32> -> vector<8x512xf32>
    %114 = arith.addf %112, %113 : vector<8x512xf32>
    %115 = vector.extract_strided_slice %114 {offsets = [0, 0], sizes = [8, 384], strides = [1, 1]} : vector<8x512xf32> to vector<8x384xf32>
    %116 = arith.negf %115 : vector<8x384xf32>
    %117 = math.exp %116 : vector<8x384xf32>
    %cst_43 = arith.constant 1.000000e+00 : f32
    %118 = vector.broadcast %cst_43 : f32 to vector<8x384xf32>
    %119 = arith.addf %118, %117 : vector<8x384xf32>
    %120 = arith.divf %118, %119 : vector<8x384xf32>
    %121 = vector.extract_strided_slice %114 {offsets = [0, 384], sizes = [8, 128], strides = [1, 1]} : vector<8x512xf32> to vector<8x128xf32>
    %122 = math.tanh %121 : vector<8x128xf32>
    %123 = vector.extract_strided_slice %120 {offsets = [0, 0], sizes = [8, 128], strides = [1, 1]} : vector<8x384xf32> to vector<8x128xf32>
    %124 = vector.extract_strided_slice %120 {offsets = [0, 128], sizes = [8, 128], strides = [1, 1]} : vector<8x384xf32> to vector<8x128xf32>
    %125 = vector.extract_strided_slice %120 {offsets = [0, 256], sizes = [8, 128], strides = [1, 1]} : vector<8x384xf32> to vector<8x128xf32>
    %126 = arith.mulf %124, %108 : vector<8x128xf32>
    %127 = arith.mulf %123, %122 : vector<8x128xf32>
    %128 = arith.addf %126, %127 : vector<8x128xf32>
    %129 = math.tanh %128 : vector<8x128xf32>
    %130 = arith.mulf %125, %129 : vector<8x128xf32>
    %c40_44 = arith.constant 40 : index
    %c0_45 = arith.constant 0 : index
    %131 = vector.load %arg15[%c40_44, %c0_45] : memref<64x128xf32, #tpu.memory_space<vmem>>, vector<8x128xf32>
    tpu.vector_store %arg15[%c40_44, %c0_45], %130 {strides = array<i32>} : memref<64x128xf32, #tpu.memory_space<vmem>>, vector<8x128xf32>,
    %c48 = arith.constant 48 : index
    %c0_46 = arith.constant 0 : index
    %132 = vector.load %arg14[%c48, %c0_46] : memref<64x512xf32, #tpu.memory_space<vmem>>, vector<8x512xf32>
    %cst_47 = arith.constant dense<0.000000e+00> : vector<8x512xf32>
    %133 = tpu.matmul %130, %7, %cst_47 {dimension_numbers = #tpu.dot_dimension_numbers<[1], [0], [0], [1], [0, 0, 1, 1], [], []>} : vector<8x128xf32>, vector<128x512xf32>, vector<8x512xf32> -> vector<8x512xf32>
    %134 = arith.addf %132, %133 : vector<8x512xf32>
    %135 = vector.extract_strided_slice %134 {offsets = [0, 0], sizes = [8, 384], strides = [1, 1]} : vector<8x512xf32> to vector<8x384xf32>
    %136 = arith.negf %135 : vector<8x384xf32>
    %137 = math.exp %136 : vector<8x384xf32>
    %cst_48 = arith.constant 1.000000e+00 : f32
    %138 = vector.broadcast %cst_48 : f32 to vector<8x384xf32>
    %139 = arith.addf %138, %137 : vector<8x384xf32>
    %140 = arith.divf %138, %139 : vector<8x384xf32>
    %141 = vector.extract_strided_slice %134 {offsets = [0, 384], sizes = [8, 128], strides = [1, 1]} : vector<8x512xf32> to vector<8x128xf32>
    %142 = math.tanh %141 : vector<8x128xf32>
    %143 = vector.extract_strided_slice %140 {offsets = [0, 0], sizes = [8, 128], strides = [1, 1]} : vector<8x384xf32> to vector<8x128xf32>
    %144 = vector.extract_strided_slice %140 {offsets = [0, 128], sizes = [8, 128], strides = [1, 1]} : vector<8x384xf32> to vector<8x128xf32>
    %145 = vector.extract_strided_slice %140 {offsets = [0, 256], sizes = [8, 128], strides = [1, 1]} : vector<8x384xf32> to vector<8x128xf32>
    %146 = arith.mulf %144, %128 : vector<8x128xf32>
    %147 = arith.mulf %143, %142 : vector<8x128xf32>
    %148 = arith.addf %146, %147 : vector<8x128xf32>
    %149 = math.tanh %148 : vector<8x128xf32>
    %150 = arith.mulf %145, %149 : vector<8x128xf32>
    %c48_49 = arith.constant 48 : index
    %c0_50 = arith.constant 0 : index
    %151 = vector.load %arg15[%c48_49, %c0_50] : memref<64x128xf32, #tpu.memory_space<vmem>>, vector<8x128xf32>
    tpu.vector_store %arg15[%c48_49, %c0_50], %150 {strides = array<i32>} : memref<64x128xf32, #tpu.memory_space<vmem>>, vector<8x128xf32>,
    %c56 = arith.constant 56 : index
    %c0_51 = arith.constant 0 : index
    %152 = vector.load %arg14[%c56, %c0_51] : memref<64x512xf32, #tpu.memory_space<vmem>>, vector<8x512xf32>
    %cst_52 = arith.constant dense<0.000000e+00> : vector<8x512xf32>
    %153 = tpu.matmul %150, %7, %cst_52 {dimension_numbers = #tpu.dot_dimension_numbers<[1], [0], [0], [1], [0, 0, 1, 1], [], []>} : vector<8x128xf32>, vector<128x512xf32>, vector<8x512xf32> -> vector<8x512xf32>
    %154 = arith.addf %152, %153 : vector<8x512xf32>
    %155 = vector.extract_strided_slice %154 {offsets = [0, 0], sizes = [8, 384], strides = [1, 1]} : vector<8x512xf32> to vector<8x384xf32>
    %156 = arith.negf %155 : vector<8x384xf32>
    %157 = math.exp %156 : vector<8x384xf32>
    %cst_53 = arith.constant 1.000000e+00 : f32
    %158 = vector.broadcast %cst_53 : f32 to vector<8x384xf32>
    %159 = arith.addf %158, %157 : vector<8x384xf32>
    %160 = arith.divf %158, %159 : vector<8x384xf32>
    %161 = vector.extract_strided_slice %154 {offsets = [0, 384], sizes = [8, 128], strides = [1, 1]} : vector<8x512xf32> to vector<8x128xf32>
    %162 = math.tanh %161 : vector<8x128xf32>
    %163 = vector.extract_strided_slice %160 {offsets = [0, 0], sizes = [8, 128], strides = [1, 1]} : vector<8x384xf32> to vector<8x128xf32>
    %164 = vector.extract_strided_slice %160 {offsets = [0, 128], sizes = [8, 128], strides = [1, 1]} : vector<8x384xf32> to vector<8x128xf32>
    %165 = vector.extract_strided_slice %160 {offsets = [0, 256], sizes = [8, 128], strides = [1, 1]} : vector<8x384xf32> to vector<8x128xf32>
    %166 = arith.mulf %164, %148 : vector<8x128xf32>
    %167 = arith.mulf %163, %162 : vector<8x128xf32>
    %168 = arith.addf %166, %167 : vector<8x128xf32>
    %169 = math.tanh %168 : vector<8x128xf32>
    %170 = arith.mulf %165, %169 : vector<8x128xf32>
    %c56_54 = arith.constant 56 : index
    %c0_55 = arith.constant 0 : index
    %171 = vector.load %arg15[%c56_54, %c0_55] : memref<64x128xf32, #tpu.memory_space<vmem>>, vector<8x128xf32>
    tpu.vector_store %arg15[%c56_54, %c0_55], %170 {strides = array<i32>} : memref<64x128xf32, #tpu.memory_space<vmem>>, vector<8x128xf32>,
    %c0_56 = arith.constant 0 : index
    %c0_57 = arith.constant 0 : index
    %c0_58 = arith.constant 0 : index
    %172 = vector.load %arg12[%c0_56, %c0_57, %c0_58] : memref<2x8x128xf32, #tpu.memory_space<vmem>>, vector<1x8x128xf32>
    %173 = vector.shape_cast %172 : vector<1x8x128xf32> to vector<8x128xf32>
    %174 = vector.shape_cast %170 : vector<8x128xf32> to vector<1x8x128xf32>
    tpu.vector_store %arg12[%c0_56, %c0_57, %c0_58], %174 {strides = array<i32>} : memref<2x8x128xf32, #tpu.memory_space<vmem>>, vector<1x8x128xf32>,
    %c0_59 = arith.constant 0 : index
    %c0_60 = arith.constant 0 : index
    %c0_61 = arith.constant 0 : index
    %175 = vector.load %arg13[%c0_59, %c0_60, %c0_61] : memref<2x8x128xf32, #tpu.memory_space<vmem>>, vector<1x8x128xf32>
    %176 = vector.shape_cast %175 : vector<1x8x128xf32> to vector<8x128xf32>
    %177 = vector.shape_cast %168 : vector<8x128xf32> to vector<1x8x128xf32>
    tpu.vector_store %arg13[%c0_59, %c0_60, %c0_61], %177 {strides = array<i32>} : memref<2x8x128xf32, #tpu.memory_space<vmem>>, vector<1x8x128xf32>,
    %c0_62 = arith.constant 0 : index
    %c0_63 = arith.constant 0 : index
    %178 = vector.load %arg15[%c0_62, %c0_63] : memref<64x128xf32, #tpu.memory_space<vmem>>, vector<64x128xf32>
    %c0_64 = arith.constant 0 : index
    %c0_65 = arith.constant 0 : index
    %179 = vector.load %arg6[%c0_64, %c0_65] : memref<128x512xf32, #tpu.memory_space<vmem>>, vector<128x512xf32>
    %cst_66 = arith.constant dense<0.000000e+00> : vector<64x512xf32>
    %180 = tpu.matmul %178, %179, %cst_66 {dimension_numbers = #tpu.dot_dimension_numbers<[1], [0], [0], [1], [0, 0, 1, 1], [], []>} : vector<64x128xf32>, vector<128x512xf32>, vector<64x512xf32> -> vector<64x512xf32>
    %c0_67 = arith.constant 0 : index
    %c0_68 = arith.constant 0 : index
    %181 = vector.load %arg8[%c0_67, %c0_68] : memref<1x512xf32, #tpu.memory_space<vmem>>, vector<1x512xf32>
    %182 = vector.broadcast %181 : vector<1x512xf32> to vector<64x512xf32>
    %183 = arith.addf %180, %182 : vector<64x512xf32>
    %c0_69 = arith.constant 0 : index
    %c0_70 = arith.constant 0 : index
    %184 = vector.load %arg14[%c0_69, %c0_70] : memref<64x512xf32, #tpu.memory_space<vmem>>, vector<64x512xf32>
    tpu.vector_store %arg14[%c0_69, %c0_70], %183 {strides = array<i32>} : memref<64x512xf32, #tpu.memory_space<vmem>>, vector<64x512xf32>,
    %c0_71 = arith.constant 0 : index
    %c0_72 = arith.constant 0 : index
    %185 = vector.load %arg7[%c0_71, %c0_72] : memref<128x512xf32, #tpu.memory_space<vmem>>, vector<128x512xf32>
    %c1 = arith.constant 1 : index
    %c0_73 = arith.constant 0 : index
    %c0_74 = arith.constant 0 : index
    %186 = vector.load %arg1[%c1, %c0_73, %c0_74] : memref<2x8x128xf32, #tpu.memory_space<vmem>>, vector<1x8x128xf32>
    %187 = vector.shape_cast %186 : vector<1x8x128xf32> to vector<8x128xf32>
    %c1_75 = arith.constant 1 : index
    %c0_76 = arith.constant 0 : index
    %c0_77 = arith.constant 0 : index
    %188 = vector.load %arg2[%c1_75, %c0_76, %c0_77] : memref<2x8x128xf32, #tpu.memory_space<vmem>>, vector<1x8x128xf32>
    %189 = vector.shape_cast %188 : vector<1x8x128xf32> to vector<8x128xf32>
    %c0_78 = arith.constant 0 : index
    %c0_79 = arith.constant 0 : index
    %190 = vector.load %arg14[%c0_78, %c0_79] : memref<64x512xf32, #tpu.memory_space<vmem>>, vector<8x512xf32>
    %cst_80 = arith.constant dense<0.000000e+00> : vector<8x512xf32>
    %191 = tpu.matmul %187, %185, %cst_80 {dimension_numbers = #tpu.dot_dimension_numbers<[1], [0], [0], [1], [0, 0, 1, 1], [], []>} : vector<8x128xf32>, vector<128x512xf32>, vector<8x512xf32> -> vector<8x512xf32>
    %192 = arith.addf %190, %191 : vector<8x512xf32>
    %193 = vector.extract_strided_slice %192 {offsets = [0, 0], sizes = [8, 384], strides = [1, 1]} : vector<8x512xf32> to vector<8x384xf32>
    %194 = arith.negf %193 : vector<8x384xf32>
    %195 = math.exp %194 : vector<8x384xf32>
    %cst_81 = arith.constant 1.000000e+00 : f32
    %196 = vector.broadcast %cst_81 : f32 to vector<8x384xf32>
    %197 = arith.addf %196, %195 : vector<8x384xf32>
    %198 = arith.divf %196, %197 : vector<8x384xf32>
    %199 = vector.extract_strided_slice %192 {offsets = [0, 384], sizes = [8, 128], strides = [1, 1]} : vector<8x512xf32> to vector<8x128xf32>
    %200 = math.tanh %199 : vector<8x128xf32>
    %201 = vector.extract_strided_slice %198 {offsets = [0, 0], sizes = [8, 128], strides = [1, 1]} : vector<8x384xf32> to vector<8x128xf32>
    %202 = vector.extract_strided_slice %198 {offsets = [0, 128], sizes = [8, 128], strides = [1, 1]} : vector<8x384xf32> to vector<8x128xf32>
    %203 = vector.extract_strided_slice %198 {offsets = [0, 256], sizes = [8, 128], strides = [1, 1]} : vector<8x384xf32> to vector<8x128xf32>
    %204 = arith.mulf %202, %189 : vector<8x128xf32>
    %205 = arith.mulf %201, %200 : vector<8x128xf32>
    %206 = arith.addf %204, %205 : vector<8x128xf32>
    %207 = math.tanh %206 : vector<8x128xf32>
    %208 = arith.mulf %203, %207 : vector<8x128xf32>
    %c8_82 = arith.constant 8 : index
    %c0_83 = arith.constant 0 : index
    %209 = vector.load %arg14[%c8_82, %c0_83] : memref<64x512xf32, #tpu.memory_space<vmem>>, vector<8x512xf32>
    %cst_84 = arith.constant dense<0.000000e+00> : vector<8x512xf32>
    %210 = tpu.matmul %208, %185, %cst_84 {dimension_numbers = #tpu.dot_dimension_numbers<[1], [0], [0], [1], [0, 0, 1, 1], [], []>} : vector<8x128xf32>, vector<128x512xf32>, vector<8x512xf32> -> vector<8x512xf32>
    %211 = arith.addf %209, %210 : vector<8x512xf32>
    %212 = vector.extract_strided_slice %211 {offsets = [0, 0], sizes = [8, 384], strides = [1, 1]} : vector<8x512xf32> to vector<8x384xf32>
    %213 = arith.negf %212 : vector<8x384xf32>
    %214 = math.exp %213 : vector<8x384xf32>
    %cst_85 = arith.constant 1.000000e+00 : f32
    %215 = vector.broadcast %cst_85 : f32 to vector<8x384xf32>
    %216 = arith.addf %215, %214 : vector<8x384xf32>
    %217 = arith.divf %215, %216 : vector<8x384xf32>
    %218 = vector.extract_strided_slice %211 {offsets = [0, 384], sizes = [8, 128], strides = [1, 1]} : vector<8x512xf32> to vector<8x128xf32>
    %219 = math.tanh %218 : vector<8x128xf32>
    %220 = vector.extract_strided_slice %217 {offsets = [0, 0], sizes = [8, 128], strides = [1, 1]} : vector<8x384xf32> to vector<8x128xf32>
    %221 = vector.extract_strided_slice %217 {offsets = [0, 128], sizes = [8, 128], strides = [1, 1]} : vector<8x384xf32> to vector<8x128xf32>
    %222 = vector.extract_strided_slice %217 {offsets = [0, 256], sizes = [8, 128], strides = [1, 1]} : vector<8x384xf32> to vector<8x128xf32>
    %223 = arith.mulf %221, %206 : vector<8x128xf32>
    %224 = arith.mulf %220, %219 : vector<8x128xf32>
    %225 = arith.addf %223, %224 : vector<8x128xf32>
    %226 = math.tanh %225 : vector<8x128xf32>
    %227 = arith.mulf %222, %226 : vector<8x128xf32>
    %c16_86 = arith.constant 16 : index
    %c0_87 = arith.constant 0 : index
    %228 = vector.load %arg14[%c16_86, %c0_87] : memref<64x512xf32, #tpu.memory_space<vmem>>, vector<8x512xf32>
    %cst_88 = arith.constant dense<0.000000e+00> : vector<8x512xf32>
    %229 = tpu.matmul %227, %185, %cst_88 {dimension_numbers = #tpu.dot_dimension_numbers<[1], [0], [0], [1], [0, 0, 1, 1], [], []>} : vector<8x128xf32>, vector<128x512xf32>, vector<8x512xf32> -> vector<8x512xf32>
    %230 = arith.addf %228, %229 : vector<8x512xf32>
    %231 = vector.extract_strided_slice %230 {offsets = [0, 0], sizes = [8, 384], strides = [1, 1]} : vector<8x512xf32> to vector<8x384xf32>
    %232 = arith.negf %231 : vector<8x384xf32>
    %233 = math.exp %232 : vector<8x384xf32>
    %cst_89 = arith.constant 1.000000e+00 : f32
    %234 = vector.broadcast %cst_89 : f32 to vector<8x384xf32>
    %235 = arith.addf %234, %233 : vector<8x384xf32>
    %236 = arith.divf %234, %235 : vector<8x384xf32>
    %237 = vector.extract_strided_slice %230 {offsets = [0, 384], sizes = [8, 128], strides = [1, 1]} : vector<8x512xf32> to vector<8x128xf32>
    %238 = math.tanh %237 : vector<8x128xf32>
    %239 = vector.extract_strided_slice %236 {offsets = [0, 0], sizes = [8, 128], strides = [1, 1]} : vector<8x384xf32> to vector<8x128xf32>
    %240 = vector.extract_strided_slice %236 {offsets = [0, 128], sizes = [8, 128], strides = [1, 1]} : vector<8x384xf32> to vector<8x128xf32>
    %241 = vector.extract_strided_slice %236 {offsets = [0, 256], sizes = [8, 128], strides = [1, 1]} : vector<8x384xf32> to vector<8x128xf32>
    %242 = arith.mulf %240, %225 : vector<8x128xf32>
    %243 = arith.mulf %239, %238 : vector<8x128xf32>
    %244 = arith.addf %242, %243 : vector<8x128xf32>
    %245 = math.tanh %244 : vector<8x128xf32>
    %246 = arith.mulf %241, %245 : vector<8x128xf32>
    %c24_90 = arith.constant 24 : index
    %c0_91 = arith.constant 0 : index
    %247 = vector.load %arg14[%c24_90, %c0_91] : memref<64x512xf32, #tpu.memory_space<vmem>>, vector<8x512xf32>
    %cst_92 = arith.constant dense<0.000000e+00> : vector<8x512xf32>
    %248 = tpu.matmul %246, %185, %cst_92 {dimension_numbers = #tpu.dot_dimension_numbers<[1], [0], [0], [1], [0, 0, 1, 1], [], []>} : vector<8x128xf32>, vector<128x512xf32>, vector<8x512xf32> -> vector<8x512xf32>
    %249 = arith.addf %247, %248 : vector<8x512xf32>
    %250 = vector.extract_strided_slice %249 {offsets = [0, 0], sizes = [8, 384], strides = [1, 1]} : vector<8x512xf32> to vector<8x384xf32>
    %251 = arith.negf %250 : vector<8x384xf32>
    %252 = math.exp %251 : vector<8x384xf32>
    %cst_93 = arith.constant 1.000000e+00 : f32
    %253 = vector.broadcast %cst_93 : f32 to vector<8x384xf32>
    %254 = arith.addf %253, %252 : vector<8x384xf32>
    %255 = arith.divf %253, %254 : vector<8x384xf32>
    %256 = vector.extract_strided_slice %249 {offsets = [0, 384], sizes = [8, 128], strides = [1, 1]} : vector<8x512xf32> to vector<8x128xf32>
    %257 = math.tanh %256 : vector<8x128xf32>
    %258 = vector.extract_strided_slice %255 {offsets = [0, 0], sizes = [8, 128], strides = [1, 1]} : vector<8x384xf32> to vector<8x128xf32>
    %259 = vector.extract_strided_slice %255 {offsets = [0, 128], sizes = [8, 128], strides = [1, 1]} : vector<8x384xf32> to vector<8x128xf32>
    %260 = vector.extract_strided_slice %255 {offsets = [0, 256], sizes = [8, 128], strides = [1, 1]} : vector<8x384xf32> to vector<8x128xf32>
    %261 = arith.mulf %259, %244 : vector<8x128xf32>
    %262 = arith.mulf %258, %257 : vector<8x128xf32>
    %263 = arith.addf %261, %262 : vector<8x128xf32>
    %264 = math.tanh %263 : vector<8x128xf32>
    %265 = arith.mulf %260, %264 : vector<8x128xf32>
    %c32_94 = arith.constant 32 : index
    %c0_95 = arith.constant 0 : index
    %266 = vector.load %arg14[%c32_94, %c0_95] : memref<64x512xf32, #tpu.memory_space<vmem>>, vector<8x512xf32>
    %cst_96 = arith.constant dense<0.000000e+00> : vector<8x512xf32>
    %267 = tpu.matmul %265, %185, %cst_96 {dimension_numbers = #tpu.dot_dimension_numbers<[1], [0], [0], [1], [0, 0, 1, 1], [], []>} : vector<8x128xf32>, vector<128x512xf32>, vector<8x512xf32> -> vector<8x512xf32>
    %268 = arith.addf %266, %267 : vector<8x512xf32>
    %269 = vector.extract_strided_slice %268 {offsets = [0, 0], sizes = [8, 384], strides = [1, 1]} : vector<8x512xf32> to vector<8x384xf32>
    %270 = arith.negf %269 : vector<8x384xf32>
    %271 = math.exp %270 : vector<8x384xf32>
    %cst_97 = arith.constant 1.000000e+00 : f32
    %272 = vector.broadcast %cst_97 : f32 to vector<8x384xf32>
    %273 = arith.addf %272, %271 : vector<8x384xf32>
    %274 = arith.divf %272, %273 : vector<8x384xf32>
    %275 = vector.extract_strided_slice %268 {offsets = [0, 384], sizes = [8, 128], strides = [1, 1]} : vector<8x512xf32> to vector<8x128xf32>
    %276 = math.tanh %275 : vector<8x128xf32>
    %277 = vector.extract_strided_slice %274 {offsets = [0, 0], sizes = [8, 128], strides = [1, 1]} : vector<8x384xf32> to vector<8x128xf32>
    %278 = vector.extract_strided_slice %274 {offsets = [0, 128], sizes = [8, 128], strides = [1, 1]} : vector<8x384xf32> to vector<8x128xf32>
    %279 = vector.extract_strided_slice %274 {offsets = [0, 256], sizes = [8, 128], strides = [1, 1]} : vector<8x384xf32> to vector<8x128xf32>
    %280 = arith.mulf %278, %263 : vector<8x128xf32>
    %281 = arith.mulf %277, %276 : vector<8x128xf32>
    %282 = arith.addf %280, %281 : vector<8x128xf32>
    %283 = math.tanh %282 : vector<8x128xf32>
    %284 = arith.mulf %279, %283 : vector<8x128xf32>
    %c40_98 = arith.constant 40 : index
    %c0_99 = arith.constant 0 : index
    %285 = vector.load %arg14[%c40_98, %c0_99] : memref<64x512xf32, #tpu.memory_space<vmem>>, vector<8x512xf32>
    %cst_100 = arith.constant dense<0.000000e+00> : vector<8x512xf32>
    %286 = tpu.matmul %284, %185, %cst_100 {dimension_numbers = #tpu.dot_dimension_numbers<[1], [0], [0], [1], [0, 0, 1, 1], [], []>} : vector<8x128xf32>, vector<128x512xf32>, vector<8x512xf32> -> vector<8x512xf32>
    %287 = arith.addf %285, %286 : vector<8x512xf32>
    %288 = vector.extract_strided_slice %287 {offsets = [0, 0], sizes = [8, 384], strides = [1, 1]} : vector<8x512xf32> to vector<8x384xf32>
    %289 = arith.negf %288 : vector<8x384xf32>
    %290 = math.exp %289 : vector<8x384xf32>
    %cst_101 = arith.constant 1.000000e+00 : f32
    %291 = vector.broadcast %cst_101 : f32 to vector<8x384xf32>
    %292 = arith.addf %291, %290 : vector<8x384xf32>
    %293 = arith.divf %291, %292 : vector<8x384xf32>
    %294 = vector.extract_strided_slice %287 {offsets = [0, 384], sizes = [8, 128], strides = [1, 1]} : vector<8x512xf32> to vector<8x128xf32>
    %295 = math.tanh %294 : vector<8x128xf32>
    %296 = vector.extract_strided_slice %293 {offsets = [0, 0], sizes = [8, 128], strides = [1, 1]} : vector<8x384xf32> to vector<8x128xf32>
    %297 = vector.extract_strided_slice %293 {offsets = [0, 128], sizes = [8, 128], strides = [1, 1]} : vector<8x384xf32> to vector<8x128xf32>
    %298 = vector.extract_strided_slice %293 {offsets = [0, 256], sizes = [8, 128], strides = [1, 1]} : vector<8x384xf32> to vector<8x128xf32>
    %299 = arith.mulf %297, %282 : vector<8x128xf32>
    %300 = arith.mulf %296, %295 : vector<8x128xf32>
    %301 = arith.addf %299, %300 : vector<8x128xf32>
    %302 = math.tanh %301 : vector<8x128xf32>
    %303 = arith.mulf %298, %302 : vector<8x128xf32>
    %c48_102 = arith.constant 48 : index
    %c0_103 = arith.constant 0 : index
    %304 = vector.load %arg14[%c48_102, %c0_103] : memref<64x512xf32, #tpu.memory_space<vmem>>, vector<8x512xf32>
    %cst_104 = arith.constant dense<0.000000e+00> : vector<8x512xf32>
    %305 = tpu.matmul %303, %185, %cst_104 {dimension_numbers = #tpu.dot_dimension_numbers<[1], [0], [0], [1], [0, 0, 1, 1], [], []>} : vector<8x128xf32>, vector<128x512xf32>, vector<8x512xf32> -> vector<8x512xf32>
    %306 = arith.addf %304, %305 : vector<8x512xf32>
    %307 = vector.extract_strided_slice %306 {offsets = [0, 0], sizes = [8, 384], strides = [1, 1]} : vector<8x512xf32> to vector<8x384xf32>
    %308 = arith.negf %307 : vector<8x384xf32>
    %309 = math.exp %308 : vector<8x384xf32>
    %cst_105 = arith.constant 1.000000e+00 : f32
    %310 = vector.broadcast %cst_105 : f32 to vector<8x384xf32>
    %311 = arith.addf %310, %309 : vector<8x384xf32>
    %312 = arith.divf %310, %311 : vector<8x384xf32>
    %313 = vector.extract_strided_slice %306 {offsets = [0, 384], sizes = [8, 128], strides = [1, 1]} : vector<8x512xf32> to vector<8x128xf32>
    %314 = math.tanh %313 : vector<8x128xf32>
    %315 = vector.extract_strided_slice %312 {offsets = [0, 0], sizes = [8, 128], strides = [1, 1]} : vector<8x384xf32> to vector<8x128xf32>
    %316 = vector.extract_strided_slice %312 {offsets = [0, 128], sizes = [8, 128], strides = [1, 1]} : vector<8x384xf32> to vector<8x128xf32>
    %317 = vector.extract_strided_slice %312 {offsets = [0, 256], sizes = [8, 128], strides = [1, 1]} : vector<8x384xf32> to vector<8x128xf32>
    %318 = arith.mulf %316, %301 : vector<8x128xf32>
    %319 = arith.mulf %315, %314 : vector<8x128xf32>
    %320 = arith.addf %318, %319 : vector<8x128xf32>
    %321 = math.tanh %320 : vector<8x128xf32>
    %322 = arith.mulf %317, %321 : vector<8x128xf32>
    %c56_106 = arith.constant 56 : index
    %c0_107 = arith.constant 0 : index
    %323 = vector.load %arg14[%c56_106, %c0_107] : memref<64x512xf32, #tpu.memory_space<vmem>>, vector<8x512xf32>
    %cst_108 = arith.constant dense<0.000000e+00> : vector<8x512xf32>
    %324 = tpu.matmul %322, %185, %cst_108 {dimension_numbers = #tpu.dot_dimension_numbers<[1], [0], [0], [1], [0, 0, 1, 1], [], []>} : vector<8x128xf32>, vector<128x512xf32>, vector<8x512xf32> -> vector<8x512xf32>
    %325 = arith.addf %323, %324 : vector<8x512xf32>
    %326 = vector.extract_strided_slice %325 {offsets = [0, 0], sizes = [8, 384], strides = [1, 1]} : vector<8x512xf32> to vector<8x384xf32>
    %327 = arith.negf %326 : vector<8x384xf32>
    %328 = math.exp %327 : vector<8x384xf32>
    %cst_109 = arith.constant 1.000000e+00 : f32
    %329 = vector.broadcast %cst_109 : f32 to vector<8x384xf32>
    %330 = arith.addf %329, %328 : vector<8x384xf32>
    %331 = arith.divf %329, %330 : vector<8x384xf32>
    %332 = vector.extract_strided_slice %325 {offsets = [0, 384], sizes = [8, 128], strides = [1, 1]} : vector<8x512xf32> to vector<8x128xf32>
    %333 = math.tanh %332 : vector<8x128xf32>
    %334 = vector.extract_strided_slice %331 {offsets = [0, 0], sizes = [8, 128], strides = [1, 1]} : vector<8x384xf32> to vector<8x128xf32>
    %335 = vector.extract_strided_slice %331 {offsets = [0, 128], sizes = [8, 128], strides = [1, 1]} : vector<8x384xf32> to vector<8x128xf32>
    %336 = vector.extract_strided_slice %331 {offsets = [0, 256], sizes = [8, 128], strides = [1, 1]} : vector<8x384xf32> to vector<8x128xf32>
    %337 = arith.mulf %335, %320 : vector<8x128xf32>
    %338 = arith.mulf %334, %333 : vector<8x128xf32>
    %339 = arith.addf %337, %338 : vector<8x128xf32>
    %340 = math.tanh %339 : vector<8x128xf32>
    %341 = arith.mulf %336, %340 : vector<8x128xf32>
    %c1_110 = arith.constant 1 : index
    %c0_111 = arith.constant 0 : index
    %c0_112 = arith.constant 0 : index
    %342 = vector.load %arg12[%c1_110, %c0_111, %c0_112] : memref<2x8x128xf32, #tpu.memory_space<vmem>>, vector<1x8x128xf32>
    %343 = vector.shape_cast %342 : vector<1x8x128xf32> to vector<8x128xf32>
    %344 = vector.shape_cast %341 : vector<8x128xf32> to vector<1x8x128xf32>
    tpu.vector_store %arg12[%c1_110, %c0_111, %c0_112], %344 {strides = array<i32>} : memref<2x8x128xf32, #tpu.memory_space<vmem>>, vector<1x8x128xf32>,
    %c1_113 = arith.constant 1 : index
    %c0_114 = arith.constant 0 : index
    %c0_115 = arith.constant 0 : index
    %345 = vector.load %arg13[%c1_113, %c0_114, %c0_115] : memref<2x8x128xf32, #tpu.memory_space<vmem>>, vector<1x8x128xf32>
    %346 = vector.shape_cast %345 : vector<1x8x128xf32> to vector<8x128xf32>
    %347 = vector.shape_cast %339 : vector<8x128xf32> to vector<1x8x128xf32>
    tpu.vector_store %arg13[%c1_113, %c0_114, %c0_115], %347 {strides = array<i32>} : memref<2x8x128xf32, #tpu.memory_space<vmem>>, vector<1x8x128xf32>,
    %c0_116 = arith.constant 0 : index
    %c0_117 = arith.constant 0 : index
    %348 = vector.load %arg9[%c0_116, %c0_117] : memref<1x128xf32, #tpu.memory_space<vmem>>, vector<1x128xf32>
    %349 = vector.broadcast %348 : vector<1x128xf32> to vector<8x128xf32>
    %350 = arith.mulf %341, %349 : vector<8x128xf32>
    %cst_118 = arith.constant dense<0.000000e+00> : vector<8xf32>
    %351 = vector.multi_reduction <add>, %350, %cst_118 [1] : vector<8x128xf32> to vector<8xf32>
    %352 = vector.shape_cast %351 : vector<8xf32> to vector<8x1xf32>
    %c0_119 = arith.constant 0 : index
    %c0_120 = arith.constant 0 : index
    %353 = vector.load %arg10[%c0_119, %c0_120] : memref<1x1xf32, #tpu.memory_space<vmem>>, vector<1x1xf32>
    %354 = vector.broadcast %353 : vector<1x1xf32> to vector<8x1xf32>
    %355 = arith.addf %352, %354 : vector<8x1xf32>
    %c0_121 = arith.constant 0 : index
    %c0_122 = arith.constant 0 : index
    %356 = vector.load %arg11[%c0_121, %c0_122] : memref<8x1xf32, #tpu.memory_space<vmem>>, vector<8x1xf32>
    tpu.vector_store %arg11[%c0_121, %c0_122], %355 {strides = array<i32>} : memref<8x1xf32, #tpu.memory_space<vmem>>, vector<8x1xf32>,
    return
  }
}

</mosaic_0001>

<bundles_post_ra>
// kernel: lstm_module_forward.1
= control target key start
LH: loop header
LB: loop body
LE: loop exit
PB: predicated region body
PF: predicated region fallthrough
CT: control target
= control target key end

     0   :  { %v7239_v3 = vmov 0.0   ;;  %vm81_vm0 = vcmask 130048   ;;  %vm3666_vm1 = vcmask 7168   ;;  %s7225_s3 = inlined_call_operand.vmem [shape: f32[16,512], index: 3, kind: input, shape index: {}]   ;;  %s7226_s0 = inlined_call_operand.vmem [shape: f32[64,16], index: 0, kind: input, shape index: {}]   ;;  %s7227_s4 = inlined_call_operand.vmem [shape: f32[128,512], index: 4, kind: input, shape index: {}]   ;;  %s7228_s1 = inlined_call_operand.vmem [shape: f32[2,8,128], index: 1, kind: input, shape index: {}]   ;;  %s7229_s5 = inlined_call_operand.vmem [shape: f32[1,512], index: 5, kind: input, shape index: {}]   ;;  %s7230_s2 = inlined_call_operand.vmem [shape: f32[2,8,128], index: 2, kind: input, shape index: {}]   ;;  %s7231_s6 = inlined_call_operand.vmem [shape: f32[128,512], index: 6, kind: input, shape index: {}]   ;;  %s7232_s7 = inlined_call_operand.vmem [shape: f32[128,512], index: 7, kind: input, shape index: {}]   ;;  %s7233_s13 = inlined_call_operand.vmem [shape: f32[2,8,128], index: 13, kind: output, shape index: {2}]   ;;  %s7234_s12 = inlined_call_operand.vmem [shape: f32[2,8,128], index: 12, kind: output, shape index: {1}]   ;;  %s7235_s8 = inlined_call_operand.vmem [shape: f32[1,512], index: 8, kind: input, shape index: {}]   ;;  %s7236_s10 = inlined_call_operand.<no memory space> [shape: f32[1,1], index: 10, kind: input, shape index: {}]   ;;  %s7237_s9 = inlined_call_operand.vmem [shape: f32[1,128], index: 9, kind: input, shape index: {}]   ;;  %s7238_s11 = inlined_call_operand.vmem [shape: f32[8,1], index: 11, kind: output, shape index: {0}]  }
   0x1   :  { %v56_v0 = vld [vmem:[%s7225_s3 + $0x28] sm:$0xff]  ;;  %v58_v1 = vld [vmem:[%s7225_s3 + $0x38] sm:$0xff]  ;;  %v55_v2 = vld [vmem:[%s7225_s3 + $0x20] sm:$0xff]  ;;  %170 = vmatprep.mubr.f32.mxu0 %v7239_v3  ;;  %283 = vmatprep.mubr.f32.mxu1 %v7239_v3 }
   0x2   :  { %134 = vmatprep.subr.mxu0 %v56_v0  ;;  %247 = vmatprep.subr.mxu1 %v58_v1  ;;  %v57_v4 = vld [vmem:[%s7225_s3 + $0x30] sm:$0xff]  ;;  %v52_v5 = vld [vmem:[%s7225_s3 + $0x8] sm:$0xff]  ;;  %v54_v6 = vld [vmem:[%s7225_s3 + $0x18] sm:$0xff] }
   0x3   :  { %135 = vmatpush1.msra.mxu0 %v55_v2  ;;  %248 = vmatpush1.msra.mxu1 %v57_v4  ;;  %v51_v7 = vld [vmem:[%s7225_s3] sm:$0xff]  ;;  %v53_v8 = vld [vmem:[%s7225_s3 + $0x10] sm:$0xff]  ;;  %v4238_v10 = vld [vmem:[%s7227_s4 + $0x1e8] sm:$0xff] }
   0x4   :  { %v43_v9 = vld [vmem:[%s7226_s0] sm:$0xff]  ;;  %136 = vmatprep.subr.mxu0 %v52_v5  ;;  %249 = vmatprep.subr.mxu1 %v54_v6  ;;  %7445 = vst [vmem:[#allocation5_spill] sm:$0xff] %v4238_v10  ;;  %v4243_v11 = vld [vmem:[%s7227_s4 + $0x1f8] sm:$0xff]  ;;  %v4253_v13 = vld [vmem:[%s7227_s4 + $0x1f0] sm:$0xff] }
   0x5   :  { %7446 = vst [vmem:[#allocation6_spill] sm:$0xff] %v4243_v11  ;;  %137 = vmatpush1.msra.mxu0 %v51_v7  ;;  %250 = vmatpush1.msra.mxu1 %v53_v8  ;;  %v4248_v12 = vld [vmem:[%s7227_s4 + $0x1e0] sm:$0xff]  ;;  %v4260_v14 = vld [vmem:[%s7227_s4 + $0x1c8] sm:$0xff]  ;;  %v4265_v15 = vld [vmem:[%s7227_s4 + $0x1d8] sm:$0xff] }
   0x6   :  { %3680 = vmatmul.mubr.msk.f32.vlgmr.msra.gmra.mxu0 %vm81_vm0, %v43_v9  ;;  %3688 = vmatmul.mubr.msk.f32.vlgmr.msra.gmra.mxu1 %vm81_vm0, %v43_v9  ;;  %v4274_v16 = vld [vmem:[%s7227_s4 + $0x1c0] sm:$0xff]  ;;  %v4279_v17 = vld [vmem:[%s7227_s4 + $0x1d0] sm:$0xff]  ;;  %v44_v18 = vld [vmem:[%s7226_s0 + $0x8] sm:$0xff] }
   0x7   :  { %434 = vmatprep.subr.mxu0 %v4238_v10  ;;  %505 = vmatprep.subr.mxu1 %v4243_v11  ;;  %v4291_v19 = vld [vmem:[%s7227_s4 + $0x1a8] sm:$0xff]  ;;  %v4296_v20 = vld [vmem:[%s7227_s4 + $0x1b8] sm:$0xff]  ;;  %v4303_v21 = vld [vmem:[%s7227_s4 + $0x1a0] sm:$0xff] }
   0x8   :  { %435 = vmatpush1.msra.mxu0 %v4248_v12  ;;  %506 = vmatpush1.msra.mxu1 %v4253_v13  ;;  %v4308_v22 = vld [vmem:[%s7227_s4 + $0x1b0] sm:$0xff]  ;;  %v4315_v23 = vld [vmem:[%s7227_s4 + $0x188] sm:$0xff]  ;;  %v4320_v24 = vld [vmem:[%s7227_s4 + $0x198] sm:$0xff] }
   0x9   :  { %436 = vmatprep.subr.mxu0 %v4260_v14  ;;  %507 = vmatprep.subr.mxu1 %v4265_v15  ;;  %v4329_v25 = vld [vmem:[%s7227_s4 + $0x180] sm:$0xff]  ;;  %v4334_v26 = vld [vmem:[%s7227_s4 + $0x190] sm:$0xff]  ;;  %v4346_v28 = vld [vmem:[%s7227_s4 + $0x168] sm:$0xff] }
   0xa   :  { %176 = vmatprep.mubr.f32.mxu0 %v7239_v3  ;;  %289 = vmatprep.mubr.f32.mxu1 %v7239_v3  ;;  %v45_v27 = vld [vmem:[%s7226_s0 + $0x10] sm:$0xff]  ;;  %v4351_v29 = vld [vmem:[%s7227_s4 + $0x178] sm:$0xff]  ;;  %v4358_v30 = vld [vmem:[%s7227_s4 + $0x160] sm:$0xff] }
   0xb   :  { %437 = vmatpush1.msra.mxu0 %v4274_v16  ;;  %508 = vmatpush1.msra.mxu1 %v4279_v17  ;;  %v4363_v31 = vld [vmem:[%s7227_s4 + $0x170] sm:$0xff]  ;;  %v4370_v32 = vld [vmem:[%s7227_s4 + $0x148] sm:$0xff]  ;;  %v4375_v33 = vld [vmem:[%s7227_s4 + $0x158] sm:$0xff] }
   0xc   :  { %3681 = vmatmul.mubr.msk.f32.gmra.mxu0 %vm81_vm0, %v44_v18  ;;  %3689 = vmatmul.mubr.msk.f32.gmra.mxu1 %vm81_vm0, %v44_v18  ;;  %v4384_v34 = vld [vmem:[%s7227_s4 + $0x140] sm:$0xff]  ;;  %v4389_v35 = vld [vmem:[%s7227_s4 + $0x150] sm:$0xff]  ;;  %v46_v36 = vld [vmem:[%s7226_s0 + $0x18] sm:$0xff] }
   0xd   :  { %438 = vmatprep.subr.mxu0 %v4291_v19  ;;  %509 = vmatprep.subr.mxu1 %v4296_v20  ;;  %v4401_v37 = vld [vmem:[%s7227_s4 + $0x128] sm:$0xff]  ;;  %v4406_v38 = vld [vmem:[%s7227_s4 + $0x138] sm:$0xff]  ;;  %v4413_v39 = vld [vmem:[%s7227_s4 + $0x120] sm:$0xff] }
   0xe   :  { %439 = vmatpush1.msra.mxu0 %v4303_v21  ;;  %510 = vmatpush1.msra.mxu1 %v4308_v22  ;;  %v4418_v40 = vld [vmem:[%s7227_s4 + $0x130] sm:$0xff]  ;;  %v4425_v41 = vld [vmem:[%s7227_s4 + $0x108] sm:$0xff]  ;;  %v4430_v42 = vld [vmem:[%s7227_s4 + $0x118] sm:$0xff] }
   0xf   :  { %440 = vmatprep.subr.mxu0 %v4315_v23  ;;  %511 = vmatprep.subr.mxu1 %v4320_v24  ;;  %v4439_v43 = vld [vmem:[%s7227_s4 + $0x100] sm:$0xff]  ;;  %v4444_v44 = vld [vmem:[%s7227_s4 + $0x110] sm:$0xff]  ;;  %v4456_v46 = vld [vmem:[%s7227_s4 + $0xe8] sm:$0xff] }
  0x10   :  { %182 = vmatprep.mubr.f32.mxu0 %v7239_v3  ;;  %295 = vmatprep.mubr.f32.mxu1 %v7239_v3  ;;  %v47_v45 = vld [vmem:[%s7226_s0 + $0x20] sm:$0xff]  ;;  %v4461_v47 = vld [vmem:[%s7227_s4 + $0xf8] sm:$0xff]  ;;  %v4473_v49 = vld [vmem:[%s7227_s4 + $0xf0] sm:$0xff] }
  0x11   :  { %441 = vmatpush1.msra.mxu0 %v4329_v25  ;;  %512 = vmatpush1.msra.mxu1 %v4334_v26  ;;  %v4468_v48 = vld [vmem:[%s7227_s4 + $0xe0] sm:$0xff]  ;;  %v4480_v50 = vld [vmem:[%s7227_s4 + $0xc8] sm:$0xff]  ;;  %v4485_v51 = vld [vmem:[%s7227_s4 + $0xd8] sm:$0xff] }
  0x12   :  { %3682 = vmatmul.mubr.msk.f32.gmra.mxu0 %vm81_vm0, %v45_v27  ;;  %3690 = vmatmul.mubr.msk.f32.gmra.mxu1 %vm81_vm0, %v45_v27  ;;  %v4494_v52 = vld [vmem:[%s7227_s4 + $0xc0] sm:$0xff]  ;;  %v4499_v53 = vld [vmem:[%s7227_s4 + $0xd0] sm:$0xff]  ;;  %v48_v54 = vld [vmem:[%s7226_s0 + $0x28] sm:$0xff] }
  0x13   :  { %442 = vmatprep.subr.mxu0 %v4346_v28  ;;  %513 = vmatprep.subr.mxu1 %v4351_v29  ;;  %v4511_v55 = vld [vmem:[%s7227_s4 + $0xa8] sm:$0xff]  ;;  %v4516_v56 = vld [vmem:[%s7227_s4 + $0xb8] sm:$0xff]  ;;  %v4523_v57 = vld [vmem:[%s7227_s4 + $0xa0] sm:$0xff] }
  0x14   :  { %443 = vmatpush1.msra.mxu0 %v4358_v30  ;;  %514 = vmatpush1.msra.mxu1 %v4363_v31  ;;  %v4528_v58 = vld [vmem:[%s7227_s4 + $0xb0] sm:$0xff]  ;;  %v4535_v59 = vld [vmem:[%s7227_s4 + $0x88] sm:$0xff]  ;;  %v4540_v60 = vld [vmem:[%s7227_s4 + $0x98] sm:$0xff] }
  0x15   :  { %444 = vmatprep.subr.mxu0 %v4370_v32  ;;  %515 = vmatprep.subr.mxu1 %v4375_v33  ;;  %7447 = vst [vmem:[#allocation7_spill] sm:$0xff] %v4528_v58  ;;  %7448 = vst [vmem:[#allocation8_spill] sm:$0xff] %v4535_v59  ;;  %v4549_v61 = vld [vmem:[%s7227_s4 + $0x80] sm:$0xff]  ;;  %v4554_v62 = vld [vmem:[%s7227_s4 + $0x90] sm:$0xff] }
  0x16   :  { %188 = vmatprep.mubr.f32.mxu0 %v7239_v3  ;;  %301 = vmatprep.mubr.f32.mxu1 %v7239_v3  ;;  %7449 = vst [vmem:[#allocation9_spill] sm:$0xff] %v4540_v60  ;;  %7450 = vst [vmem:[#allocation10_spill] sm:$0xff] %v4549_v61  ;;  %v49_v63 = vld [vmem:[%s7226_s0 + $0x30] sm:$0xff]  ;;  %v4566_v0 = vld [vmem:[%s7227_s4 + $0x68] sm:$0xff] }
  0x17   :  { %445 = vmatpush1.msra.mxu0 %v4384_v34  ;;  %516 = vmatpush1.msra.mxu1 %v4389_v35  ;;  %7451 = vst [vmem:[#allocation11_spill] sm:$0xff] %v4554_v62  ;;  %7452 = vst [vmem:[#allocation12_spill] sm:$0xff] %v4566_v0  ;;  %v4571_v1 = vld [vmem:[%s7227_s4 + $0x78] sm:$0xff]  ;;  %v4578_v2 = vld [vmem:[%s7227_s4 + $0x60] sm:$0xff] }
  0x18   :  { %3683 = vmatmul.mubr.msk.f32.gmra.mxu0 %vm81_vm0, %v46_v36  ;;  %3691 = vmatmul.mubr.msk.f32.gmra.mxu1 %vm81_vm0, %v46_v36  ;;  %7453 = vst [vmem:[#allocation13_spill] sm:$0xff] %v4571_v1  ;;  %7454 = vst [vmem:[#allocation14_spill] sm:$0xff] %v4578_v2  ;;  %v4583_v4 = vld [vmem:[%s7227_s4 + $0x70] sm:$0xff]  ;;  %v4590_v5 = vld [vmem:[%s7227_s4 + $0x48] sm:$0xff] }
  0x19   :  { %446 = vmatprep.subr.mxu0 %v4401_v37  ;;  %517 = vmatprep.subr.mxu1 %v4406_v38  ;;  %7455 = vst [vmem:[#allocation15_spill] sm:$0xff] %v4583_v4  ;;  %7456 = vst [vmem:[#allocation16_spill] sm:$0xff] %v4590_v5  ;;  %v4595_v6 = vld [vmem:[%s7227_s4 + $0x58] sm:$0xff]  ;;  %v4604_v7 = vld [vmem:[%s7227_s4 + $0x40] sm:$0xff] }
  0x1a   :  { %447 = vmatpush1.msra.mxu0 %v4413_v39  ;;  %518 = vmatpush1.msra.mxu1 %v4418_v40  ;;  %7457 = vst [vmem:[#allocation17_spill] sm:$0xff] %v4595_v6  ;;  %7458 = vst [vmem:[#allocation18_spill] sm:$0xff] %v4604_v7  ;;  %v4609_v8 = vld [vmem:[%s7227_s4 + $0x50] sm:$0xff]  ;;  %v50_v9 = vld [vmem:[%s7226_s0 + $0x38] sm:$0xff] }
  0x1b   :  { %448 = vmatprep.subr.mxu0 %v4425_v41  ;;  %519 = vmatprep.subr.mxu1 %v4430_v42  ;;  %7459 = vst [vmem:[#allocation19_spill] sm:$0xff] %v4609_v8  ;;  %v4621_v18 = vld [vmem:[%s7227_s4 + $0x28] sm:$0xff]  ;;  %v4626_v27 = vld [vmem:[%s7227_s4 + $0x38] sm:$0xff]  ;;  %v4633_v36 = vld [vmem:[%s7227_s4 + $0x20] sm:$0xff] }
  0x1c   :  { %194 = vmatprep.mubr.f32.mxu0 %v7239_v3  ;;  %307 = vmatprep.mubr.f32.mxu1 %v7239_v3  ;;  %7460 = vst [vmem:[#allocation20_spill] sm:$0xff] %v4621_v18  ;;  %7461 = vst [vmem:[#allocation21_spill] sm:$0xff] %v4626_v27 }
  0x1d   :  { %449 = vmatpush1.msra.mxu0 %v4439_v43  ;;  %520 = vmatpush1.msra.mxu1 %v4444_v44  ;;  %7462 = vst [vmem:[#allocation22_spill] sm:$0xff] %v4633_v36 }
  0x1e   :  { %3684 = vmatmul.mubr.msk.f32.gmra.mxu0 %vm81_vm0, %v47_v45  ;;  %3692 = vmatmul.mubr.msk.f32.gmra.mxu1 %vm81_vm0, %v47_v45  ;;  %v4638_v45 = vld [vmem:[%s7227_s4 + $0x30] sm:$0xff] }
  0x1f   :  { %450 = vmatprep.subr.mxu0 %v4456_v46  ;;  %521 = vmatprep.subr.mxu1 %v4461_v47  ;;  %7463 = vst [vmem:[#allocation23_spill] sm:$0xff] %v4638_v45 }
  0x20   :  { %451 = vmatpush1.msra.mxu0 %v4468_v48  ;;  %522 = vmatpush1.msra.mxu1 %v4473_v49 }
  0x21   :  { %452 = vmatprep.subr.mxu0 %v4480_v50  ;;  %523 = vmatprep.subr.mxu1 %v4485_v51 }
  0x22   :  { %200 = vmatprep.mubr.f32.mxu0 %v7239_v3  ;;  %313 = vmatprep.mubr.f32.mxu1 %v7239_v3 }
  0x23   :  { %453 = vmatpush1.msra.mxu0 %v4494_v52  ;;  %524 = vmatpush1.msra.mxu1 %v4499_v53 }
  0x24   :  { %3685 = vmatmul.mubr.msk.f32.gmra.mxu0 %vm81_vm0, %v48_v54  ;;  %3693 = vmatmul.mubr.msk.f32.gmra.mxu1 %vm81_vm0, %v48_v54  ;;  %v4645_v54 = vld [vmem:[%s7227_s4 + $0x8] sm:$0xff] }
  0x25   :  { %454 = vmatprep.subr.mxu0 %v4511_v55  ;;  %525 = vmatprep.subr.mxu1 %v4516_v56  ;;  %7464 = vst [vmem:[#allocation24_spill] sm:$0xff] %v4645_v54 }
  0x26   :  { %455 = vmatpush1.msra.mxu0 %v4523_v57  ;;  %526 = vmatpush1.msra.mxu1 %v4528_v58 }
  0x27   :  { %456 = vmatprep.subr.mxu0 %v4535_v59  ;;  %527 = vmatprep.subr.mxu1 %v4540_v60 }
  0x28   :  { %206 = vmatprep.mubr.f32.mxu0 %v7239_v3  ;;  %319 = vmatprep.mubr.f32.mxu1 %v7239_v3 }
  0x29   :  { %457 = vmatpush1.msra.mxu0 %v4549_v61  ;;  %528 = vmatpush1.msra.mxu1 %v4554_v62 }
  0x2a   :  { %3686 = vmatmul.mubr.msk.f32.gmra.mxu0 %vm81_vm0, %v49_v63  ;;  %3694 = vmatmul.mubr.msk.f32.gmra.mxu1 %vm81_vm0, %v49_v63  ;;  %v4650_v63 = vld [vmem:[%s7227_s4 + $0x18] sm:$0xff] }
  0x2b   :  { %458 = vmatprep.subr.mxu0 %v4566_v0  ;;  %529 = vmatprep.subr.mxu1 %v4571_v1  ;;  %7465 = vst [vmem:[#allocation25_spill] sm:$0xff] %v4650_v63 }
  0x2c   :  { %459 = vmatpush1.msra.mxu0 %v4578_v2  ;;  %530 = vmatpush1.msra.mxu1 %v4583_v4 }
  0x2d   :  { %460 = vmatprep.subr.mxu0 %v4590_v5  ;;  %531 = vmatprep.subr.mxu1 %v4595_v6 }
  0x2e   :  { %212 = vmatprep.mubr.f32.mxu0 %v7239_v3  ;;  %325 = vmatprep.mubr.f32.mxu1 %v7239_v3  ;;  %v4657_v3 = vld [vmem:[%s7227_s4] sm:$0xff] }
  0x2f   :  { %461 = vmatpush1.msra.mxu0 %v4604_v7  ;;  %532 = vmatpush1.msra.mxu1 %v4609_v8  ;;  %7466 = vst [vmem:[#allocation26_spill] sm:$0xff] %v4657_v3 }
  0x30   :  { %3687 = vmatmul.mubr.msk.f32.gmra.mxu0 %vm81_vm0, %v50_v9  ;;  %3695 = vmatmul.mubr.msk.f32.gmra.mxu1 %vm81_vm0, %v50_v9  ;;  %v4664_v9 = vld [vmem:[%s7227_s4 + $0x10] sm:$0xff] }
  0x31   :  { %462 = vmatprep.subr.mxu0 %v4621_v18  ;;  %533 = vmatprep.subr.mxu1 %v4626_v27  ;;  %7467 = vst [vmem:[#allocation27_spill] sm:$0xff] %v4664_v9  ;;  %v428_v27 = vld [vmem:[%s7228_s1] sm:$0xff]  ;;  %v7468_v18 = vmov 0.0  }
  0x32   :  { %463 = vmatpush1.msra.mxu0 %v4633_v36  ;;  %534 = vmatpush1.msra.mxu1 %v4638_v45 }
  0x33   :  { %464 = vmatprep.subr.mxu0 %v4645_v54  ;;  %535 = vmatprep.subr.mxu1 %v4650_v63 }
  0x34   :  { %465 = vmatpush1.msra.mxu0 %v4657_v3  ;;  %498 = vmatprep.mubr.f32.mxu0 %v7468_v18 }
  0x35   :  { %536 = vmatpush1.msra.mxu1 %v4664_v9  ;;  %569 = vmatprep.mubr.f32.mxu1 %v7468_v18 }
  0x36   :  { %499 = vmatmul.mubr.f32.vlgmr.msra.gmra.mxu0 %v428_v27  ;;  %570 = vmatmul.mubr.f32.vlgmr.msra.gmra.mxu1 %v428_v27  ;;  %v7469_v27 = vld [vmem:[#allocation20_spill] sm:$0xff] }
  0x37   :  { %609 = vmatprep.subr.mxu0 %v4238_v10  ;;  %680 = vmatprep.subr.mxu1 %v4243_v11 }
  0x38   :  { %610 = vmatpush1.msra.mxu0 %v4248_v12  ;;  %681 = vmatpush1.msra.mxu1 %v4253_v13 }
  0x39   :  { %611 = vmatprep.subr.mxu0 %v4260_v14  ;;  %682 = vmatprep.subr.mxu1 %v4265_v15 }
  0x3a   :  { %612 = vmatpush1.msra.mxu0 %v4274_v16  ;;  %683 = vmatpush1.msra.mxu1 %v4279_v17 }
  0x3b   :  { %613 = vmatprep.subr.mxu0 %v4291_v19  ;;  %684 = vmatprep.subr.mxu1 %v4296_v20 }
  0x3c   :  { %614 = vmatpush1.msra.mxu0 %v4303_v21  ;;  %685 = vmatpush1.msra.mxu1 %v4308_v22 }
  0x3d   :  { %615 = vmatprep.subr.mxu0 %v4315_v23  ;;  %686 = vmatprep.subr.mxu1 %v4320_v24 }
  0x3e   :  { %616 = vmatpush1.msra.mxu0 %v4329_v25  ;;  %687 = vmatpush1.msra.mxu1 %v4334_v26 }
  0x3f   :  { %617 = vmatprep.subr.mxu0 %v4346_v28  ;;  %688 = vmatprep.subr.mxu1 %v4351_v29 }
  0x40   :  { %618 = vmatpush1.msra.mxu0 %v4358_v30  ;;  %689 = vmatpush1.msra.mxu1 %v4363_v31 }
  0x41   :  { %619 = vmatprep.subr.mxu0 %v4370_v32  ;;  %690 = vmatprep.subr.mxu1 %v4375_v33 }
  0x42   :  { %620 = vmatpush1.msra.mxu0 %v4384_v34  ;;  %691 = vmatpush1.msra.mxu1 %v4389_v35 }
  0x43   :  { %621 = vmatprep.subr.mxu0 %v4401_v37  ;;  %692 = vmatprep.subr.mxu1 %v4406_v38 }
  0x44   :  { %622 = vmatpush1.msra.mxu0 %v4413_v39  ;;  %693 = vmatpush1.msra.mxu1 %v4418_v40 }
  0x45   :  { %623 = vmatprep.subr.mxu0 %v4425_v41  ;;  %694 = vmatprep.subr.mxu1 %v4430_v42 }
  0x46   :  { %624 = vmatpush1.msra.mxu0 %v4439_v43  ;;  %695 = vmatpush1.msra.mxu1 %v4444_v44 }
  0x47   :  { %625 = vmatprep.subr.mxu0 %v4456_v46  ;;  %696 = vmatprep.subr.mxu1 %v4461_v47 }
  0x48   :  { %626 = vmatpush1.msra.mxu0 %v4468_v48  ;;  %697 = vmatpush1.msra.mxu1 %v4473_v49 }
  0x49   :  { %627 = vmatprep.subr.mxu0 %v4480_v50  ;;  %698 = vmatprep.subr.mxu1 %v4485_v51 }
  0x4a   :  { %628 = vmatpush1.msra.mxu0 %v4494_v52  ;;  %699 = vmatpush1.msra.mxu1 %v4499_v53 }
  0x4b   :  { %629 = vmatprep.subr.mxu0 %v4511_v55  ;;  %700 = vmatprep.subr.mxu1 %v4516_v56 }
  0x4c   :  { %630 = vmatpush1.msra.mxu0 %v4523_v57  ;;  %701 = vmatpush1.msra.mxu1 %v4528_v58 }
  0x4d   :  { %631 = vmatprep.subr.mxu0 %v4535_v59  ;;  %702 = vmatprep.subr.mxu1 %v4540_v60 }
  0x4e   :  { %632 = vmatpush1.msra.mxu0 %v4549_v61  ;;  %703 = vmatpush1.msra.mxu1 %v4554_v62  ;;  %v7470_v61 = vld [vmem:[#allocation21_spill] sm:$0xff] }
  0x4f   :  { %633 = vmatprep.subr.mxu0 %v4566_v0  ;;  %704 = vmatprep.subr.mxu1 %v4571_v1 }
  0x50   :  { %634 = vmatpush1.msra.mxu0 %v4578_v2  ;;  %705 = vmatpush1.msra.mxu1 %v4583_v4 }
  0x51   :  { %635 = vmatprep.subr.mxu0 %v4590_v5  ;;  %706 = vmatprep.subr.mxu1 %v4595_v6 }
  0x52   :  { %636 = vmatpush1.msra.mxu0 %v4604_v7  ;;  %707 = vmatpush1.msra.mxu1 %v4609_v8 }
  0x53   :  { %637 = vmatprep.subr.mxu0 %v7469_v27  ;;  %708 = vmatprep.subr.mxu1 %v7470_v61  ;;  %v61_v61 = vlaneseq }
  0x54   :  { %638 = vmatpush1.msra.mxu0 %v4633_v36  ;;  %709 = vmatpush1.msra.mxu1 %v4638_v45 }
  0x55   :  { %639 = vmatprep.subr.mxu0 %v4645_v54  ;;  %710 = vmatprep.subr.mxu1 %v4650_v63  ;;  %v4743_v36 = vshrl.u32 %v61_v61, 7 }
  0x56   :  { %640 = vmatpush1.msra.mxu0 %v4657_v3  ;;  %673 = vmatprep.mubr.f32.mxu0 %v7468_v18 }
  0x57   :  { %711 = vmatpush1.msra.mxu1 %v4664_v9  ;;  %744 = vmatprep.mubr.f32.mxu1 %v7468_v18  ;;  %7471 = vst [vmem:[#allocation28_spill] sm:$0xff] %v4743_v36  ;;  %v7278_v63 = vsub.s32 0, %v4743_v36  ;;  %v7281_v3 = vsub.s32 2, %v4743_v36  ;;  %v59_v9 = vld [vmem:[%s7229_s5] sm:$0xf]  ;;  %v7289_v61 = vsub.s32 3, %v4743_v36 }
  0x58   :  { %784 = vmatprep.subr.mxu0 %v4238_v10  ;;  %855 = vmatprep.subr.mxu1 %v4243_v11  ;;  %v7288_v11 = vsub.s32 1, %v4743_v36 }
  0x59   :  { %v64_v27 = vrot.slane %v59_v9, %v7278_v63  ;;  %v4764_v8 = vrot.slane %v59_v9, %v7281_v3  ;;  %v4770_v4 = vrot.slane %v59_v9, %v7289_v61 }
  0x5a   :  { %v68_v5 = vrot.slane %v59_v9, %v7288_v11 }
  0xc6   :  { %v4745_v45 = vpop.f32.mrf.mxu0  ;;  %v4747_v54 = vpop.f32.mrf.mxu1 }
  0xc8   :  { %v4754_v18 = vpop.f32.mrf.mxu0  ;;  %v4756_v10 = vpop.f32.mrf.mxu1 }
  0xcc   :  { %v178_v7 = vpop.f32.mrf.mxu0  ;;  %v291_v6 = vpop.f32.mrf.mxu1 }
  0xcd   :  { %v4772_v2 = vadd.f32 %v178_v7, %v64_v27  ;;  %v4775_v1 = vadd.f32 %v291_v6, %v4764_v8 }
  0xce   :  { %v180_v0 = vpop.f32.mrf.mxu0  ;;  %v293_v63 = vpop.f32.mrf.mxu1 }
  0xcf   :  { %7472 = vst [vmem:[#allocation29_spill] sm:$0xff] %v4775_v1  ;;  %v4777_v62 = vadd.f32 %v180_v0, %v68_v5  ;;  %v4780_v3 = vadd.f32 %v293_v63, %v4770_v4 }
  0xd1   :  { %7473 = vst [vmem:[#allocation30_spill] sm:$0xff] %v4777_v62  ;;  %7474 = vst [vmem:[#allocation31_spill] sm:$0xff] %v4780_v3 }
  0xd2   :  { %v184_v60 = vpop.f32.mrf.mxu0  ;;  %v297_v59 = vpop.f32.mrf.mxu1 }
  0xd3   :  { %v4782_v58 = vadd.f32 %v184_v60, %v64_v27  ;;  %v4785_v11 = vadd.f32 %v297_v59, %v4764_v8 }
  0xd4   :  { %v186_v9 = vpop.f32.mrf.mxu0  ;;  %v299_v7 = vpop.f32.mrf.mxu1 }
  0xd5   :  { %7475 = vst [vmem:[#allocation32_spill] sm:$0xff] %v4782_v58  ;;  %7476 = vst [vmem:[#allocation33_spill] sm:$0xff] %v4785_v11  ;;  %v4787_v61 = vadd.f32 %v186_v9, %v68_v5  ;;  %v4790_v6 = vadd.f32 %v299_v7, %v4770_v4 }
  0xd7   :  { %7477 = vst [vmem:[#allocation34_spill] sm:$0xff] %v4787_v61  ;;  %7478 = vst [vmem:[#allocation35_spill] sm:$0xff] %v4790_v6 }
  0xd8   :  { %v190_v36 = vpop.f32.mrf.mxu0  ;;  %v303_v0 = vpop.f32.mrf.mxu1 }
  0xd9   :  { %v4792_v1 = vadd.f32 %v190_v36, %v64_v27  ;;  %v4795_v63 = vadd.f32 %v303_v0, %v4764_v8 }
  0xda   :  { %v192_v3 = vpop.f32.mrf.mxu0  ;;  %v305_v60 = vpop.f32.mrf.mxu1 }
  0xdb   :  { %7479 = vst [vmem:[#allocation36_spill] sm:$0xff] %v4792_v1  ;;  %7480 = vst [vmem:[#allocation37_spill] sm:$0xff] %v4795_v63  ;;  %v4797_v58 = vadd.f32 %v192_v3, %v68_v5  ;;  %v4800_v59 = vadd.f32 %v305_v60, %v4770_v4 }
  0xdd   :  { %7481 = vst [vmem:[#allocation38_spill] sm:$0xff] %v4797_v58  ;;  %7482 = vst [vmem:[#allocation39_spill] sm:$0xff] %v4800_v59 }
  0xde   :  { %v196_v11 = vpop.f32.mrf.mxu0  ;;  %v309_v9 = vpop.f32.mrf.mxu1 }
  0xdf   :  { %v4802_v61 = vadd.f32 %v196_v11, %v64_v27  ;;  %v4805_v7 = vadd.f32 %v309_v9, %v4764_v8 }
  0xe0   :  { %v198_v6 = vpop.f32.mrf.mxu0  ;;  %v311_v36 = vpop.f32.mrf.mxu1 }
  0xe1   :  { %7483 = vst [vmem:[#allocation40_spill] sm:$0xff] %v4802_v61  ;;  %7484 = vst [vmem:[#allocation41_spill] sm:$0xff] %v4805_v7  ;;  %v4807_v1 = vadd.f32 %v198_v6, %v68_v5  ;;  %v4810_v0 = vadd.f32 %v311_v36, %v4770_v4 }
  0xe3   :  { %7485 = vst [vmem:[#allocation42_spill] sm:$0xff] %v4807_v1  ;;  %7486 = vst [vmem:[#allocation43_spill] sm:$0xff] %v4810_v0 }
  0xe4   :  { %v202_v63 = vpop.f32.mrf.mxu0  ;;  %v315_v3 = vpop.f32.mrf.mxu1 }
  0xe5   :  { %v4812_v58 = vadd.f32 %v202_v63, %v64_v27  ;;  %v4815_v60 = vadd.f32 %v315_v3, %v4764_v8 }
  0xe6   :  { %v204_v59 = vpop.f32.mrf.mxu0  ;;  %v317_v11 = vpop.f32.mrf.mxu1 }
  0xe7   :  { %7487 = vst [vmem:[#allocation44_spill] sm:$0xff] %v4812_v58  ;;  %7488 = vst [vmem:[#allocation45_spill] sm:$0xff] %v4815_v60  ;;  %v4817_v61 = vadd.f32 %v204_v59, %v68_v5  ;;  %v4820_v9 = vadd.f32 %v317_v11, %v4770_v4 }
  0xe9   :  { %7489 = vst [vmem:[#allocation46_spill] sm:$0xff] %v4817_v61  ;;  %7490 = vst [vmem:[#allocation47_spill] sm:$0xff] %v4820_v9 }
  0xea   :  { %v208_v7 = vpop.f32.mrf.mxu0  ;;  %v321_v6 = vpop.f32.mrf.mxu1 }
  0xeb   :  { %v4822_v1 = vadd.f32 %v208_v7, %v64_v27  ;;  %v4825_v36 = vadd.f32 %v321_v6, %v4764_v8 }
  0xec   :  { %v210_v0 = vpop.f32.mrf.mxu0  ;;  %v323_v63 = vpop.f32.mrf.mxu1 }
  0xed   :  { %7491 = vst [vmem:[#allocation48_spill] sm:$0xff] %v4822_v1  ;;  %7492 = vst [vmem:[#allocation49_spill] sm:$0xff] %v4825_v36  ;;  %v4827_v58 = vadd.f32 %v210_v0, %v68_v5  ;;  %v4830_v3 = vadd.f32 %v323_v63, %v4770_v4  ;;  %v173_v0 = vadd.f32 %v4745_v45, %v64_v27 }
  0xee   :  { %v175_v63 = vadd.f32 %v4754_v18, %v68_v5 }
  0xef   :  { %7493 = vst [vmem:[#allocation50_spill] sm:$0xff] %v4827_v58  ;;  %7494 = vst [vmem:[#allocation51_spill] sm:$0xff] %v4830_v3 }
  0xf0   :  { %v214_v60 = vpop.f32.mrf.mxu0  ;;  %v327_v59 = vpop.f32.mrf.mxu1 }
  0xf1   :  { %v4832_v61 = vadd.f32 %v214_v60, %v64_v27  ;;  %v4835_v11 = vadd.f32 %v327_v59, %v4764_v8 }
  0xf2   :  { %v216_v9 = vpop.f32.mrf.mxu0  ;;  %v329_v7 = vpop.f32.mrf.mxu1 }
  0xf3   :  { %7495 = vst [vmem:[#allocation52_spill] sm:$0xff] %v4832_v61  ;;  %7496 = vst [vmem:[#allocation53_spill] sm:$0xff] %v4835_v11  ;;  %v4837_v1 = vadd.f32 %v216_v9, %v68_v5  ;;  %v4840_v6 = vadd.f32 %v329_v7, %v4770_v4  ;;  %v286_v9 = vadd.f32 %v4747_v54, %v4764_v8  ;;  %v429_v8 = vld [vmem:[%s7230_s2] sm:$0xff] }
  0xf4   :  { %v288_v7 = vadd.f32 %v4756_v10, %v4770_v4 }
  0xf5   :  { %7497 = vst [vmem:[#allocation54_spill] sm:$0xff] %v4837_v1  ;;  %7498 = vst [vmem:[#allocation55_spill] sm:$0xff] %v4840_v6 }
  0xf6   :  { %v500_v36 = vpop.f32.mrf.mxu0  ;;  %v571_v59 = vpop.f32.mrf.mxu1 }
  0xf7   :  { %v576_v3 = vadd.f32 %v500_v36, %v173_v0  ;;  %v578_v11 = vadd.f32 %v571_v59, %v286_v9  ;;  %v7502_v59 = vld [vmem:[#allocation9_spill] sm:$0xff]  ;;  %v7503_v9 = vld [vmem:[#allocation10_spill] sm:$0xff] }
  0xf8   :  { %v502_v58 = vpop.f32.mrf.mxu0  ;;  %v573_v1 = vpop.f32.mrf.mxu1 }
  0xf9   :  { %v3696_v62 = vmul.f32 -1.442695, %v576_v3  ;;  %v577_v60 = vadd.f32 %v502_v58, %v175_v63  ;;  %v3698_v45 = vmul.f32 -1.442695, %v578_v11  ;;  %v579_v6 = vadd.f32 %v573_v1, %v288_v7  ;;  %v7500_v63 = vld [vmem:[#allocation7_spill] sm:$0xff] }
  0xfa   :  { %v7504_v7 = vld [vmem:[#allocation11_spill] sm:$0xff] }
  0xfb   :  { %3751 = vpow2.f32 %v3696_v62  ;;  %v3697_v61 = vmul.f32 -1.442695, %v577_v60  ;;  %v7501_v60 = vld [vmem:[#allocation8_spill] sm:$0xff] }
  0xfd   :  { %3753 = vpow2.f32 %v3697_v61 }
  0xfe   :  { %3755 = vpow2.f32 %v3698_v45  ;;  %v7505_v45 = vld [vmem:[#allocation12_spill] sm:$0xff] }
 0x108   :  { %v3752_v27 = vpop.eup %3751 }
 0x109   :  { %v589_v5 = vadd.f32 1.0, %v3752_v27  ;;  %v7506_v27 = vld [vmem:[#allocation13_spill] sm:$0xff] }
 0x10a   :  { %v3754_v18 = vpop.eup %3753 }
 0x10b   :  { %3757 = vrcp.f32 %v589_v5  ;;  %v590_v58 = vadd.f32 1.0, %v3754_v18  ;;  %v3756_v62 = vpop.eup %3755  ;;  %v7507_v5 = vld [vmem:[#allocation14_spill] sm:$0xff]  ;;  %v7508_v18 = vld [vmem:[#allocation15_spill] sm:$0xff] }
 0x10c   :  { %3759 = vtanh.f32 %v579_v6  ;;  %v591_v3 = vadd.f32 1.0, %v3756_v62  ;;  %v7510_v62 = vld [vmem:[#allocation17_spill] sm:$0xff] }
 0x10d   :  { %3761 = vrcp.f32 %v590_v58  ;;  %v7509_v58 = vld [vmem:[#allocation16_spill] sm:$0xff] }
 0x10e   :  { %3763 = vrcp.f32 %v591_v3  ;;  %v7515_v3 = vld [vmem:[#allocation22_spill] sm:$0xff] }
 0x118   :  { %v3758_v61 = vpop.eup %3757 }
 0x119   :  { %v3760_v54 = vpop.eup %3759 }
 0x11a   :  { %v3762_v36 = vpop.eup %3761  ;;  %v600_v4 = vmul.f32 %v3760_v54, %v3758_v61  ;;  %v7511_v61 = vld [vmem:[#allocation18_spill] sm:$0xff]  ;;  %v7513_v54 = vld [vmem:[#allocation20_spill] sm:$0xff] }
 0x11b   :  { %v599_v10 = vmul.f32 %v3762_v36, %v429_v8  ;;  %v3764_v1 = vpop.eup %3763  ;;  %v7512_v8 = vld [vmem:[#allocation19_spill] sm:$0xff]  ;;  %v7514_v36 = vld [vmem:[#allocation21_spill] sm:$0xff] }
 0x11d   :  { %v4851_v11 = vadd.f32 %v600_v4, %v599_v10  ;;  %v7516_v10 = vld [vmem:[#allocation23_spill] sm:$0xff]  ;;  %v7517_v4 = vld [vmem:[#allocation24_spill] sm:$0xff] }
 0x11f   :  { %3765 = vtanh.f32 %v4851_v11 }
 0x12c   :  { %v3766_v0 = vpop.eup %3765 }
 0x12d   :  { %v4854_v6 = vmul.f32 %v3766_v0, %v3764_v1  ;;  %v7518_v1 = vld [vmem:[#allocation25_spill] sm:$0xff]  ;;  %v7519_v0 = vld [vmem:[#allocation26_spill] sm:$0xff] }
 0x12f   :  { %7499 = vst [vmem:[#allocation56_spill] sm:$0xff] %v4854_v6  ;;  %674 = vmatmul.mubr.f32.vlgmr.msra.gmra.mxu0 %v4854_v6  ;;  %745 = vmatmul.mubr.f32.vlgmr.msra.gmra.mxu1 %v4854_v6  ;;  %v7520_v6 = vmov 0.0  }
 0x130   :  { %785 = vmatpush1.msra.mxu0 %v4248_v12  ;;  %856 = vmatpush1.msra.mxu1 %v4253_v13 }
 0x131   :  { %786 = vmatprep.subr.mxu0 %v4260_v14  ;;  %857 = vmatprep.subr.mxu1 %v4265_v15 }
 0x132   :  { %787 = vmatpush1.msra.mxu0 %v4274_v16  ;;  %858 = vmatpush1.msra.mxu1 %v4279_v17 }
 0x133   :  { %788 = vmatprep.subr.mxu0 %v4291_v19  ;;  %859 = vmatprep.subr.mxu1 %v4296_v20 }
 0x134   :  { %789 = vmatpush1.msra.mxu0 %v4303_v21  ;;  %860 = vmatpush1.msra.mxu1 %v4308_v22 }
 0x135   :  { %790 = vmatprep.subr.mxu0 %v4315_v23  ;;  %861 = vmatprep.subr.mxu1 %v4320_v24 }
 0x136   :  { %791 = vmatpush1.msra.mxu0 %v4329_v25  ;;  %862 = vmatpush1.msra.mxu1 %v4334_v26 }
 0x137   :  { %792 = vmatprep.subr.mxu0 %v4346_v28  ;;  %863 = vmatprep.subr.mxu1 %v4351_v29 }
 0x138   :  { %793 = vmatpush1.msra.mxu0 %v4358_v30  ;;  %864 = vmatpush1.msra.mxu1 %v4363_v31 }
 0x139   :  { %794 = vmatprep.subr.mxu0 %v4370_v32  ;;  %865 = vmatprep.subr.mxu1 %v4375_v33 }
 0x13a   :  { %795 = vmatpush1.msra.mxu0 %v4384_v34  ;;  %866 = vmatpush1.msra.mxu1 %v4389_v35 }
 0x13b   :  { %796 = vmatprep.subr.mxu0 %v4401_v37  ;;  %867 = vmatprep.subr.mxu1 %v4406_v38 }
 0x13c   :  { %797 = vmatpush1.msra.mxu0 %v4413_v39  ;;  %868 = vmatpush1.msra.mxu1 %v4418_v40 }
 0x13d   :  { %798 = vmatprep.subr.mxu0 %v4425_v41  ;;  %869 = vmatprep.subr.mxu1 %v4430_v42 }
 0x13e   :  { %799 = vmatpush1.msra.mxu0 %v4439_v43  ;;  %870 = vmatpush1.msra.mxu1 %v4444_v44 }
 0x13f   :  { %800 = vmatprep.subr.mxu0 %v4456_v46  ;;  %871 = vmatprep.subr.mxu1 %v4461_v47 }
 0x140   :  { %801 = vmatpush1.msra.mxu0 %v4468_v48  ;;  %872 = vmatpush1.msra.mxu1 %v4473_v49 }
 0x141   :  { %802 = vmatprep.subr.mxu0 %v4480_v50  ;;  %873 = vmatprep.subr.mxu1 %v4485_v51 }
 0x142   :  { %803 = vmatpush1.msra.mxu0 %v4494_v52  ;;  %874 = vmatpush1.msra.mxu1 %v4499_v53 }
 0x143   :  { %804 = vmatprep.subr.mxu0 %v4511_v55  ;;  %875 = vmatprep.subr.mxu1 %v4516_v56 }
 0x144   :  { %805 = vmatpush1.msra.mxu0 %v4523_v57  ;;  %876 = vmatpush1.msra.mxu1 %v7500_v63 }
 0x145   :  { %806 = vmatprep.subr.mxu0 %v7501_v60  ;;  %877 = vmatprep.subr.mxu1 %v7502_v59 }
 0x146   :  { %807 = vmatpush1.msra.mxu0 %v7503_v9  ;;  %878 = vmatpush1.msra.mxu1 %v7504_v7 }
 0x147   :  { %808 = vmatprep.subr.mxu0 %v7505_v45  ;;  %879 = vmatprep.subr.mxu1 %v7506_v27 }
 0x148   :  { %809 = vmatpush1.msra.mxu0 %v7507_v5  ;;  %880 = vmatpush1.msra.mxu1 %v7508_v18  ;;  %v7525_v18 = vld [vmem:[#allocation29_spill] sm:$0xff] }
 0x149   :  { %810 = vmatprep.subr.mxu0 %v7509_v58  ;;  %881 = vmatprep.subr.mxu1 %v7510_v62  ;;  %v7521_v62 = vld [vmem:[#allocation27_spill] sm:$0xff] }
 0x14a   :  { %811 = vmatpush1.msra.mxu0 %v7511_v61  ;;  %882 = vmatpush1.msra.mxu1 %v7512_v8  ;;  %v7522_v8 = vld [vmem:[#allocation5_spill] sm:$0xff] }
 0x14b   :  { %812 = vmatprep.subr.mxu0 %v7513_v54  ;;  %883 = vmatprep.subr.mxu1 %v7514_v36  ;;  %v7523_v54 = vld [vmem:[#allocation6_spill] sm:$0xff] }
 0x14c   :  { %813 = vmatpush1.msra.mxu0 %v7515_v3  ;;  %884 = vmatpush1.msra.mxu1 %v7516_v10 }
 0x14d   :  { %814 = vmatprep.subr.mxu0 %v7517_v4  ;;  %885 = vmatprep.subr.mxu1 %v7518_v1  ;;  %v7524_v4 = vld [vmem:[#allocation30_spill] sm:$0xff] }
 0x14e   :  { %815 = vmatpush1.msra.mxu0 %v7519_v0  ;;  %848 = vmatprep.mubr.f32.mxu0 %v7520_v6 }
 0x14f   :  { %886 = vmatpush1.msra.mxu1 %v7521_v62  ;;  %919 = vmatprep.mubr.f32.mxu1 %v7520_v6  ;;  %v7526_v6 = vld [vmem:[#allocation31_spill] sm:$0xff] }
 0x150   :  { %959 = vmatprep.subr.mxu0 %v7522_v8  ;;  %1030 = vmatprep.subr.mxu1 %v7523_v54 }
 0x1ef   :  { %v675_v36 = vpop.f32.mrf.mxu0  ;;  %v746_v0 = vpop.f32.mrf.mxu1 }
 0x1f0   :  { %v751_v3 = vadd.f32 %v675_v36, %v4772_v2  ;;  %v753_v5 = vadd.f32 %v746_v0, %v7525_v18 }
 0x1f1   :  { %v677_v10 = vpop.f32.mrf.mxu0  ;;  %v748_v62 = vpop.f32.mrf.mxu1 }
 0x1f2   :  { %v3699_v61 = vmul.f32 -1.442695, %v751_v3  ;;  %v752_v58 = vadd.f32 %v677_v10, %v7524_v4  ;;  %v3701_v27 = vmul.f32 -1.442695, %v753_v5  ;;  %v754_v45 = vadd.f32 %v748_v62, %v7526_v6 }
 0x1f4   :  { %3767 = vpow2.f32 %v3699_v61  ;;  %v3700_v1 = vmul.f32 -1.442695, %v752_v58 }
 0x1f6   :  { %3769 = vpow2.f32 %v3700_v1 }
 0x1f7   :  { %3771 = vpow2.f32 %v3701_v27 }
 0x1f8   :  { %3773 = vtanh.f32 %v754_v45 }
 0x201   :  { %v3768_v8 = vpop.eup %3767 }
 0x202   :  { %v764_v7 = vadd.f32 1.0, %v3768_v8  ;;  %v7551_v8 = vld [vmem:[#allocation35_spill] sm:$0xff] }
 0x203   :  { %v3770_v54 = vpop.eup %3769 }
 0x204   :  { %3775 = vrcp.f32 %v764_v7  ;;  %v765_v2 = vadd.f32 1.0, %v3770_v54  ;;  %v3772_v36 = vpop.eup %3771  ;;  %v7550_v7 = vld [vmem:[#allocation33_spill] sm:$0xff] }
 0x205   :  { %v3774_v3 = vpop.eup %3773  ;;  %v766_v4 = vadd.f32 1.0, %v3772_v36 }
 0x206   :  { %3777 = vrcp.f32 %v765_v2 }
 0x207   :  { %3779 = vrcp.f32 %v766_v4 }
 0x211   :  { %v3776_v61 = vpop.eup %3775 }
 0x212   :  { %v775_v58 = vmul.f32 %v3776_v61, %v3774_v3 }
 0x213   :  { %v3778_v10 = vpop.eup %3777 }
 0x214   :  { %v774_v18 = vmul.f32 %v3778_v10, %v4851_v11  ;;  %v3780_v6 = vpop.eup %3779 }
 0x216   :  { %v4929_v1 = vadd.f32 %v775_v58, %v774_v18 }
 0x218   :  { %3781 = vtanh.f32 %v4929_v1 }
 0x225   :  { %v3782_v27 = vpop.eup %3781 }
 0x226   :  { %v4932_v5 = vmul.f32 %v3782_v27, %v3780_v6 }
 0x228   :  { %7527 = vst [vmem:[#allocation7_spill] sm:$0xff] %v4932_v5  ;;  %849 = vmatmul.mubr.f32.vlgmr.msra.gmra.mxu0 %v4932_v5  ;;  %920 = vmatmul.mubr.f32.vlgmr.msra.gmra.mxu1 %v4932_v5  ;;  %v5177_v5 = vld [vmem:[%s7227_s4 + $0x130] sm:$0xff] }
 0x229   :  { %960 = vmatpush1.msra.mxu0 %v4248_v12  ;;  %1031 = vmatpush1.msra.mxu1 %v4253_v13  ;;  %v7528_v12 = vld [vmem:[#allocation11_spill] sm:$0xff]  ;;  %v7529_v13 = vld [vmem:[#allocation12_spill] sm:$0xff] }
 0x22a   :  { %961 = vmatprep.subr.mxu0 %v4260_v14  ;;  %1032 = vmatprep.subr.mxu1 %v4265_v15  ;;  %v7530_v14 = vld [vmem:[#allocation13_spill] sm:$0xff]  ;;  %v7531_v15 = vld [vmem:[#allocation14_spill] sm:$0xff] }
 0x22b   :  { %962 = vmatpush1.msra.mxu0 %v4274_v16  ;;  %1033 = vmatpush1.msra.mxu1 %v4279_v17  ;;  %v7532_v16 = vld [vmem:[#allocation15_spill] sm:$0xff]  ;;  %v7533_v17 = vld [vmem:[#allocation16_spill] sm:$0xff] }
 0x22c   :  { %963 = vmatprep.subr.mxu0 %v4291_v19  ;;  %1034 = vmatprep.subr.mxu1 %v4296_v20  ;;  %v7534_v19 = vld [vmem:[#allocation17_spill] sm:$0xff]  ;;  %v7535_v20 = vld [vmem:[#allocation18_spill] sm:$0xff] }
 0x22d   :  { %964 = vmatpush1.msra.mxu0 %v4303_v21  ;;  %1035 = vmatpush1.msra.mxu1 %v4308_v22  ;;  %v7536_v21 = vld [vmem:[#allocation19_spill] sm:$0xff]  ;;  %v7537_v22 = vld [vmem:[#allocation20_spill] sm:$0xff] }
 0x22e   :  { %965 = vmatprep.subr.mxu0 %v4315_v23  ;;  %1036 = vmatprep.subr.mxu1 %v4320_v24  ;;  %v7538_v23 = vld [vmem:[#allocation21_spill] sm:$0xff]  ;;  %v7539_v24 = vld [vmem:[#allocation22_spill] sm:$0xff] }
 0x22f   :  { %966 = vmatpush1.msra.mxu0 %v4329_v25  ;;  %1037 = vmatpush1.msra.mxu1 %v4334_v26  ;;  %v7540_v25 = vld [vmem:[#allocation23_spill] sm:$0xff]  ;;  %v7541_v26 = vld [vmem:[#allocation24_spill] sm:$0xff] }
 0x230   :  { %967 = vmatprep.subr.mxu0 %v4346_v28  ;;  %1038 = vmatprep.subr.mxu1 %v4351_v29  ;;  %v7542_v28 = vld [vmem:[#allocation25_spill] sm:$0xff]  ;;  %v7543_v29 = vld [vmem:[#allocation26_spill] sm:$0xff] }
 0x231   :  { %968 = vmatpush1.msra.mxu0 %v4358_v30  ;;  %1039 = vmatpush1.msra.mxu1 %v4363_v31  ;;  %v7544_v30 = vmov 0.0   ;;  %v7545_v31 = vld [vmem:[#allocation27_spill] sm:$0xff] }
 0x232   :  { %969 = vmatprep.subr.mxu0 %v4370_v32  ;;  %1040 = vmatprep.subr.mxu1 %v4375_v33  ;;  %v5003_v32 = vld [vmem:[%s7227_s4 + $0x1e8] sm:$0xff]  ;;  %v5009_v33 = vld [vmem:[%s7227_s4 + $0x1f8] sm:$0xff] }
 0x233   :  { %970 = vmatpush1.msra.mxu0 %v4384_v34  ;;  %1041 = vmatpush1.msra.mxu1 %v4389_v35  ;;  %7546 = vst [vmem:[#allocation8_spill] sm:$0xff] %v5003_v32  ;;  %7547 = vst [vmem:[#allocation9_spill] sm:$0xff] %v5009_v33  ;;  %v7548_v35 = vld [vmem:[#allocation32_spill] sm:$0xff] }
 0x234   :  { %971 = vmatprep.subr.mxu0 %v4401_v37  ;;  %1042 = vmatprep.subr.mxu1 %v4406_v38 }
 0x235   :  { %972 = vmatpush1.msra.mxu0 %v4413_v39  ;;  %1043 = vmatpush1.msra.mxu1 %v4418_v40  ;;  %v7549_v40 = vld [vmem:[#allocation34_spill] sm:$0xff] }
 0x236   :  { %973 = vmatprep.subr.mxu0 %v4425_v41  ;;  %1044 = vmatprep.subr.mxu1 %v4430_v42 }
 0x237   :  { %974 = vmatpush1.msra.mxu0 %v4439_v43  ;;  %1045 = vmatpush1.msra.mxu1 %v4444_v44 }
 0x238   :  { %975 = vmatprep.subr.mxu0 %v4456_v46  ;;  %1046 = vmatprep.subr.mxu1 %v4461_v47 }
 0x239   :  { %976 = vmatpush1.msra.mxu0 %v4468_v48  ;;  %1047 = vmatpush1.msra.mxu1 %v4473_v49 }
 0x23a   :  { %977 = vmatprep.subr.mxu0 %v4480_v50  ;;  %1048 = vmatprep.subr.mxu1 %v4485_v51 }
 0x23b   :  { %978 = vmatpush1.msra.mxu0 %v4494_v52  ;;  %1049 = vmatpush1.msra.mxu1 %v4499_v53 }
 0x23c   :  { %979 = vmatprep.subr.mxu0 %v4511_v55  ;;  %1050 = vmatprep.subr.mxu1 %v4516_v56 }
 0x23d   :  { %980 = vmatpush1.msra.mxu0 %v4523_v57  ;;  %1051 = vmatpush1.msra.mxu1 %v7500_v63 }
 0x23e   :  { %981 = vmatprep.subr.mxu0 %v7501_v60  ;;  %1052 = vmatprep.subr.mxu1 %v7502_v59 }
 0x23f   :  { %982 = vmatpush1.msra.mxu0 %v7503_v9  ;;  %1053 = vmatpush1.msra.mxu1 %v7528_v12 }
 0x240   :  { %983 = vmatprep.subr.mxu0 %v7529_v13  ;;  %1054 = vmatprep.subr.mxu1 %v7530_v14 }
 0x241   :  { %984 = vmatpush1.msra.mxu0 %v7531_v15  ;;  %1055 = vmatpush1.msra.mxu1 %v7532_v16 }
 0x242   :  { %985 = vmatprep.subr.mxu0 %v7533_v17  ;;  %1056 = vmatprep.subr.mxu1 %v7534_v19 }
 0x243   :  { %986 = vmatpush1.msra.mxu0 %v7535_v20  ;;  %1057 = vmatpush1.msra.mxu1 %v7536_v21 }
 0x244   :  { %987 = vmatprep.subr.mxu0 %v7537_v22  ;;  %1058 = vmatprep.subr.mxu1 %v7538_v23 }
 0x245   :  { %988 = vmatpush1.msra.mxu0 %v7539_v24  ;;  %1059 = vmatpush1.msra.mxu1 %v7540_v25 }
 0x246   :  { %989 = vmatprep.subr.mxu0 %v7541_v26  ;;  %1060 = vmatprep.subr.mxu1 %v7542_v28 }
 0x247   :  { %990 = vmatpush1.msra.mxu0 %v7543_v29  ;;  %1023 = vmatprep.mubr.f32.mxu0 %v7544_v30 }
 0x248   :  { %1061 = vmatpush1.msra.mxu1 %v7545_v31  ;;  %1094 = vmatprep.mubr.f32.mxu1 %v7544_v30 }
 0x249   :  { %1134 = vmatprep.subr.mxu0 %v5003_v32  ;;  %1205 = vmatprep.subr.mxu1 %v5009_v33 }
 0x2e8   :  { %v850_v34 = vpop.f32.mrf.mxu0  ;;  %v921_v11 = vpop.f32.mrf.mxu1 }
 0x2e9   :  { %v926_v37 = vadd.f32 %v850_v34, %v7548_v35  ;;  %v928_v45 = vadd.f32 %v921_v11, %v7550_v7  ;;  %v5051_v11 = vld [vmem:[%s7227_s4 + $0x1c0] sm:$0xff]  ;;  %v5057_v7 = vld [vmem:[%s7227_s4 + $0x1d0] sm:$0xff] }
 0x2ea   :  { %v852_v38 = vpop.f32.mrf.mxu0  ;;  %v923_v62 = vpop.f32.mrf.mxu1 }
 0x2eb   :  { %v3702_v39 = vmul.f32 -1.442695, %v926_v37  ;;  %v927_v41 = vadd.f32 %v852_v38, %v7549_v40  ;;  %v3704_v0 = vmul.f32 -1.442695, %v928_v45  ;;  %v929_v54 = vadd.f32 %v923_v62, %v7551_v8  ;;  %v5027_v40 = vld [vmem:[%s7227_s4 + $0x1e0] sm:$0xff]  ;;  %v5063_v45 = vld [vmem:[%s7227_s4 + $0x1a8] sm:$0xff] }
 0x2ec   :  { %v5069_v62 = vld [vmem:[%s7227_s4 + $0x1b8] sm:$0xff]  ;;  %v5081_v8 = vld [vmem:[%s7227_s4 + $0x1b0] sm:$0xff] }
 0x2ed   :  { %3783 = vpow2.f32 %v3702_v39  ;;  %v3703_v42 = vmul.f32 -1.442695, %v927_v41  ;;  %v5039_v41 = vld [vmem:[%s7227_s4 + $0x1c8] sm:$0xff] }
 0x2ef   :  { %3785 = vpow2.f32 %v3703_v42  ;;  %v5045_v42 = vld [vmem:[%s7227_s4 + $0x1d8] sm:$0xff] }
 0x2f0   :  { %3787 = vpow2.f32 %v3704_v0  ;;  %v5075_v0 = vld [vmem:[%s7227_s4 + $0x1a0] sm:$0xff] }
 0x2f1   :  { %3789 = vtanh.f32 %v929_v54  ;;  %v5087_v54 = vld [vmem:[%s7227_s4 + $0x188] sm:$0xff] }
 0x2fa   :  { %v3784_v2 = vpop.eup %3783 }
 0x2fb   :  { %v939_v36 = vadd.f32 1.0, %v3784_v2  ;;  %v5093_v2 = vld [vmem:[%s7227_s4 + $0x198] sm:$0xff] }
 0x2fc   :  { %v3786_v3 = vpop.eup %3785 }
 0x2fd   :  { %3791 = vrcp.f32 %v939_v36  ;;  %v940_v61 = vadd.f32 1.0, %v3786_v3  ;;  %v3788_v58 = vpop.eup %3787  ;;  %v5099_v36 = vld [vmem:[%s7227_s4 + $0x180] sm:$0xff]  ;;  %v5105_v3 = vld [vmem:[%s7227_s4 + $0x190] sm:$0xff] }
 0x2fe   :  { %v3790_v10 = vpop.eup %3789  ;;  %v941_v27 = vadd.f32 1.0, %v3788_v58  ;;  %v5117_v58 = vld [vmem:[%s7227_s4 + $0x178] sm:$0xff] }
 0x2ff   :  { %3793 = vrcp.f32 %v940_v61  ;;  %v5111_v61 = vld [vmem:[%s7227_s4 + $0x168] sm:$0xff] }
 0x300   :  { %3795 = vrcp.f32 %v941_v27  ;;  %v5147_v27 = vld [vmem:[%s7227_s4 + $0x140] sm:$0xff] }
 0x30a   :  { %v3792_v4 = vpop.eup %3791 }
 0x30b   :  { %v950_v18 = vmul.f32 %v3792_v4, %v3790_v10  ;;  %v5123_v10 = vld [vmem:[%s7227_s4 + $0x160] sm:$0xff]  ;;  %v5129_v4 = vld [vmem:[%s7227_s4 + $0x170] sm:$0xff] }
 0x30c   :  { %v3794_v6 = vpop.eup %3793 }
 0x30d   :  { %v949_v34 = vmul.f32 %v3794_v6, %v4929_v1  ;;  %v3796_v37 = vpop.eup %3795  ;;  %v5033_v1 = vld [vmem:[%s7227_s4 + $0x1f0] sm:$0xff]  ;;  %v5141_v6 = vld [vmem:[%s7227_s4 + $0x158] sm:$0xff] }
 0x30f   :  { %v5017_v35 = vadd.f32 %v950_v18, %v949_v34  ;;  %v5135_v18 = vld [vmem:[%s7227_s4 + $0x148] sm:$0xff]  ;;  %v5153_v34 = vld [vmem:[%s7227_s4 + $0x150] sm:$0xff] }
 0x311   :  { %3797 = vtanh.f32 %v5017_v35 }
 0x31e   :  { %v3798_v38 = vpop.eup %3797 }
 0x31f   :  { %v5020_v39 = vmul.f32 %v3798_v38, %v3796_v37  ;;  %v5159_v37 = vld [vmem:[%s7227_s4 + $0x128] sm:$0xff]  ;;  %v5165_v38 = vld [vmem:[%s7227_s4 + $0x138] sm:$0xff] }
 0x320   :  { %7553 = vst [vmem:[#allocation5_spill] sm:$0xff] %v5159_v37  ;;  %7554 = vst [vmem:[#allocation6_spill] sm:$0xff] %v5165_v38 }
 0x321   :  { %7552 = vst [vmem:[#allocation10_spill] sm:$0xff] %v5020_v39  ;;  %1024 = vmatmul.mubr.f32.vlgmr.msra.gmra.mxu0 %v5020_v39  ;;  %1095 = vmatmul.mubr.f32.vlgmr.msra.gmra.mxu1 %v5020_v39  ;;  %v5171_v39 = vld [vmem:[%s7227_s4 + $0x120] sm:$0xff] }
 0x322   :  { %1135 = vmatpush1.msra.mxu0 %v5027_v40  ;;  %1206 = vmatpush1.msra.mxu1 %v5033_v1 }
 0x323   :  { %1136 = vmatprep.subr.mxu0 %v5039_v41  ;;  %1207 = vmatprep.subr.mxu1 %v5045_v42 }
 0x324   :  { %1137 = vmatpush1.msra.mxu0 %v5051_v11  ;;  %1208 = vmatpush1.msra.mxu1 %v5057_v7 }
 0x325   :  { %1138 = vmatprep.subr.mxu0 %v5063_v45  ;;  %1209 = vmatprep.subr.mxu1 %v5069_v62 }
 0x326   :  { %1139 = vmatpush1.msra.mxu0 %v5075_v0  ;;  %1210 = vmatpush1.msra.mxu1 %v5081_v8 }
 0x327   :  { %1140 = vmatprep.subr.mxu0 %v5087_v54  ;;  %1211 = vmatprep.subr.mxu1 %v5093_v2 }
 0x328   :  { %1141 = vmatpush1.msra.mxu0 %v5099_v36  ;;  %1212 = vmatpush1.msra.mxu1 %v5105_v3 }
 0x329   :  { %1142 = vmatprep.subr.mxu0 %v5111_v61  ;;  %1213 = vmatprep.subr.mxu1 %v5117_v58 }
 0x32a   :  { %1143 = vmatpush1.msra.mxu0 %v5123_v10  ;;  %1214 = vmatpush1.msra.mxu1 %v5129_v4 }
 0x32b   :  { %1144 = vmatprep.subr.mxu0 %v5135_v18  ;;  %1215 = vmatprep.subr.mxu1 %v5141_v6 }
 0x32c   :  { %1145 = vmatpush1.msra.mxu0 %v5147_v27  ;;  %1216 = vmatpush1.msra.mxu1 %v5153_v34 }
 0x32d   :  { %1146 = vmatprep.subr.mxu0 %v5159_v37  ;;  %1217 = vmatprep.subr.mxu1 %v5165_v38  ;;  %v5183_v37 = vld [vmem:[%s7227_s4 + $0x108] sm:$0xff]  ;;  %v5189_v38 = vld [vmem:[%s7227_s4 + $0x118] sm:$0xff] }
 0x32e   :  { %1147 = vmatpush1.msra.mxu0 %v5171_v39  ;;  %1218 = vmatpush1.msra.mxu1 %v5177_v5 }
 0x32f   :  { %1148 = vmatprep.subr.mxu0 %v5183_v37  ;;  %1219 = vmatprep.subr.mxu1 %v5189_v38 }
 0x330   :  { %1149 = vmatpush1.msra.mxu0 %v4439_v43  ;;  %1220 = vmatpush1.msra.mxu1 %v4444_v44  ;;  %v7555_v44 = vld [vmem:[#allocation36_spill] sm:$0xff] }
 0x331   :  { %1150 = vmatprep.subr.mxu0 %v4456_v46  ;;  %1221 = vmatprep.subr.mxu1 %v4461_v47 }
 0x332   :  { %1151 = vmatpush1.msra.mxu0 %v4468_v48  ;;  %1222 = vmatpush1.msra.mxu1 %v4473_v49  ;;  %v7556_v49 = vld [vmem:[#allocation38_spill] sm:$0xff] }
 0x333   :  { %1152 = vmatprep.subr.mxu0 %v4480_v50  ;;  %1223 = vmatprep.subr.mxu1 %v4485_v51 }
 0x334   :  { %1153 = vmatpush1.msra.mxu0 %v4494_v52  ;;  %1224 = vmatpush1.msra.mxu1 %v4499_v53  ;;  %v7557_v53 = vld [vmem:[#allocation37_spill] sm:$0xff] }
 0x335   :  { %1154 = vmatprep.subr.mxu0 %v4511_v55  ;;  %1225 = vmatprep.subr.mxu1 %v4516_v56 }
 0x336   :  { %1155 = vmatpush1.msra.mxu0 %v4523_v57  ;;  %1226 = vmatpush1.msra.mxu1 %v7500_v63  ;;  %v7558_v63 = vld [vmem:[#allocation39_spill] sm:$0xff] }
 0x337   :  { %1156 = vmatprep.subr.mxu0 %v7501_v60  ;;  %1227 = vmatprep.subr.mxu1 %v7502_v59 }
 0x338   :  { %1157 = vmatpush1.msra.mxu0 %v7503_v9  ;;  %1228 = vmatpush1.msra.mxu1 %v7528_v12 }
 0x339   :  { %1158 = vmatprep.subr.mxu0 %v7529_v13  ;;  %1229 = vmatprep.subr.mxu1 %v7530_v14 }
 0x33a   :  { %1159 = vmatpush1.msra.mxu0 %v7531_v15  ;;  %1230 = vmatpush1.msra.mxu1 %v7532_v16 }
 0x33b   :  { %1160 = vmatprep.subr.mxu0 %v7533_v17  ;;  %1231 = vmatprep.subr.mxu1 %v7534_v19 }
 0x33c   :  { %1161 = vmatpush1.msra.mxu0 %v7535_v20  ;;  %1232 = vmatpush1.msra.mxu1 %v7536_v21 }
 0x33d   :  { %1162 = vmatprep.subr.mxu0 %v7537_v22  ;;  %1233 = vmatprep.subr.mxu1 %v7538_v23 }
 0x33e   :  { %1163 = vmatpush1.msra.mxu0 %v7539_v24  ;;  %1234 = vmatpush1.msra.mxu1 %v7540_v25 }
 0x33f   :  { %1164 = vmatprep.subr.mxu0 %v7541_v26  ;;  %1235 = vmatprep.subr.mxu1 %v7542_v28  ;;  %v7560_v26 = vld [vmem:[#allocation5_spill] sm:$0xff]  ;;  %v7561_v28 = vld [vmem:[#allocation6_spill] sm:$0xff] }
 0x340   :  { %1165 = vmatpush1.msra.mxu0 %v7543_v29  ;;  %1198 = vmatprep.mubr.f32.mxu0 %v7544_v30  ;;  %v5273_v29 = vld [vmem:[%s7227_s4 + $0x100] sm:$0xff] }
 0x341   :  { %1236 = vmatpush1.msra.mxu1 %v7545_v31  ;;  %1269 = vmatprep.mubr.f32.mxu1 %v7544_v30  ;;  %v5279_v31 = vld [vmem:[%s7227_s4 + $0x110] sm:$0xff] }
 0x342   :  { %1309 = vmatprep.subr.mxu0 %v5003_v32  ;;  %1380 = vmatprep.subr.mxu1 %v5009_v33 }
 0x3e1   :  { %v1025_v43 = vpop.f32.mrf.mxu0  ;;  %v1096_v52 = vpop.f32.mrf.mxu1 }
 0x3e2   :  { %v1101_v46 = vadd.f32 %v1025_v43, %v7555_v44  ;;  %v1103_v55 = vadd.f32 %v1096_v52, %v7557_v53  ;;  %v5291_v43 = vld [vmem:[%s7227_s4 + $0xf8] sm:$0xff]  ;;  %v5297_v44 = vld [vmem:[%s7227_s4 + $0xe0] sm:$0xff] }
 0x3e3   :  { %v1027_v47 = vpop.f32.mrf.mxu0  ;;  %v1098_v56 = vpop.f32.mrf.mxu1  ;;  %v5339_v52 = vld [vmem:[%s7227_s4 + $0xb8] sm:$0xff]  ;;  %v5345_v53 = vld [vmem:[%s7227_s4 + $0xa0] sm:$0xff] }
 0x3e4   :  { %v3705_v48 = vmul.f32 -1.442695, %v1101_v46  ;;  %v1102_v50 = vadd.f32 %v1027_v47, %v7556_v49  ;;  %v3707_v57 = vmul.f32 -1.442695, %v1103_v55  ;;  %v1104_v60 = vadd.f32 %v1098_v56, %v7558_v63  ;;  %v5303_v46 = vld [vmem:[%s7227_s4 + $0xf0] sm:$0xff]  ;;  %v5309_v47 = vld [vmem:[%s7227_s4 + $0xc8] sm:$0xff] }
 0x3e5   :  { %v5321_v49 = vld [vmem:[%s7227_s4 + $0xc0] sm:$0xff]  ;;  %v5351_v55 = vld [vmem:[%s7227_s4 + $0xb0] sm:$0xff]  ;;  %v5357_v56 = vld [vmem:[%s7227_s4 + $0x88] sm:$0xff] }
 0x3e6   :  { %3799 = vpow2.f32 %v3705_v48  ;;  %v3706_v51 = vmul.f32 -1.442695, %v1102_v50  ;;  %v5315_v48 = vld [vmem:[%s7227_s4 + $0xd8] sm:$0xff]  ;;  %v5327_v50 = vld [vmem:[%s7227_s4 + $0xd0] sm:$0xff]  ;;  %v5369_v63 = vld [vmem:[%s7227_s4 + $0x80] sm:$0xff] }
 0x3e8   :  { %3801 = vpow2.f32 %v3706_v51  ;;  %v5333_v51 = vld [vmem:[%s7227_s4 + $0xa8] sm:$0xff] }
 0x3e9   :  { %3803 = vpow2.f32 %v3707_v57  ;;  %v5363_v57 = vld [vmem:[%s7227_s4 + $0x98] sm:$0xff] }
 0x3ea   :  { %3805 = vtanh.f32 %v1104_v60  ;;  %v5375_v60 = vld [vmem:[%s7227_s4 + $0x90] sm:$0xff] }
 0x3eb   :  { %7562 = vst [vmem:[#allocation29_spill] sm:$0xff] %v5375_v60 }
 0x3f3   :  { %v3800_v59 = vpop.eup %3799 }
 0x3f4   :  { %v1114_v9 = vadd.f32 1.0, %v3800_v59  ;;  %v5381_v59 = vld [vmem:[%s7227_s4 + $0x68] sm:$0xff] }
 0x3f5   :  { %v3802_v12 = vpop.eup %3801  ;;  %7563 = vst [vmem:[#allocation31_spill] sm:$0xff] %v5381_v59 }
 0x3f6   :  { %3807 = vrcp.f32 %v1114_v9  ;;  %v1115_v13 = vadd.f32 1.0, %v3802_v12  ;;  %v3804_v14 = vpop.eup %3803  ;;  %v5387_v9 = vld [vmem:[%s7227_s4 + $0x78] sm:$0xff]  ;;  %v5393_v12 = vld [vmem:[%s7227_s4 + $0x60] sm:$0xff] }
 0x3f7   :  { %v3806_v15 = vpop.eup %3805  ;;  %v1116_v20 = vadd.f32 1.0, %v3804_v14  ;;  %7564 = vst [vmem:[#allocation11_spill] sm:$0xff] %v5387_v9  ;;  %7565 = vst [vmem:[#allocation12_spill] sm:$0xff] %v5393_v12  ;;  %v5405_v14 = vld [vmem:[%s7227_s4 + $0x48] sm:$0xff] }
 0x3f8   :  { %3809 = vrcp.f32 %v1115_v13  ;;  %v5399_v13 = vld [vmem:[%s7227_s4 + $0x70] sm:$0xff]  ;;  %7567 = vst [vmem:[#allocation14_spill] sm:$0xff] %v5405_v14 }
 0x3f9   :  { %3811 = vrcp.f32 %v1116_v20  ;;  %7566 = vst [vmem:[#allocation13_spill] sm:$0xff] %v5399_v13  ;;  %v5435_v20 = vld [vmem:[%s7227_s4 + $0x38] sm:$0xff] }
 0x3fa   :  { %7572 = vst [vmem:[#allocation19_spill] sm:$0xff] %v5435_v20 }
 0x403   :  { %v3808_v16 = vpop.eup %3807 }
 0x404   :  { %v1125_v17 = vmul.f32 %v3808_v16, %v3806_v15  ;;  %v5411_v15 = vld [vmem:[%s7227_s4 + $0x58] sm:$0xff]  ;;  %v5417_v16 = vld [vmem:[%s7227_s4 + $0x40] sm:$0xff] }
 0x405   :  { %v3810_v19 = vpop.eup %3809  ;;  %7568 = vst [vmem:[#allocation15_spill] sm:$0xff] %v5411_v15  ;;  %7569 = vst [vmem:[#allocation16_spill] sm:$0xff] %v5417_v16 }
 0x406   :  { %v1124_v21 = vmul.f32 %v3810_v19, %v5017_v35  ;;  %v3812_v23 = vpop.eup %3811  ;;  %v5285_v35 = vld [vmem:[%s7227_s4 + $0xe8] sm:$0xff] }
 0x407   :  { %v5429_v19 = vld [vmem:[%s7227_s4 + $0x28] sm:$0xff] }
 0x408   :  { %v5235_v22 = vadd.f32 %v1125_v17, %v1124_v21  ;;  %v5423_v17 = vld [vmem:[%s7227_s4 + $0x50] sm:$0xff]  ;;  %7571 = vst [vmem:[#allocation18_spill] sm:$0xff] %v5429_v19  ;;  %v5441_v21 = vld [vmem:[%s7227_s4 + $0x20] sm:$0xff] }
 0x409   :  { %7570 = vst [vmem:[#allocation17_spill] sm:$0xff] %v5423_v17  ;;  %7573 = vst [vmem:[#allocation20_spill] sm:$0xff] %v5441_v21 }
 0x40a   :  { %3813 = vtanh.f32 %v5235_v22 }
 0x417   :  { %v3814_v24 = vpop.eup %3813 }
 0x418   :  { %v5238_v25 = vmul.f32 %v3814_v24, %v3812_v23  ;;  %v5447_v23 = vld [vmem:[%s7227_s4 + $0x30] sm:$0xff]  ;;  %v5453_v24 = vld [vmem:[%s7227_s4 + $0x8] sm:$0xff] }
 0x419   :  { %7574 = vst [vmem:[#allocation21_spill] sm:$0xff] %v5447_v23  ;;  %7575 = vst [vmem:[#allocation22_spill] sm:$0xff] %v5453_v24 }
 0x41a   :  { %7559 = vst [vmem:[#allocation30_spill] sm:$0xff] %v5238_v25  ;;  %1199 = vmatmul.mubr.f32.vlgmr.msra.gmra.mxu0 %v5238_v25  ;;  %1270 = vmatmul.mubr.f32.vlgmr.msra.gmra.mxu1 %v5238_v25  ;;  %v5459_v25 = vld [vmem:[%s7227_s4 + $0x18] sm:$0xff] }
 0x41b   :  { %1310 = vmatpush1.msra.mxu0 %v5027_v40  ;;  %1381 = vmatpush1.msra.mxu1 %v5033_v1  ;;  %7576 = vst [vmem:[#allocation23_spill] sm:$0xff] %v5459_v25 }
 0x41c   :  { %1311 = vmatprep.subr.mxu0 %v5039_v41  ;;  %1382 = vmatprep.subr.mxu1 %v5045_v42 }
 0x41d   :  { %1312 = vmatpush1.msra.mxu0 %v5051_v11  ;;  %1383 = vmatpush1.msra.mxu1 %v5057_v7 }
 0x41e   :  { %1313 = vmatprep.subr.mxu0 %v5063_v45  ;;  %1384 = vmatprep.subr.mxu1 %v5069_v62 }
 0x41f   :  { %1314 = vmatpush1.msra.mxu0 %v5075_v0  ;;  %1385 = vmatpush1.msra.mxu1 %v5081_v8 }
 0x420   :  { %1315 = vmatprep.subr.mxu0 %v5087_v54  ;;  %1386 = vmatprep.subr.mxu1 %v5093_v2 }
 0x421   :  { %1316 = vmatpush1.msra.mxu0 %v5099_v36  ;;  %1387 = vmatpush1.msra.mxu1 %v5105_v3 }
 0x422   :  { %1317 = vmatprep.subr.mxu0 %v5111_v61  ;;  %1388 = vmatprep.subr.mxu1 %v5117_v58 }
 0x423   :  { %1318 = vmatpush1.msra.mxu0 %v5123_v10  ;;  %1389 = vmatpush1.msra.mxu1 %v5129_v4 }
 0x424   :  { %1319 = vmatprep.subr.mxu0 %v5135_v18  ;;  %1390 = vmatprep.subr.mxu1 %v5141_v6 }
 0x425   :  { %1320 = vmatpush1.msra.mxu0 %v5147_v27  ;;  %1391 = vmatpush1.msra.mxu1 %v5153_v34 }
 0x426   :  { %1321 = vmatprep.subr.mxu0 %v7560_v26  ;;  %1392 = vmatprep.subr.mxu1 %v7561_v28 }
 0x427   :  { %1322 = vmatpush1.msra.mxu0 %v5171_v39  ;;  %1393 = vmatpush1.msra.mxu1 %v5177_v5 }
 0x428   :  { %1323 = vmatprep.subr.mxu0 %v5183_v37  ;;  %1394 = vmatprep.subr.mxu1 %v5189_v38 }
 0x429   :  { %1324 = vmatpush1.msra.mxu0 %v5273_v29  ;;  %1395 = vmatpush1.msra.mxu1 %v5279_v31 }
 0x42a   :  { %1325 = vmatprep.subr.mxu0 %v5285_v35  ;;  %1396 = vmatprep.subr.mxu1 %v5291_v43 }
 0x42b   :  { %1326 = vmatpush1.msra.mxu0 %v5297_v44  ;;  %1397 = vmatpush1.msra.mxu1 %v5303_v46 }
 0x42c   :  { %1327 = vmatprep.subr.mxu0 %v5309_v47  ;;  %1398 = vmatprep.subr.mxu1 %v5315_v48 }
 0x42d   :  { %1328 = vmatpush1.msra.mxu0 %v5321_v49  ;;  %1399 = vmatpush1.msra.mxu1 %v5327_v50 }
 0x42e   :  { %1329 = vmatprep.subr.mxu0 %v5333_v51  ;;  %1400 = vmatprep.subr.mxu1 %v5339_v52 }
 0x42f   :  { %1330 = vmatpush1.msra.mxu0 %v5345_v53  ;;  %1401 = vmatpush1.msra.mxu1 %v5351_v55 }
 0x430   :  { %1331 = vmatprep.subr.mxu0 %v5357_v56  ;;  %1402 = vmatprep.subr.mxu1 %v5363_v57 }
 0x431   :  { %1332 = vmatpush1.msra.mxu0 %v5369_v63  ;;  %1403 = vmatpush1.msra.mxu1 %v5375_v60 }
 0x432   :  { %1333 = vmatprep.subr.mxu0 %v5381_v59  ;;  %1404 = vmatprep.subr.mxu1 %v5387_v9 }
 0x433   :  { %1334 = vmatpush1.msra.mxu0 %v5393_v12  ;;  %1405 = vmatpush1.msra.mxu1 %v5399_v13  ;;  %v7581_v13 = vld [vmem:[#allocation41_spill] sm:$0xff] }
 0x434   :  { %1335 = vmatprep.subr.mxu0 %v5405_v14  ;;  %1406 = vmatprep.subr.mxu1 %v5411_v15 }
 0x435   :  { %1336 = vmatpush1.msra.mxu0 %v5417_v16  ;;  %1407 = vmatpush1.msra.mxu1 %v5423_v17  ;;  %v7580_v17 = vld [vmem:[#allocation42_spill] sm:$0xff] }
 0x436   :  { %1337 = vmatprep.subr.mxu0 %v5429_v19  ;;  %1408 = vmatprep.subr.mxu1 %v5435_v20 }
 0x437   :  { %1338 = vmatpush1.msra.mxu0 %v5441_v21  ;;  %1409 = vmatpush1.msra.mxu1 %v5447_v23  ;;  %v5465_v21 = vld [vmem:[%s7227_s4] sm:$0xff] }
 0x438   :  { %1339 = vmatprep.subr.mxu0 %v5453_v24  ;;  %1410 = vmatprep.subr.mxu1 %v5459_v25  ;;  %7577 = vst [vmem:[#allocation24_spill] sm:$0xff] %v5465_v21  ;;  %v5472_v24 = vld [vmem:[%s7227_s4 + $0x10] sm:$0xff]  ;;  %v7579_v23 = vld [vmem:[#allocation40_spill] sm:$0xff] }
 0x439   :  { %1340 = vmatpush1.msra.mxu0 %v5465_v21  ;;  %1373 = vmatprep.mubr.f32.mxu0 %v7544_v30  ;;  %7578 = vst [vmem:[#allocation25_spill] sm:$0xff] %v5472_v24 }
 0x43a   :  { %1411 = vmatpush1.msra.mxu1 %v5472_v24  ;;  %1444 = vmatprep.mubr.f32.mxu1 %v7544_v30  ;;  %v7582_v30 = vld [vmem:[#allocation43_spill] sm:$0xff] }
 0x43b   :  { %1484 = vmatprep.subr.mxu0 %v5003_v32  ;;  %1555 = vmatprep.subr.mxu1 %v5009_v33 }
 0x4da   :  { %v1200_v25 = vpop.f32.mrf.mxu0  ;;  %v1271_v14 = vpop.f32.mrf.mxu1 }
 0x4db   :  { %v1276_v20 = vadd.f32 %v1200_v25, %v7579_v23  ;;  %v1278_v12 = vadd.f32 %v1271_v14, %v7581_v13  ;;  %v7589_v23 = vld [vmem:[#allocation14_spill] sm:$0xff] }
 0x4dc   :  { %v1202_v19 = vpop.f32.mrf.mxu0  ;;  %v1273_v24 = vpop.f32.mrf.mxu1 }
 0x4dd   :  { %v3708_v21 = vmul.f32 -1.442695, %v1276_v20  ;;  %v1277_v16 = vadd.f32 %v1202_v19, %v7580_v17  ;;  %v3710_v9 = vmul.f32 -1.442695, %v1278_v12  ;;  %v1279_v59 = vadd.f32 %v1273_v24, %v7582_v30  ;;  %v7588_v12 = vld [vmem:[#allocation13_spill] sm:$0xff]  ;;  %v7590_v24 = vld [vmem:[#allocation15_spill] sm:$0xff] }
 0x4df   :  { %3815 = vpow2.f32 %v3708_v21  ;;  %v3709_v15 = vmul.f32 -1.442695, %v1277_v16 }
 0x4e1   :  { %3817 = vpow2.f32 %v3709_v15 }
 0x4e2   :  { %3819 = vpow2.f32 %v3710_v9 }
 0x4e3   :  { %3821 = vtanh.f32 %v1279_v59  ;;  %v7587_v59 = vld [vmem:[#allocation12_spill] sm:$0xff] }
 0x4ec   :  { %v3816_v32 = vpop.eup %3815 }
 0x4ed   :  { %v1289_v60 = vadd.f32 1.0, %v3816_v32 }
 0x4ee   :  { %v3818_v33 = vpop.eup %3817 }
 0x4ef   :  { %3823 = vrcp.f32 %v1289_v60  ;;  %v1290_v25 = vadd.f32 1.0, %v3818_v33  ;;  %v3820_v20 = vpop.eup %3819  ;;  %v7584_v33 = vld [vmem:[#allocation29_spill] sm:$0xff]  ;;  %v7586_v60 = vld [vmem:[#allocation11_spill] sm:$0xff] }
 0x4f0   :  { %v3822_v17 = vpop.eup %3821  ;;  %v1291_v21 = vadd.f32 1.0, %v3820_v20  ;;  %v7592_v20 = vld [vmem:[#allocation17_spill] sm:$0xff] }
 0x4f1   :  { %3825 = vrcp.f32 %v1290_v25  ;;  %v7591_v25 = vld [vmem:[#allocation16_spill] sm:$0xff] }
 0x4f2   :  { %3827 = vrcp.f32 %v1291_v21  ;;  %v7597_v21 = vld [vmem:[#allocation22_spill] sm:$0xff] }
 0x4fc   :  { %v3824_v19 = vpop.eup %3823 }
 0x4fd   :  { %v1300_v16 = vmul.f32 %v3824_v19, %v3822_v17  ;;  %v7593_v17 = vld [vmem:[#allocation18_spill] sm:$0xff]  ;;  %v7594_v19 = vld [vmem:[#allocation19_spill] sm:$0xff] }
 0x4fe   :  { %v3826_v15 = vpop.eup %3825 }
 0x4ff   :  { %v1299_v13 = vmul.f32 %v3826_v15, %v5235_v22  ;;  %v3828_v30 = vpop.eup %3827  ;;  %v7585_v22 = vld [vmem:[#allocation31_spill] sm:$0xff]  ;;  %v7596_v15 = vld [vmem:[#allocation21_spill] sm:$0xff] }
 0x501   :  { %v5483_v14 = vadd.f32 %v1300_v16, %v1299_v13  ;;  %v7595_v16 = vld [vmem:[#allocation20_spill] sm:$0xff]  ;;  %v7598_v13 = vld [vmem:[#allocation23_spill] sm:$0xff] }
 0x503   :  { %3829 = vtanh.f32 %v5483_v14 }
 0x510   :  { %v3830_v32 = vpop.eup %3829 }
 0x511   :  { %v5486_v9 = vmul.f32 %v3830_v32, %v3828_v30  ;;  %v7599_v30 = vld [vmem:[#allocation24_spill] sm:$0xff]  ;;  %v7600_v32 = vmov 0.0  }
 0x513   :  { %7583 = vst [vmem:[#allocation26_spill] sm:$0xff] %v5486_v9  ;;  %1374 = vmatmul.mubr.f32.vlgmr.msra.gmra.mxu0 %v5486_v9  ;;  %1445 = vmatmul.mubr.f32.vlgmr.msra.gmra.mxu1 %v5486_v9  ;;  %v7601_v9 = vld [vmem:[#allocation25_spill] sm:$0xff] }
 0x514   :  { %1485 = vmatpush1.msra.mxu0 %v5027_v40  ;;  %1556 = vmatpush1.msra.mxu1 %v5033_v1 }
 0x515   :  { %1486 = vmatprep.subr.mxu0 %v5039_v41  ;;  %1557 = vmatprep.subr.mxu1 %v5045_v42 }
 0x516   :  { %1487 = vmatpush1.msra.mxu0 %v5051_v11  ;;  %1558 = vmatpush1.msra.mxu1 %v5057_v7 }
 0x517   :  { %1488 = vmatprep.subr.mxu0 %v5063_v45  ;;  %1559 = vmatprep.subr.mxu1 %v5069_v62 }
 0x518   :  { %1489 = vmatpush1.msra.mxu0 %v5075_v0  ;;  %1560 = vmatpush1.msra.mxu1 %v5081_v8 }
 0x519   :  { %1490 = vmatprep.subr.mxu0 %v5087_v54  ;;  %1561 = vmatprep.subr.mxu1 %v5093_v2 }
 0x51a   :  { %1491 = vmatpush1.msra.mxu0 %v5099_v36  ;;  %1562 = vmatpush1.msra.mxu1 %v5105_v3 }
 0x51b   :  { %1492 = vmatprep.subr.mxu0 %v5111_v61  ;;  %1563 = vmatprep.subr.mxu1 %v5117_v58 }
 0x51c   :  { %1493 = vmatpush1.msra.mxu0 %v5123_v10  ;;  %1564 = vmatpush1.msra.mxu1 %v5129_v4 }
 0x51d   :  { %1494 = vmatprep.subr.mxu0 %v5135_v18  ;;  %1565 = vmatprep.subr.mxu1 %v5141_v6 }
 0x51e   :  { %1495 = vmatpush1.msra.mxu0 %v5147_v27  ;;  %1566 = vmatpush1.msra.mxu1 %v5153_v34 }
 0x51f   :  { %1496 = vmatprep.subr.mxu0 %v7560_v26  ;;  %1567 = vmatprep.subr.mxu1 %v7561_v28 }
 0x520   :  { %1497 = vmatpush1.msra.mxu0 %v5171_v39  ;;  %1568 = vmatpush1.msra.mxu1 %v5177_v5 }
 0x521   :  { %1498 = vmatprep.subr.mxu0 %v5183_v37  ;;  %1569 = vmatprep.subr.mxu1 %v5189_v38 }
 0x522   :  { %1499 = vmatpush1.msra.mxu0 %v5273_v29  ;;  %1570 = vmatpush1.msra.mxu1 %v5279_v31 }
 0x523   :  { %1500 = vmatprep.subr.mxu0 %v5285_v35  ;;  %1571 = vmatprep.subr.mxu1 %v5291_v43 }
 0x524   :  { %1501 = vmatpush1.msra.mxu0 %v5297_v44  ;;  %1572 = vmatpush1.msra.mxu1 %v5303_v46 }
 0x525   :  { %1502 = vmatprep.subr.mxu0 %v5309_v47  ;;  %1573 = vmatprep.subr.mxu1 %v5315_v48 }
 0x526   :  { %1503 = vmatpush1.msra.mxu0 %v5321_v49  ;;  %1574 = vmatpush1.msra.mxu1 %v5327_v50 }
 0x527   :  { %1504 = vmatprep.subr.mxu0 %v5333_v51  ;;  %1575 = vmatprep.subr.mxu1 %v5339_v52 }
 0x528   :  { %1505 = vmatpush1.msra.mxu0 %v5345_v53  ;;  %1576 = vmatpush1.msra.mxu1 %v5351_v55 }
 0x529   :  { %1506 = vmatprep.subr.mxu0 %v5357_v56  ;;  %1577 = vmatprep.subr.mxu1 %v5363_v57 }
 0x52a   :  { %1507 = vmatpush1.msra.mxu0 %v5369_v63  ;;  %1578 = vmatpush1.msra.mxu1 %v7584_v33 }
 0x52b   :  { %1508 = vmatprep.subr.mxu0 %v7585_v22  ;;  %1579 = vmatprep.subr.mxu1 %v7586_v60 }
 0x52c   :  { %1509 = vmatpush1.msra.mxu0 %v7587_v59  ;;  %1580 = vmatpush1.msra.mxu1 %v7588_v12  ;;  %v7606_v12 = vld [vmem:[#allocation45_spill] sm:$0xff] }
 0x52d   :  { %1510 = vmatprep.subr.mxu0 %v7589_v23  ;;  %1581 = vmatprep.subr.mxu1 %v7590_v24 }
 0x52e   :  { %1511 = vmatpush1.msra.mxu0 %v7591_v25  ;;  %1582 = vmatpush1.msra.mxu1 %v7592_v20  ;;  %v7602_v20 = vld [vmem:[#allocation8_spill] sm:$0xff] }
 0x52f   :  { %1512 = vmatprep.subr.mxu0 %v7593_v17  ;;  %1583 = vmatprep.subr.mxu1 %v7594_v19  ;;  %v7603_v17 = vld [vmem:[#allocation9_spill] sm:$0xff] }
 0x530   :  { %1513 = vmatpush1.msra.mxu0 %v7595_v16  ;;  %1584 = vmatpush1.msra.mxu1 %v7596_v15  ;;  %v7604_v16 = vld [vmem:[#allocation44_spill] sm:$0xff] }
 0x531   :  { %1514 = vmatprep.subr.mxu0 %v7597_v21  ;;  %1585 = vmatprep.subr.mxu1 %v7598_v13  ;;  %v7605_v21 = vld [vmem:[#allocation46_spill] sm:$0xff] }
 0x532   :  { %1515 = vmatpush1.msra.mxu0 %v7599_v30  ;;  %1548 = vmatprep.mubr.f32.mxu0 %v7600_v32 }
 0x533   :  { %1586 = vmatpush1.msra.mxu1 %v7601_v9  ;;  %1619 = vmatprep.mubr.f32.mxu1 %v7600_v32  ;;  %v7607_v32 = vld [vmem:[#allocation47_spill] sm:$0xff] }
 0x534   :  { %1659 = vmatprep.subr.mxu0 %v7602_v20  ;;  %1730 = vmatprep.subr.mxu1 %v7603_v17 }
 0x5d3   :  { %v1375_v19 = vpop.f32.mrf.mxu0  ;;  %v1446_v30 = vpop.f32.mrf.mxu1 }
 0x5d4   :  { %v1451_v25 = vadd.f32 %v1375_v19, %v7604_v16  ;;  %v1453_v59 = vadd.f32 %v1446_v30, %v7606_v12 }
 0x5d5   :  { %v1377_v15 = vpop.f32.mrf.mxu0  ;;  %v1448_v9 = vpop.f32.mrf.mxu1 }
 0x5d6   :  { %v3711_v24 = vmul.f32 -1.442695, %v1451_v25  ;;  %v1452_v23 = vadd.f32 %v1377_v15, %v7605_v21  ;;  %v3713_v60 = vmul.f32 -1.442695, %v1453_v59  ;;  %v1454_v22 = vadd.f32 %v1448_v9, %v7607_v32 }
 0x5d8   :  { %3831 = vpow2.f32 %v3711_v24  ;;  %v3712_v13 = vmul.f32 -1.442695, %v1452_v23 }
 0x5da   :  { %3833 = vpow2.f32 %v3712_v13 }
 0x5db   :  { %3835 = vpow2.f32 %v3713_v60 }
 0x5dc   :  { %3837 = vtanh.f32 %v1454_v22 }
 0x5e5   :  { %v3832_v20 = vpop.eup %3831 }
 0x5e6   :  { %v1464_v33 = vadd.f32 1.0, %v3832_v20  ;;  %v1900_v20 = vld [vmem:[%s7231_s6 + $0x1e0] sm:$0xff] }
 0x5e7   :  { %v3834_v17 = vpop.eup %3833 }
 0x5e8   :  { %3839 = vrcp.f32 %v1464_v33  ;;  %v1465_v19 = vadd.f32 1.0, %v3834_v17  ;;  %v3836_v25 = vpop.eup %3835  ;;  %v1902_v17 = vld [vmem:[%s7231_s6 + $0x1f0] sm:$0xff] }
 0x5e9   :  { %v3838_v16 = vpop.eup %3837  ;;  %v1466_v21 = vadd.f32 1.0, %v3836_v25  ;;  %v1899_v25 = vld [vmem:[%s7231_s6 + $0x1d8] sm:$0xff] }
 0x5ea   :  { %3841 = vrcp.f32 %v1465_v19  ;;  %v1897_v19 = vld [vmem:[%s7231_s6 + $0x1c8] sm:$0xff] }
 0x5eb   :  { %3843 = vrcp.f32 %v1466_v21  ;;  %v1892_v21 = vld [vmem:[%s7231_s6 + $0x1a0] sm:$0xff] }
 0x5f5   :  { %v3840_v24 = vpop.eup %3839 }
 0x5f6   :  { %v1475_v23 = vmul.f32 %v3840_v24, %v3838_v16  ;;  %v1896_v16 = vld [vmem:[%s7231_s6 + $0x1c0] sm:$0xff]  ;;  %v1898_v24 = vld [vmem:[%s7231_s6 + $0x1d0] sm:$0xff] }
 0x5f7   :  { %v3842_v15 = vpop.eup %3841 }
 0x5f8   :  { %v1474_v12 = vmul.f32 %v3842_v15, %v5483_v14  ;;  %v3844_v9 = vpop.eup %3843  ;;  %v1895_v15 = vld [vmem:[%s7231_s6 + $0x1b8] sm:$0xff] }
 0x5fa   :  { %v5561_v13 = vadd.f32 %v1475_v23, %v1474_v12  ;;  %v1893_v23 = vld [vmem:[%s7231_s6 + $0x1a8] sm:$0xff]  ;;  %v1894_v12 = vld [vmem:[%s7231_s6 + $0x1b0] sm:$0xff] }
 0x5fc   :  { %3845 = vtanh.f32 %v5561_v13 }
 0x609   :  { %v3846_v60 = vpop.eup %3845 }
 0x60a   :  { %v5564_v59 = vmul.f32 %v3846_v60, %v3844_v9  ;;  %v1891_v9 = vld [vmem:[%s7231_s6 + $0x198] sm:$0xff]  ;;  %v1888_v60 = vld [vmem:[%s7231_s6 + $0x180] sm:$0xff] }
 0x60c   :  { %1549 = vmatmul.mubr.f32.vlgmr.msra.gmra.mxu0 %v5564_v59  ;;  %1620 = vmatmul.mubr.f32.vlgmr.msra.gmra.mxu1 %v5564_v59 }
 0x60d   :  { %1660 = vmatpush1.msra.mxu0 %v5027_v40  ;;  %1731 = vmatpush1.msra.mxu1 %v5033_v1  ;;  %v7610_v40 = vld [vmem:[#allocation11_spill] sm:$0xff]  ;;  %v7611_v1 = vld [vmem:[#allocation12_spill] sm:$0xff] }
 0x60e   :  { %1661 = vmatprep.subr.mxu0 %v5039_v41  ;;  %1732 = vmatprep.subr.mxu1 %v5045_v42  ;;  %v7612_v41 = vld [vmem:[#allocation13_spill] sm:$0xff]  ;;  %v7613_v42 = vld [vmem:[#allocation14_spill] sm:$0xff] }
 0x60f   :  { %1662 = vmatpush1.msra.mxu0 %v5051_v11  ;;  %1733 = vmatpush1.msra.mxu1 %v5057_v7  ;;  %v7614_v11 = vld [vmem:[#allocation15_spill] sm:$0xff]  ;;  %v7615_v7 = vld [vmem:[#allocation16_spill] sm:$0xff] }
 0x610   :  { %1663 = vmatprep.subr.mxu0 %v5063_v45  ;;  %1734 = vmatprep.subr.mxu1 %v5069_v62  ;;  %v7616_v45 = vld [vmem:[#allocation17_spill] sm:$0xff]  ;;  %v7617_v62 = vld [vmem:[#allocation18_spill] sm:$0xff] }
 0x611   :  { %1664 = vmatpush1.msra.mxu0 %v5075_v0  ;;  %1735 = vmatpush1.msra.mxu1 %v5081_v8  ;;  %v7618_v0 = vld [vmem:[#allocation19_spill] sm:$0xff]  ;;  %v7619_v8 = vld [vmem:[#allocation20_spill] sm:$0xff] }
 0x612   :  { %1665 = vmatprep.subr.mxu0 %v5087_v54  ;;  %1736 = vmatprep.subr.mxu1 %v5093_v2  ;;  %v7620_v54 = vld [vmem:[#allocation21_spill] sm:$0xff]  ;;  %v7621_v2 = vld [vmem:[#allocation22_spill] sm:$0xff] }
 0x613   :  { %1666 = vmatpush1.msra.mxu0 %v5099_v36  ;;  %1737 = vmatpush1.msra.mxu1 %v5105_v3  ;;  %v7622_v36 = vld [vmem:[#allocation23_spill] sm:$0xff]  ;;  %v7623_v3 = vld [vmem:[#allocation24_spill] sm:$0xff] }
 0x614   :  { %1667 = vmatprep.subr.mxu0 %v5111_v61  ;;  %1738 = vmatprep.subr.mxu1 %v5117_v58  ;;  %v7624_v61 = vld [vmem:[#allocation25_spill] sm:$0xff]  ;;  %v7625_v58 = vmov 0.0  }
 0x615   :  { %1668 = vmatpush1.msra.mxu0 %v5123_v10  ;;  %1739 = vmatpush1.msra.mxu1 %v5129_v4  ;;  %v1901_v10 = vld [vmem:[%s7231_s6 + $0x1e8] sm:$0xff]  ;;  %v1903_v4 = vld [vmem:[%s7231_s6 + $0x1f8] sm:$0xff] }
 0x616   :  { %1669 = vmatprep.subr.mxu0 %v5135_v18  ;;  %1740 = vmatprep.subr.mxu1 %v5141_v6  ;;  %v7626_v6 = vld [vmem:[#allocation48_spill] sm:$0xff] }
 0x617   :  { %1670 = vmatpush1.msra.mxu0 %v5147_v27  ;;  %1741 = vmatpush1.msra.mxu1 %v5153_v34 }
 0x618   :  { %1671 = vmatprep.subr.mxu0 %v7560_v26  ;;  %1742 = vmatprep.subr.mxu1 %v7561_v28 }
 0x619   :  { %1672 = vmatpush1.msra.mxu0 %v5171_v39  ;;  %1743 = vmatpush1.msra.mxu1 %v5177_v5  ;;  %v7608_v5 = vld [vmem:[#allocation29_spill] sm:$0xff]  ;;  %v7609_v39 = vld [vmem:[#allocation31_spill] sm:$0xff] }
 0x61a   :  { %1673 = vmatprep.subr.mxu0 %v5183_v37  ;;  %1744 = vmatprep.subr.mxu1 %v5189_v38  ;;  %v7627_v38 = vld [vmem:[#allocation50_spill] sm:$0xff] }
 0x61b   :  { %1674 = vmatpush1.msra.mxu0 %v5273_v29  ;;  %1745 = vmatpush1.msra.mxu1 %v5279_v31  ;;  %v7628_v31 = vld [vmem:[#allocation49_spill] sm:$0xff] }
 0x61c   :  { %1675 = vmatprep.subr.mxu0 %v5285_v35  ;;  %1746 = vmatprep.subr.mxu1 %v5291_v43 }
 0x61d   :  { %1676 = vmatpush1.msra.mxu0 %v5297_v44  ;;  %1747 = vmatpush1.msra.mxu1 %v5303_v46  ;;  %v7629_v46 = vld [vmem:[#allocation51_spill] sm:$0xff] }
 0x61e   :  { %1677 = vmatprep.subr.mxu0 %v5309_v47  ;;  %1748 = vmatprep.subr.mxu1 %v5315_v48 }
 0x61f   :  { %1678 = vmatpush1.msra.mxu0 %v5321_v49  ;;  %1749 = vmatpush1.msra.mxu1 %v5327_v50 }
 0x620   :  { %1679 = vmatprep.subr.mxu0 %v5333_v51  ;;  %1750 = vmatprep.subr.mxu1 %v5339_v52 }
 0x621   :  { %1680 = vmatpush1.msra.mxu0 %v5345_v53  ;;  %1751 = vmatpush1.msra.mxu1 %v5351_v55 }
 0x622   :  { %1681 = vmatprep.subr.mxu0 %v5357_v56  ;;  %1752 = vmatprep.subr.mxu1 %v5363_v57 }
 0x623   :  { %1682 = vmatpush1.msra.mxu0 %v5369_v63  ;;  %1753 = vmatpush1.msra.mxu1 %v7608_v5  ;;  %v1890_v5 = vld [vmem:[%s7231_s6 + $0x190] sm:$0xff] }
 0x624   :  { %1683 = vmatprep.subr.mxu0 %v7609_v39  ;;  %1754 = vmatprep.subr.mxu1 %v7610_v40  ;;  %v1885_v39 = vld [vmem:[%s7231_s6 + $0x168] sm:$0xff]  ;;  %v1887_v40 = vld [vmem:[%s7231_s6 + $0x178] sm:$0xff] }
 0x625   :  { %1684 = vmatpush1.msra.mxu0 %v7611_v1  ;;  %1755 = vmatpush1.msra.mxu1 %v7612_v41  ;;  %v1884_v1 = vld [vmem:[%s7231_s6 + $0x160] sm:$0xff]  ;;  %v1886_v41 = vld [vmem:[%s7231_s6 + $0x170] sm:$0xff] }
 0x626   :  { %1685 = vmatprep.subr.mxu0 %v7613_v42  ;;  %1756 = vmatprep.subr.mxu1 %v7614_v11  ;;  %v1881_v42 = vld [vmem:[%s7231_s6 + $0x148] sm:$0xff]  ;;  %v1883_v11 = vld [vmem:[%s7231_s6 + $0x158] sm:$0xff] }
 0x627   :  { %1686 = vmatpush1.msra.mxu0 %v7615_v7  ;;  %1757 = vmatpush1.msra.mxu1 %v7616_v45  ;;  %v1880_v7 = vld [vmem:[%s7231_s6 + $0x140] sm:$0xff]  ;;  %v1882_v45 = vld [vmem:[%s7231_s6 + $0x150] sm:$0xff] }
 0x628   :  { %1687 = vmatprep.subr.mxu0 %v7617_v62  ;;  %1758 = vmatprep.subr.mxu1 %v7618_v0  ;;  %v1877_v62 = vld [vmem:[%s7231_s6 + $0x128] sm:$0xff]  ;;  %v1879_v0 = vld [vmem:[%s7231_s6 + $0x138] sm:$0xff] }
 0x629   :  { %1688 = vmatpush1.msra.mxu0 %v7619_v8  ;;  %1759 = vmatpush1.msra.mxu1 %v7620_v54  ;;  %v1876_v8 = vld [vmem:[%s7231_s6 + $0x120] sm:$0xff]  ;;  %v1878_v54 = vld [vmem:[%s7231_s6 + $0x130] sm:$0xff] }
 0x62a   :  { %1689 = vmatprep.subr.mxu0 %v7621_v2  ;;  %1760 = vmatprep.subr.mxu1 %v7622_v36  ;;  %v1873_v2 = vld [vmem:[%s7231_s6 + $0x108] sm:$0xff]  ;;  %v1875_v36 = vld [vmem:[%s7231_s6 + $0x118] sm:$0xff] }
 0x62b   :  { %1690 = vmatpush1.msra.mxu0 %v7623_v3  ;;  %1761 = vmatpush1.msra.mxu1 %v7624_v61  ;;  %v1872_v3 = vld [vmem:[%s7231_s6 + $0x100] sm:$0xff]  ;;  %v1874_v61 = vld [vmem:[%s7231_s6 + $0x110] sm:$0xff] }
 0x62c   :  { %1723 = vmatprep.mubr.f32.mxu0 %v7625_v58  ;;  %1794 = vmatprep.mubr.f32.mxu1 %v7625_v58 }
 0x62d   :  { %1926 = vmatprep.subr.mxu0 %v1901_v10  ;;  %2039 = vmatprep.subr.mxu1 %v1903_v4  ;;  %v1869_v10 = vld [vmem:[%s7231_s6 + $0xe8] sm:$0xff]  ;;  %v1871_v4 = vld [vmem:[%s7231_s6 + $0xf8] sm:$0xff] }
 0x6cc   :  { %v1550_v18 = vpop.f32.mrf.mxu0  ;;  %v1621_v29 = vpop.f32.mrf.mxu1 }
 0x6cd   :  { %v1626_v27 = vadd.f32 %v1550_v18, %v7626_v6  ;;  %v1628_v35 = vadd.f32 %v1621_v29, %v7628_v31  ;;  %v1868_v18 = vld [vmem:[%s7231_s6 + $0xe0] sm:$0xff]  ;;  %v1870_v6 = vld [vmem:[%s7231_s6 + $0xf0] sm:$0xff] }
 0x6ce   :  { %v1552_v34 = vpop.f32.mrf.mxu0  ;;  %v1623_v43 = vpop.f32.mrf.mxu1  ;;  %v1860_v29 = vld [vmem:[%s7231_s6 + $0xa0] sm:$0xff]  ;;  %v1862_v31 = vld [vmem:[%s7231_s6 + $0xb0] sm:$0xff] }
 0x6cf   :  { %v3714_v37 = vmul.f32 -1.442695, %v1626_v27  ;;  %v1627_v26 = vadd.f32 %v1552_v34, %v7627_v38  ;;  %v3716_v44 = vmul.f32 -1.442695, %v1628_v35  ;;  %v1629_v47 = vadd.f32 %v1623_v43, %v7629_v46  ;;  %v1865_v27 = vld [vmem:[%s7231_s6 + $0xc8] sm:$0xff]  ;;  %v1867_v34 = vld [vmem:[%s7231_s6 + $0xd8] sm:$0xff] }
 0x6d0   :  { %v1866_v38 = vld [vmem:[%s7231_s6 + $0xd0] sm:$0xff]  ;;  %v1857_v35 = vld [vmem:[%s7231_s6 + $0x88] sm:$0xff]  ;;  %v1859_v43 = vld [vmem:[%s7231_s6 + $0x98] sm:$0xff] }
 0x6d1   :  { %3847 = vpow2.f32 %v3714_v37  ;;  %v3715_v28 = vmul.f32 -1.442695, %v1627_v26  ;;  %v1864_v37 = vld [vmem:[%s7231_s6 + $0xc0] sm:$0xff]  ;;  %v1861_v26 = vld [vmem:[%s7231_s6 + $0xa8] sm:$0xff]  ;;  %v1858_v46 = vld [vmem:[%s7231_s6 + $0x90] sm:$0xff] }
 0x6d3   :  { %3849 = vpow2.f32 %v3715_v28  ;;  %v1863_v28 = vld [vmem:[%s7231_s6 + $0xb8] sm:$0xff] }
 0x6d4   :  { %3851 = vpow2.f32 %v3716_v44  ;;  %v1856_v44 = vld [vmem:[%s7231_s6 + $0x80] sm:$0xff] }
 0x6d5   :  { %3853 = vtanh.f32 %v1629_v47  ;;  %v1853_v47 = vld [vmem:[%s7231_s6 + $0x68] sm:$0xff] }
 0x6de   :  { %v3848_v48 = vpop.eup %3847 }
 0x6df   :  { %v1639_v49 = vadd.f32 1.0, %v3848_v48  ;;  %v1855_v48 = vld [vmem:[%s7231_s6 + $0x78] sm:$0xff] }
 0x6e0   :  { %v3850_v50 = vpop.eup %3849 }
 0x6e1   :  { %3855 = vrcp.f32 %v1639_v49  ;;  %v1640_v51 = vadd.f32 1.0, %v3850_v50  ;;  %v3852_v52 = vpop.eup %3851  ;;  %v1852_v49 = vld [vmem:[%s7231_s6 + $0x60] sm:$0xff]  ;;  %v1854_v50 = vld [vmem:[%s7231_s6 + $0x70] sm:$0xff] }
 0x6e2   :  { %v3854_v53 = vpop.eup %3853  ;;  %v1641_v63 = vadd.f32 1.0, %v3852_v52  ;;  %v1851_v52 = vld [vmem:[%s7231_s6 + $0x58] sm:$0xff] }
 0x6e3   :  { %3857 = vrcp.f32 %v1640_v51  ;;  %v1849_v51 = vld [vmem:[%s7231_s6 + $0x48] sm:$0xff] }
 0x6e4   :  { %3859 = vrcp.f32 %v1641_v63  ;;  %v1844_v63 = vld [vmem:[%s7231_s6 + $0x20] sm:$0xff] }
 0x6ee   :  { %v3856_v55 = vpop.eup %3855 }
 0x6ef   :  { %v1650_v56 = vmul.f32 %v3856_v55, %v3854_v53  ;;  %v1848_v53 = vld [vmem:[%s7231_s6 + $0x40] sm:$0xff]  ;;  %v1850_v55 = vld [vmem:[%s7231_s6 + $0x50] sm:$0xff] }
 0x6f0   :  { %v3858_v57 = vpop.eup %3857 }
 0x6f1   :  { %v1649_v14 = vmul.f32 %v3858_v57, %v5561_v13  ;;  %v3860_v22 = vpop.eup %3859  ;;  %v1889_v13 = vld [vmem:[%s7231_s6 + $0x188] sm:$0xff]  ;;  %v1847_v57 = vld [vmem:[%s7231_s6 + $0x38] sm:$0xff] }
 0x6f3   :  { %v5643_v33 = vadd.f32 %v1650_v56, %v1649_v14  ;;  %v1845_v56 = vld [vmem:[%s7231_s6 + $0x28] sm:$0xff]  ;;  %v1846_v14 = vld [vmem:[%s7231_s6 + $0x30] sm:$0xff] }
 0x6f5   :  { %3861 = vtanh.f32 %v5643_v33 }
 0x702   :  { %v3862_v30 = vpop.eup %3861 }
 0x703   :  { %v5646_v32 = vmul.f32 %v3862_v30, %v3860_v22  ;;  %v1841_v22 = vld [vmem:[%s7231_s6 + $0x8] sm:$0xff]  ;;  %v1843_v30 = vld [vmem:[%s7231_s6 + $0x18] sm:$0xff] }
 0x705   :  { %1724 = vmatmul.mubr.f32.vlgmr.msra.gmra.mxu0 %v5646_v32  ;;  %1795 = vmatmul.mubr.f32.vlgmr.msra.gmra.mxu1 %v5646_v32 }
 0x706   :  { %1927 = vmatpush1.msra.mxu0 %v1900_v20  ;;  %2040 = vmatpush1.msra.mxu1 %v1902_v17  ;;  %v1840_v20 = vld [vmem:[%s7231_s6] sm:$0xff]  ;;  %v1842_v17 = vld [vmem:[%s7231_s6 + $0x10] sm:$0xff] }
 0x707   :  { %1928 = vmatprep.subr.mxu0 %v1897_v19  ;;  %2041 = vmatprep.subr.mxu1 %v1899_v25  ;;  %v7630_v19 = vld [vmem:[#allocation56_spill] sm:$0xff]  ;;  %v7631_v25 = vld [vmem:[#allocation7_spill] sm:$0xff] }
 0x708   :  { %1929 = vmatpush1.msra.mxu0 %v1896_v16  ;;  %2042 = vmatpush1.msra.mxu1 %v1898_v24  ;;  %v7632_v16 = vld [vmem:[#allocation10_spill] sm:$0xff] }
 0x709   :  { %1930 = vmatprep.subr.mxu0 %v1893_v23  ;;  %2043 = vmatprep.subr.mxu1 %v1895_v15  ;;  %v7633_v24 = vld [vmem:[#allocation30_spill] sm:$0xff] }
 0x70a   :  { %1931 = vmatpush1.msra.mxu0 %v1892_v21  ;;  %2044 = vmatpush1.msra.mxu1 %v1894_v12  ;;  %v7634_v23 = vld [vmem:[#allocation26_spill] sm:$0xff] }
 0x70b   :  { %1932 = vmatprep.subr.mxu0 %v1889_v13  ;;  %2045 = vmatprep.subr.mxu1 %v1891_v9  ;;  %v5869_v15 = vld [vmem:[%s7232_s7 + $0x1e8] sm:$0xff]  ;;  %v5886_v21 = vld [vmem:[%s7232_s7 + $0x1f0] sm:$0xff]  ;;  %v5898_v13 = vld [vmem:[%s7232_s7 + $0x1d8] sm:$0xff] }
 0x70c   :  { %1933 = vmatpush1.msra.mxu0 %v1888_v60  ;;  %2046 = vmatpush1.msra.mxu1 %v1890_v5  ;;  %7635 = vst [vmem:[#allocation27_spill] sm:$0xff] %v5869_v15  ;;  %v5893_v12 = vld [vmem:[%s7232_s7 + $0x1c8] sm:$0xff]  ;;  %v5905_v9 = vld [vmem:[%s7232_s7 + $0x1c0] sm:$0xff]  ;;  %v5910_v60 = vld [vmem:[%s7232_s7 + $0x1d0] sm:$0xff] }
 0x70d   :  { %1934 = vmatprep.subr.mxu0 %v1885_v39  ;;  %2047 = vmatprep.subr.mxu1 %v1887_v40  ;;  %v5917_v5 = vld [vmem:[%s7232_s7 + $0x1a8] sm:$0xff]  ;;  %v5922_v39 = vld [vmem:[%s7232_s7 + $0x1b8] sm:$0xff]  ;;  %v5929_v40 = vld [vmem:[%s7232_s7 + $0x1a0] sm:$0xff] }
 0x70e   :  { %1935 = vmatpush1.msra.mxu0 %v1884_v1  ;;  %2048 = vmatpush1.msra.mxu1 %v1886_v41  ;;  %v5934_v1 = vld [vmem:[%s7232_s7 + $0x1b0] sm:$0xff]  ;;  %v5941_v41 = vld [vmem:[%s7232_s7 + $0x188] sm:$0xff] }
 0x70f   :  { %1936 = vmatprep.subr.mxu0 %v1881_v42  ;;  %2049 = vmatprep.subr.mxu1 %v1883_v11  ;;  %v5946_v42 = vld [vmem:[%s7232_s7 + $0x198] sm:$0xff]  ;;  %v5953_v11 = vld [vmem:[%s7232_s7 + $0x180] sm:$0xff] }
 0x710   :  { %1937 = vmatpush1.msra.mxu0 %v1880_v7  ;;  %2050 = vmatpush1.msra.mxu1 %v1882_v45  ;;  %v5958_v7 = vld [vmem:[%s7232_s7 + $0x190] sm:$0xff]  ;;  %v5965_v45 = vld [vmem:[%s7232_s7 + $0x168] sm:$0xff] }
 0x711   :  { %1938 = vmatprep.subr.mxu0 %v1877_v62  ;;  %2051 = vmatprep.subr.mxu1 %v1879_v0  ;;  %v5970_v62 = vld [vmem:[%s7232_s7 + $0x178] sm:$0xff]  ;;  %v5977_v0 = vld [vmem:[%s7232_s7 + $0x160] sm:$0xff] }
 0x712   :  { %1939 = vmatpush1.msra.mxu0 %v1876_v8  ;;  %2052 = vmatpush1.msra.mxu1 %v1878_v54  ;;  %v5982_v8 = vld [vmem:[%s7232_s7 + $0x170] sm:$0xff]  ;;  %v5989_v54 = vld [vmem:[%s7232_s7 + $0x148] sm:$0xff] }
 0x713   :  { %1940 = vmatprep.subr.mxu0 %v1873_v2  ;;  %2053 = vmatprep.subr.mxu1 %v1875_v36  ;;  %v5994_v2 = vld [vmem:[%s7232_s7 + $0x158] sm:$0xff]  ;;  %v6001_v36 = vld [vmem:[%s7232_s7 + $0x140] sm:$0xff] }
 0x714   :  { %1941 = vmatpush1.msra.mxu0 %v1872_v3  ;;  %2054 = vmatpush1.msra.mxu1 %v1874_v61  ;;  %v6006_v3 = vld [vmem:[%s7232_s7 + $0x150] sm:$0xff]  ;;  %v6013_v61 = vld [vmem:[%s7232_s7 + $0x128] sm:$0xff] }
 0x715   :  { %1942 = vmatprep.subr.mxu0 %v1869_v10  ;;  %2055 = vmatprep.subr.mxu1 %v1871_v4  ;;  %v6018_v10 = vld [vmem:[%s7232_s7 + $0x138] sm:$0xff]  ;;  %v6025_v4 = vld [vmem:[%s7232_s7 + $0x120] sm:$0xff] }
 0x716   :  { %1943 = vmatpush1.msra.mxu0 %v1868_v18  ;;  %2056 = vmatpush1.msra.mxu1 %v1870_v6  ;;  %v6030_v18 = vld [vmem:[%s7232_s7 + $0x130] sm:$0xff]  ;;  %v6037_v6 = vld [vmem:[%s7232_s7 + $0x108] sm:$0xff] }
 0x717   :  { %1944 = vmatprep.subr.mxu0 %v1865_v27  ;;  %2057 = vmatprep.subr.mxu1 %v1867_v34  ;;  %v6042_v27 = vld [vmem:[%s7232_s7 + $0x118] sm:$0xff]  ;;  %v6049_v34 = vld [vmem:[%s7232_s7 + $0x100] sm:$0xff] }
 0x718   :  { %1945 = vmatpush1.msra.mxu0 %v1864_v37  ;;  %2058 = vmatpush1.msra.mxu1 %v1866_v38  ;;  %v6054_v37 = vld [vmem:[%s7232_s7 + $0x110] sm:$0xff]  ;;  %v6061_v38 = vld [vmem:[%s7232_s7 + $0xe8] sm:$0xff] }
 0x719   :  { %1946 = vmatprep.subr.mxu0 %v1861_v26  ;;  %2059 = vmatprep.subr.mxu1 %v1863_v28  ;;  %v6066_v26 = vld [vmem:[%s7232_s7 + $0xf8] sm:$0xff]  ;;  %v6073_v28 = vld [vmem:[%s7232_s7 + $0xe0] sm:$0xff] }
 0x71a   :  { %1947 = vmatpush1.msra.mxu0 %v1860_v29  ;;  %2060 = vmatpush1.msra.mxu1 %v1862_v31  ;;  %v6078_v29 = vld [vmem:[%s7232_s7 + $0xf0] sm:$0xff]  ;;  %v6085_v31 = vld [vmem:[%s7232_s7 + $0xc8] sm:$0xff] }
 0x71b   :  { %1948 = vmatprep.subr.mxu0 %v1857_v35  ;;  %2061 = vmatprep.subr.mxu1 %v1859_v43  ;;  %v6090_v35 = vld [vmem:[%s7232_s7 + $0xd8] sm:$0xff]  ;;  %v6097_v43 = vld [vmem:[%s7232_s7 + $0xc0] sm:$0xff] }
 0x71c   :  { %1949 = vmatpush1.msra.mxu0 %v1856_v44  ;;  %2062 = vmatpush1.msra.mxu1 %v1858_v46  ;;  %v6102_v44 = vld [vmem:[%s7232_s7 + $0xd0] sm:$0xff]  ;;  %v6109_v46 = vld [vmem:[%s7232_s7 + $0xa8] sm:$0xff] }
 0x71d   :  { %1950 = vmatprep.subr.mxu0 %v1853_v47  ;;  %2063 = vmatprep.subr.mxu1 %v1855_v48  ;;  %v6114_v47 = vld [vmem:[%s7232_s7 + $0xb8] sm:$0xff]  ;;  %v6121_v48 = vld [vmem:[%s7232_s7 + $0xa0] sm:$0xff] }
 0x71e   :  { %1951 = vmatpush1.msra.mxu0 %v1852_v49  ;;  %2064 = vmatpush1.msra.mxu1 %v1854_v50  ;;  %v6126_v49 = vld [vmem:[%s7232_s7 + $0xb0] sm:$0xff]  ;;  %v6133_v50 = vld [vmem:[%s7232_s7 + $0x88] sm:$0xff] }
 0x71f   :  { %1952 = vmatprep.subr.mxu0 %v1849_v51  ;;  %2065 = vmatprep.subr.mxu1 %v1851_v52  ;;  %7637 = vst [vmem:[#allocation34_spill] sm:$0xff] %v6126_v49  ;;  %7638 = vst [vmem:[#allocation33_spill] sm:$0xff] %v6133_v50  ;;  %v6138_v51 = vld [vmem:[%s7232_s7 + $0x98] sm:$0xff]  ;;  %v6145_v52 = vld [vmem:[%s7232_s7 + $0x80] sm:$0xff] }
 0x720   :  { %1953 = vmatpush1.msra.mxu0 %v1848_v53  ;;  %2066 = vmatpush1.msra.mxu1 %v1850_v55  ;;  %7639 = vst [vmem:[#allocation35_spill] sm:$0xff] %v6138_v51  ;;  %7640 = vst [vmem:[#allocation36_spill] sm:$0xff] %v6145_v52  ;;  %v6150_v53 = vld [vmem:[%s7232_s7 + $0x90] sm:$0xff]  ;;  %v6157_v55 = vld [vmem:[%s7232_s7 + $0x68] sm:$0xff] }
 0x721   :  { %1954 = vmatprep.subr.mxu0 %v1845_v56  ;;  %2067 = vmatprep.subr.mxu1 %v1847_v57  ;;  %7641 = vst [vmem:[#allocation38_spill] sm:$0xff] %v6150_v53  ;;  %7642 = vst [vmem:[#allocation37_spill] sm:$0xff] %v6157_v55  ;;  %v6162_v56 = vld [vmem:[%s7232_s7 + $0x78] sm:$0xff]  ;;  %v6169_v57 = vld [vmem:[%s7232_s7 + $0x60] sm:$0xff] }
 0x722   :  { %1955 = vmatpush1.msra.mxu0 %v1844_v63  ;;  %2068 = vmatpush1.msra.mxu1 %v1846_v14  ;;  %7643 = vst [vmem:[#allocation39_spill] sm:$0xff] %v6162_v56  ;;  %7644 = vst [vmem:[#allocation5_spill] sm:$0xff] %v6169_v57  ;;  %v6174_v63 = vld [vmem:[%s7232_s7 + $0x70] sm:$0xff]  ;;  %v6181_v14 = vld [vmem:[%s7232_s7 + $0x48] sm:$0xff] }
 0x723   :  { %1956 = vmatprep.subr.mxu0 %v1841_v22  ;;  %2069 = vmatprep.subr.mxu1 %v1843_v30  ;;  %7645 = vst [vmem:[#allocation6_spill] sm:$0xff] %v6174_v63  ;;  %7646 = vst [vmem:[#allocation40_spill] sm:$0xff] %v6181_v14  ;;  %v6186_v22 = vld [vmem:[%s7232_s7 + $0x58] sm:$0xff]  ;;  %v6193_v30 = vld [vmem:[%s7232_s7 + $0x40] sm:$0xff] }
 0x724   :  { %1957 = vmatpush1.msra.mxu0 %v1840_v20  ;;  %1990 = vmatprep.mubr.f32.mxu0 %v7625_v58  ;;  %7647 = vst [vmem:[#allocation42_spill] sm:$0xff] %v6186_v22  ;;  %7648 = vst [vmem:[#allocation41_spill] sm:$0xff] %v6193_v30  ;;  %v6198_v20 = vld [vmem:[%s7232_s7 + $0x50] sm:$0xff] }
 0x725   :  { %2070 = vmatpush1.msra.mxu1 %v1842_v17  ;;  %2103 = vmatprep.mubr.f32.mxu1 %v7625_v58  ;;  %7649 = vst [vmem:[#allocation43_spill] sm:$0xff] %v6198_v20  ;;  %v6205_v17 = vld [vmem:[%s7232_s7 + $0x28] sm:$0xff] }
 0x726   :  { %1991 = vmatmul.mubr.f32.vlgmr.msra.gmra.mxu0 %v7630_v19  ;;  %2104 = vmatmul.mubr.f32.vlgmr.msra.gmra.mxu1 %v7630_v19  ;;  %7650 = vst [vmem:[#allocation8_spill] sm:$0xff] %v6205_v17  ;;  %v6210_v19 = vld [vmem:[%s7232_s7 + $0x38] sm:$0xff] }
 0x727   :  { %1996 = vmatprep.mubr.f32.mxu0 %v7625_v58  ;;  %2109 = vmatprep.mubr.f32.mxu1 %v7625_v58  ;;  %7651 = vst [vmem:[#allocation9_spill] sm:$0xff] %v6210_v19 }
 0x728   :  { %2256 = vmatprep.subr.mxu0 %v5869_v15 }
 0x72a   :  { %1997 = vmatmul.mubr.f32.gmra.mxu0 %v7631_v25  ;;  %2110 = vmatmul.mubr.f32.gmra.mxu1 %v7631_v25  ;;  %v6217_v25 = vld [vmem:[%s7232_s7 + $0x20] sm:$0xff] }
 0x72b   :  { %2002 = vmatprep.mubr.f32.mxu0 %v7625_v58  ;;  %2115 = vmatprep.mubr.f32.mxu1 %v7625_v58  ;;  %7652 = vst [vmem:[#allocation44_spill] sm:$0xff] %v6217_v25 }
 0x72e   :  { %2003 = vmatmul.mubr.f32.gmra.mxu0 %v7632_v16  ;;  %2116 = vmatmul.mubr.f32.gmra.mxu1 %v7632_v16  ;;  %v6222_v16 = vld [vmem:[%s7232_s7 + $0x30] sm:$0xff] }
 0x72f   :  { %2008 = vmatprep.mubr.f32.mxu0 %v7625_v58  ;;  %2121 = vmatprep.mubr.f32.mxu1 %v7625_v58  ;;  %7653 = vst [vmem:[#allocation46_spill] sm:$0xff] %v6222_v16 }
 0x732   :  { %2009 = vmatmul.mubr.f32.gmra.mxu0 %v7633_v24  ;;  %2122 = vmatmul.mubr.f32.gmra.mxu1 %v7633_v24  ;;  %v6227_v24 = vld [vmem:[%s7232_s7 + $0x8] sm:$0xff] }
 0x733   :  { %2014 = vmatprep.mubr.f32.mxu0 %v7625_v58  ;;  %2127 = vmatprep.mubr.f32.mxu1 %v7625_v58  ;;  %7654 = vst [vmem:[#allocation45_spill] sm:$0xff] %v6227_v24 }
 0x736   :  { %2015 = vmatmul.mubr.f32.gmra.mxu0 %v7634_v23  ;;  %2128 = vmatmul.mubr.f32.gmra.mxu1 %v7634_v23  ;;  %v6234_v23 = vld [vmem:[%s7232_s7 + $0x18] sm:$0xff] }
 0x737   :  { %2020 = vmatprep.mubr.f32.mxu0 %v7625_v58  ;;  %2133 = vmatprep.mubr.f32.mxu1 %v7625_v58  ;;  %7655 = vst [vmem:[#allocation47_spill] sm:$0xff] %v6234_v23 }
 0x73a   :  { %2021 = vmatmul.mubr.f32.gmra.mxu0 %v5564_v59  ;;  %2134 = vmatmul.mubr.f32.gmra.mxu1 %v5564_v59  ;;  %v5874_v59 = vld [vmem:[%s7232_s7 + $0x1f8] sm:$0xff] }
 0x73b   :  { %2026 = vmatprep.mubr.f32.mxu0 %v7625_v58  ;;  %2139 = vmatprep.mubr.f32.mxu1 %v7625_v58  ;;  %7636 = vst [vmem:[#allocation32_spill] sm:$0xff] %v5874_v59 }
 0x73c   :  { %2327 = vmatprep.subr.mxu1 %v5874_v59 }
 0x73d   :  { %2328 = vmatpush1.msra.mxu1 %v5886_v21 }
 0x73e   :  { %2027 = vmatmul.mubr.f32.gmra.mxu0 %v5646_v32  ;;  %2140 = vmatmul.mubr.f32.gmra.mxu1 %v5646_v32  ;;  %v5881_v32 = vld [vmem:[%s7232_s7 + $0x1e0] sm:$0xff] }
 0x73f   :  { %2032 = vmatprep.mubr.f32.mxu0 %v7625_v58  ;;  %2145 = vmatprep.mubr.f32.mxu1 %v7625_v58 }
 0x740   :  { %2257 = vmatpush1.msra.mxu0 %v5881_v32  ;;  %2329 = vmatprep.subr.mxu1 %v5898_v13 }
 0x741   :  { %2258 = vmatprep.subr.mxu0 %v5893_v12  ;;  %2330 = vmatpush1.msra.mxu1 %v5910_v60 }
 0x742   :  { %2259 = vmatpush1.msra.mxu0 %v5905_v9  ;;  %2331 = vmatprep.subr.mxu1 %v5922_v39 }
 0x743   :  { %2260 = vmatprep.subr.mxu0 %v5917_v5  ;;  %2332 = vmatpush1.msra.mxu1 %v5934_v1 }
 0x744   :  { %2261 = vmatpush1.msra.mxu0 %v5929_v40  ;;  %2333 = vmatprep.subr.mxu1 %v5946_v42 }
 0x745   :  { %2262 = vmatprep.subr.mxu0 %v5941_v41  ;;  %2334 = vmatpush1.msra.mxu1 %v5958_v7 }
 0x746   :  { %2263 = vmatpush1.msra.mxu0 %v5953_v11  ;;  %2335 = vmatprep.subr.mxu1 %v5970_v62 }
 0x747   :  { %2264 = vmatprep.subr.mxu0 %v5965_v45  ;;  %2336 = vmatpush1.msra.mxu1 %v5982_v8 }
 0x748   :  { %2265 = vmatpush1.msra.mxu0 %v5977_v0  ;;  %2337 = vmatprep.subr.mxu1 %v5994_v2 }
 0x749   :  { %2266 = vmatprep.subr.mxu0 %v5989_v54  ;;  %2338 = vmatpush1.msra.mxu1 %v6006_v3 }
 0x74a   :  { %2267 = vmatpush1.msra.mxu0 %v6001_v36  ;;  %2339 = vmatprep.subr.mxu1 %v6018_v10 }
 0x74b   :  { %2268 = vmatprep.subr.mxu0 %v6013_v61  ;;  %2340 = vmatpush1.msra.mxu1 %v6030_v18 }
 0x74c   :  { %2269 = vmatpush1.msra.mxu0 %v6025_v4  ;;  %2341 = vmatprep.subr.mxu1 %v6042_v27 }
 0x74d   :  { %2270 = vmatprep.subr.mxu0 %v6037_v6  ;;  %2342 = vmatpush1.msra.mxu1 %v6054_v37 }
 0x74e   :  { %2271 = vmatpush1.msra.mxu0 %v6049_v34  ;;  %2343 = vmatprep.subr.mxu1 %v6066_v26 }
 0x74f   :  { %2272 = vmatprep.subr.mxu0 %v6061_v38  ;;  %2344 = vmatpush1.msra.mxu1 %v6078_v29 }
 0x750   :  { %2273 = vmatpush1.msra.mxu0 %v6073_v28  ;;  %2345 = vmatprep.subr.mxu1 %v6090_v35 }
 0x751   :  { %2274 = vmatprep.subr.mxu0 %v6085_v31  ;;  %2346 = vmatpush1.msra.mxu1 %v6102_v44 }
 0x752   :  { %2275 = vmatpush1.msra.mxu0 %v6097_v43  ;;  %2347 = vmatprep.subr.mxu1 %v6114_v47 }
 0x753   :  { %2276 = vmatprep.subr.mxu0 %v6109_v46  ;;  %2348 = vmatpush1.msra.mxu1 %v6126_v49 }
 0x754   :  { %2277 = vmatpush1.msra.mxu0 %v6121_v48  ;;  %2349 = vmatprep.subr.mxu1 %v6138_v51 }
 0x755   :  { %2278 = vmatprep.subr.mxu0 %v6133_v50  ;;  %2350 = vmatpush1.msra.mxu1 %v6150_v53 }
 0x756   :  { %2279 = vmatpush1.msra.mxu0 %v6145_v52  ;;  %2351 = vmatprep.subr.mxu1 %v6162_v56 }
 0x757   :  { %2280 = vmatprep.subr.mxu0 %v6157_v55  ;;  %2352 = vmatpush1.msra.mxu1 %v6174_v63 }
 0x758   :  { %2281 = vmatpush1.msra.mxu0 %v6169_v57  ;;  %2353 = vmatprep.subr.mxu1 %v6186_v22 }
 0x759   :  { %2282 = vmatprep.subr.mxu0 %v6181_v14  ;;  %2354 = vmatpush1.msra.mxu1 %v6198_v20  ;;  %v7659_v14 = vld [vmem:[#allocation54_spill] sm:$0xff] }
 0x75a   :  { %2283 = vmatpush1.msra.mxu0 %v6193_v30  ;;  %2355 = vmatprep.subr.mxu1 %v6210_v19  ;;  %v6239_v19 = vld [vmem:[%s7232_s7] sm:$0xff] }
 0x75b   :  { %2284 = vmatprep.subr.mxu0 %v6205_v17  ;;  %2356 = vmatpush1.msra.mxu1 %v6222_v16  ;;  %7656 = vst [vmem:[#allocation29_spill] sm:$0xff] %v6239_v19  ;;  %v6244_v17 = vld [vmem:[%s7232_s7 + $0x10] sm:$0xff] }
 0x75c   :  { %2285 = vmatpush1.msra.mxu0 %v6217_v25  ;;  %7657 = vst [vmem:[#allocation31_spill] sm:$0xff] %v6244_v17  ;;  %2357 = vmatprep.subr.mxu1 %v6234_v23  ;;  %v7658_v25 = vld [vmem:[#allocation52_spill] sm:$0xff]  ;;  %v7660_v23 = vld [vmem:[#allocation53_spill] sm:$0xff] }
 0x75d   :  { %2286 = vmatprep.subr.mxu0 %v6227_v24  ;;  %2358 = vmatpush1.msra.mxu1 %v6244_v17  ;;  %v7661_v17 = vld [vmem:[#allocation55_spill] sm:$0xff] }
 0x75e   :  { %2287 = vmatpush1.msra.mxu0 %v6239_v19  ;;  %2501 = vmatprep.subr.mxu1 %v5874_v59 }
 0x75f   :  { %2430 = vmatprep.subr.mxu0 %v5869_v15 }
 0x7c5   :  { %v1725_v16 = vpop.f32.mrf.mxu0  ;;  %v1796_v24 = vpop.f32.mrf.mxu1 }
 0x7c6   :  { %v1801_v20 = vadd.f32 %v1725_v16, %v7658_v25  ;;  %v1803_v56 = vadd.f32 %v1796_v24, %v7660_v23  ;;  %v7667_v23 = vld [vmem:[#allocation6_spill] sm:$0xff] }
 0x7c7   :  { %v1727_v30 = vpop.f32.mrf.mxu0  ;;  %v1798_v19 = vpop.f32.mrf.mxu1 }
 0x7c8   :  { %v3717_v22 = vmul.f32 -1.442695, %v1801_v20  ;;  %v1802_v63 = vadd.f32 %v1727_v30, %v7659_v14  ;;  %v3719_v55 = vmul.f32 -1.442695, %v1803_v56  ;;  %v1804_v53 = vadd.f32 %v1798_v19, %v7661_v17  ;;  %v7664_v56 = vld [vmem:[#allocation37_spill] sm:$0xff]  ;;  %v7665_v17 = vld [vmem:[#allocation39_spill] sm:$0xff] }
 0x7c9   :  { %v7666_v19 = vld [vmem:[#allocation5_spill] sm:$0xff] }
 0x7ca   :  { %3863 = vpow2.f32 %v3717_v22  ;;  %v3718_v57 = vmul.f32 -1.442695, %v1802_v63 }
 0x7cc   :  { %3865 = vpow2.f32 %v3718_v57 }
 0x7cd   :  { %3867 = vpow2.f32 %v3719_v55  ;;  %v7663_v55 = vld [vmem:[#allocation38_spill] sm:$0xff] }
 0x7ce   :  { %3869 = vtanh.f32 %v1804_v53 }
 0x7d7   :  { %v3864_v15 = vpop.eup %3863 }
 0x7d8   :  { %v1814_v52 = vadd.f32 1.0, %v3864_v15 }
 0x7d9   :  { %v3866_v59 = vpop.eup %3865 }
 0x7da   :  { %3871 = vrcp.f32 %v1814_v52  ;;  %v1815_v25 = vadd.f32 1.0, %v3866_v59  ;;  %v3868_v20 = vpop.eup %3867  ;;  %v7662_v59 = vld [vmem:[#allocation36_spill] sm:$0xff] }
 0x7db   :  { %v3870_v14 = vpop.eup %3869  ;;  %v1816_v30 = vadd.f32 1.0, %v3868_v20  ;;  %v7669_v20 = vld [vmem:[#allocation42_spill] sm:$0xff] }
 0x7dc   :  { %3873 = vrcp.f32 %v1815_v25  ;;  %v7668_v25 = vld [vmem:[#allocation40_spill] sm:$0xff] }
 0x7dd   :  { %3875 = vrcp.f32 %v1816_v30  ;;  %v7674_v30 = vld [vmem:[#allocation44_spill] sm:$0xff] }
 0x7e7   :  { %v3872_v22 = vpop.eup %3871 }
 0x7e8   :  { %v1825_v63 = vmul.f32 %v3872_v22, %v3870_v14  ;;  %v7670_v14 = vld [vmem:[#allocation41_spill] sm:$0xff]  ;;  %v7671_v22 = vld [vmem:[#allocation43_spill] sm:$0xff] }
 0x7e9   :  { %v3874_v57 = vpop.eup %3873 }
 0x7ea   :  { %v1824_v16 = vmul.f32 %v3874_v57, %v5643_v33  ;;  %v3876_v15 = vpop.eup %3875  ;;  %v3720_v33 = vld [vmem:[%s7228_s1 + $0x8] sm:$0xff] }
 0x7eb   :  { %v7673_v57 = vld [vmem:[#allocation9_spill] sm:$0xff] }
 0x7ec   :  { %v1826_v24 = vadd.f32 %v1825_v63, %v1824_v16  ;;  %v7672_v63 = vld [vmem:[#allocation8_spill] sm:$0xff]  ;;  %v7675_v16 = vld [vmem:[#allocation46_spill] sm:$0xff] }
 0x7ee   :  { %1831 = vst [vmem:[%s7233_s13] sm:$0xff] %v1826_v24  ;;  %3877 = vtanh.f32 %v1826_v24  ;;  %v7676_v24 = vld [vmem:[#allocation45_spill] sm:$0xff] }
 0x7fb   :  { %v3878_v53 = vpop.eup %3877 }
 0x7fc   :  { %v1828_v52 = vmul.f32 %v3878_v53, %v3876_v15  ;;  %v7677_v15 = vld [vmem:[#allocation47_spill] sm:$0xff]  ;;  %v7678_v53 = vld [vmem:[#allocation29_spill] sm:$0xff] }
 0x7fe   :  { %2033 = vmatmul.mubr.f32.gmra.mxu0 %v1828_v52  ;;  %2146 = vmatmul.mubr.f32.gmra.mxu1 %v1828_v52  ;;  %1830 = vst [vmem:[%s7234_s12] sm:$0xff] %v1828_v52  ;;  %v7679_v52 = vld [vmem:[#allocation31_spill] sm:$0xff] }
 0x7ff   :  { %2320 = vmatprep.mubr.f32.mxu0 %v7625_v58  ;;  %2391 = vmatprep.mubr.f32.mxu1 %v7625_v58 }
 0x802   :  { %2321 = vmatmul.mubr.f32.vlgmr.msra.gmra.mxu0 %v3720_v33  ;;  %2392 = vmatmul.mubr.f32.vlgmr.msra.gmra.mxu1 %v3720_v33  ;;  %v7680_v33 = vld [vmem:[#allocation27_spill] sm:$0xff] }
 0x803   :  { %2431 = vmatpush1.msra.mxu0 %v5881_v32  ;;  %2502 = vmatpush1.msra.mxu1 %v5886_v21 }
 0x804   :  { %2432 = vmatprep.subr.mxu0 %v5893_v12  ;;  %2503 = vmatprep.subr.mxu1 %v5898_v13 }
 0x805   :  { %2433 = vmatpush1.msra.mxu0 %v5905_v9  ;;  %2504 = vmatpush1.msra.mxu1 %v5910_v60 }
 0x806   :  { %2434 = vmatprep.subr.mxu0 %v5917_v5  ;;  %2505 = vmatprep.subr.mxu1 %v5922_v39 }
 0x807   :  { %2435 = vmatpush1.msra.mxu0 %v5929_v40  ;;  %2506 = vmatpush1.msra.mxu1 %v5934_v1 }
 0x808   :  { %2436 = vmatprep.subr.mxu0 %v5941_v41  ;;  %2507 = vmatprep.subr.mxu1 %v5946_v42 }
 0x809   :  { %2437 = vmatpush1.msra.mxu0 %v5953_v11  ;;  %2508 = vmatpush1.msra.mxu1 %v5958_v7 }
 0x80a   :  { %2438 = vmatprep.subr.mxu0 %v5965_v45  ;;  %2509 = vmatprep.subr.mxu1 %v5970_v62 }
 0x80b   :  { %2439 = vmatpush1.msra.mxu0 %v5977_v0  ;;  %2510 = vmatpush1.msra.mxu1 %v5982_v8 }
 0x80c   :  { %2440 = vmatprep.subr.mxu0 %v5989_v54  ;;  %2511 = vmatprep.subr.mxu1 %v5994_v2 }
 0x80d   :  { %2441 = vmatpush1.msra.mxu0 %v6001_v36  ;;  %2512 = vmatpush1.msra.mxu1 %v6006_v3 }
 0x80e   :  { %2442 = vmatprep.subr.mxu0 %v6013_v61  ;;  %2513 = vmatprep.subr.mxu1 %v6018_v10 }
 0x80f   :  { %2443 = vmatpush1.msra.mxu0 %v6025_v4  ;;  %2514 = vmatpush1.msra.mxu1 %v6030_v18 }
 0x810   :  { %2444 = vmatprep.subr.mxu0 %v6037_v6  ;;  %2515 = vmatprep.subr.mxu1 %v6042_v27 }
 0x811   :  { %2445 = vmatpush1.msra.mxu0 %v6049_v34  ;;  %2516 = vmatpush1.msra.mxu1 %v6054_v37 }
 0x812   :  { %2446 = vmatprep.subr.mxu0 %v6061_v38  ;;  %2517 = vmatprep.subr.mxu1 %v6066_v26 }
 0x813   :  { %2447 = vmatpush1.msra.mxu0 %v6073_v28  ;;  %2518 = vmatpush1.msra.mxu1 %v6078_v29 }
 0x814   :  { %2448 = vmatprep.subr.mxu0 %v6085_v31  ;;  %2519 = vmatprep.subr.mxu1 %v6090_v35 }
 0x815   :  { %2449 = vmatpush1.msra.mxu0 %v6097_v43  ;;  %2520 = vmatpush1.msra.mxu1 %v6102_v44 }
 0x816   :  { %2450 = vmatprep.subr.mxu0 %v6109_v46  ;;  %2521 = vmatprep.subr.mxu1 %v6114_v47 }
 0x817   :  { %2451 = vmatpush1.msra.mxu0 %v6121_v48  ;;  %2522 = vmatpush1.msra.mxu1 %v6126_v49 }
 0x818   :  { %2452 = vmatprep.subr.mxu0 %v6133_v50  ;;  %2523 = vmatprep.subr.mxu1 %v6138_v51 }
 0x819   :  { %2453 = vmatpush1.msra.mxu0 %v7662_v59  ;;  %2524 = vmatpush1.msra.mxu1 %v7663_v55 }
 0x81a   :  { %2454 = vmatprep.subr.mxu0 %v7664_v56  ;;  %2525 = vmatprep.subr.mxu1 %v7665_v17 }
 0x81b   :  { %2455 = vmatpush1.msra.mxu0 %v7666_v19  ;;  %2526 = vmatpush1.msra.mxu1 %v7667_v23 }
 0x81c   :  { %2456 = vmatprep.subr.mxu0 %v7668_v25  ;;  %2527 = vmatprep.subr.mxu1 %v7669_v20 }
 0x81d   :  { %2457 = vmatpush1.msra.mxu0 %v7670_v14  ;;  %2528 = vmatpush1.msra.mxu1 %v7671_v22  ;;  %v2105_v22 = vpop.f32.mrf.mxu1 }
 0x81e   :  { %2458 = vmatprep.subr.mxu0 %v7672_v63  ;;  %2529 = vmatprep.subr.mxu1 %v7673_v57  ;;  %v7681_v63 = vld [vmem:[#allocation32_spill] sm:$0xff]  ;;  %v1992_v57 = vpop.f32.mrf.mxu0 }
 0x81f   :  { %2459 = vmatpush1.msra.mxu0 %v7674_v30  ;;  %2530 = vmatpush1.msra.mxu1 %v7675_v16 }
 0x820   :  { %2460 = vmatprep.subr.mxu0 %v7676_v24  ;;  %2531 = vmatprep.subr.mxu1 %v7677_v15  ;;  %v1994_v30 = vpop.f32.mrf.mxu0  ;;  %v2107_v24 = vpop.f32.mrf.mxu1 }
 0x821   :  { %2461 = vmatpush1.msra.mxu0 %v7678_v53  ;;  %2494 = vmatprep.mubr.f32.mxu0 %v7625_v58 }
 0x822   :  { %2532 = vmatpush1.msra.mxu1 %v7679_v52  ;;  %2565 = vmatprep.mubr.f32.mxu1 %v7625_v58  ;;  %v6334_v16 = vpop.f32.mrf.mxu0  ;;  %v6338_v15 = vpop.f32.mrf.mxu1 }
 0x823   :  { %2604 = vmatprep.subr.mxu0 %v7680_v33  ;;  %2675 = vmatprep.subr.mxu1 %v7681_v63  ;;  %7682 = vst [vmem:[#allocation11_spill] sm:$0xff] %v6334_v16  ;;  %7684 = vst [vmem:[#allocation13_spill] sm:$0xff] %v6338_v15 }
 0x824   :  { %v6336_v14 = vpop.f32.mrf.mxu0  ;;  %v6342_v20 = vpop.f32.mrf.mxu1 }
 0x825   :  { %7683 = vst [vmem:[#allocation12_spill] sm:$0xff] %v6336_v14  ;;  %7686 = vst [vmem:[#allocation15_spill] sm:$0xff] %v6342_v20 }
 0x826   :  { %v6340_v53 = vpop.f32.mrf.mxu0  ;;  %v6346_v58 = vpop.f32.mrf.mxu1 }
 0x827   :  { %7685 = vst [vmem:[#allocation14_spill] sm:$0xff] %v6340_v53  ;;  %7688 = vst [vmem:[#allocation17_spill] sm:$0xff] %v6346_v58 }
 0x828   :  { %v6344_v52 = vpop.f32.mrf.mxu0  ;;  %v6350_v63 = vpop.f32.mrf.mxu1 }
 0x829   :  { %7687 = vst [vmem:[#allocation16_spill] sm:$0xff] %v6344_v52  ;;  %7690 = vst [vmem:[#allocation19_spill] sm:$0xff] %v6350_v63 }
 0x82a   :  { %v6348_v33 = vpop.f32.mrf.mxu0  ;;  %v6354_v16 = vpop.f32.mrf.mxu1 }
 0x82b   :  { %7689 = vst [vmem:[#allocation18_spill] sm:$0xff] %v6348_v33  ;;  %7692 = vst [vmem:[#allocation21_spill] sm:$0xff] %v6354_v16 }
 0x82c   :  { %v6352_v25 = vpop.f32.mrf.mxu0  ;;  %v6358_v14 = vpop.f32.mrf.mxu1 }
 0x82d   :  { %7691 = vst [vmem:[#allocation20_spill] sm:$0xff] %v6352_v25  ;;  %7694 = vst [vmem:[#allocation23_spill] sm:$0xff] %v6358_v14 }
 0x82e   :  { %v6356_v23 = vpop.f32.mrf.mxu0  ;;  %v6362_v53 = vpop.f32.mrf.mxu1 }
 0x82f   :  { %7693 = vst [vmem:[#allocation22_spill] sm:$0xff] %v6356_v23  ;;  %7696 = vst [vmem:[#allocation25_spill] sm:$0xff] %v6362_v53  ;;  %v1904_v23 = vld [vmem:[%s7235_s8] sm:$0xf] }
 0x830   :  { %v6360_v15 = vpop.f32.mrf.mxu0  ;;  %v6366_v52 = vpop.f32.mrf.mxu1 }
 0x831   :  { %7695 = vst [vmem:[#allocation24_spill] sm:$0xff] %v6360_v15  ;;  %7698 = vst [vmem:[#allocation50_spill] sm:$0xff] %v6366_v52  ;;  %v7704_v15 = vld [vmem:[#allocation28_spill] sm:$0xff] }
 0x832   :  { %v6364_v20 = vpop.f32.mrf.mxu0  ;;  %v6370_v33 = vpop.f32.mrf.mxu1  ;;  %v7705_v53 = vsub.s32 0, %v7704_v15  ;;  %v7715_v51 = vsub.s32 2, %v7704_v15 }
 0x833   :  { %7697 = vst [vmem:[#allocation48_spill] sm:$0xff] %v6364_v20  ;;  %7700 = vst [vmem:[#allocation51_spill] sm:$0xff] %v6370_v33  ;;  %v7709_v33 = vsub.s32 1, %v7704_v15 }
 0x834   :  { %v6368_v58 = vpop.f32.mrf.mxu0  ;;  %v6374_v25 = vpop.f32.mrf.mxu1  ;;  %v6383_v16 = vrot.slane %v1904_v23, %v7705_v53 }
 0x835   :  { %7699 = vst [vmem:[#allocation49_spill] sm:$0xff] %v6368_v58  ;;  %7702 = vst [vmem:[#allocation7_spill] sm:$0xff] %v6374_v25  ;;  %v6391_v58 = vrot.slane %v1904_v23, %v7709_v33 }
 0x836   :  { %v6372_v63 = vpop.f32.mrf.mxu0  ;;  %7706 = vst [vmem:[#allocation30_spill] sm:$0xff] %v6383_v16  ;;  %v6385_v20 = vpop.f32.mrf.mxu1  ;;  %v1993_v25 = vadd.f32 %v1992_v57, %v6383_v16 }
 0x837   :  { %7701 = vst [vmem:[#allocation56_spill] sm:$0xff] %v6372_v63  ;;  %7707 = vst [vmem:[#allocation26_spill] sm:$0xff] %v6385_v20 }
 0x838   :  { %v6379_v14 = vpop.f32.mrf.mxu0  ;;  %7710 = vst [vmem:[#allocation54_spill] sm:$0xff] %v6391_v58  ;;  %v6396_v19 = vpop.f32.mrf.mxu1 }
 0x839   :  { %7703 = vst [vmem:[#allocation10_spill] sm:$0xff] %v6379_v14  ;;  %7712 = vst [vmem:[#allocation55_spill] sm:$0xff] %v6396_v19  ;;  %v1995_v14 = vadd.f32 %v1994_v30, %v6391_v58  ;;  %v7716_v30 = vsub.s32 3, %v7704_v15 }
 0x83b   :  { %v6410_v58 = vrot.slane %v1904_v23, %v7716_v30 }
 0x8be   :  { %v6387_v52 = vpop.f32.mrf.mxu0  ;;  %v6399_v56 = vpop.f32.mrf.mxu1 }
 0x8bf   :  { %7708 = vst [vmem:[#allocation52_spill] sm:$0xff] %v6387_v52  ;;  %7713 = vst [vmem:[#allocation28_spill] sm:$0xff] %v6399_v56  ;;  %v7733_v56 = vld [vmem:[#allocation47_spill] sm:$0xff] }
 0x8c0   :  { %v6393_v63 = vpop.f32.mrf.mxu0  ;;  %v6401_v52 = vpop.f32.mrf.mxu1 }
 0x8c1   :  { %7711 = vst [vmem:[#allocation53_spill] sm:$0xff] %v6393_v63  ;;  %7714 = vst [vmem:[#allocation57_spill] sm:$0xff] %v6401_v52  ;;  %v6405_v63 = vrot.slane %v1904_v23, %v7715_v51  ;;  %v3721_v23 = vld [vmem:[%s7230_s2 + $0x8] sm:$0xff] }
 0x8c2   :  { %v2322_v17 = vpop.f32.mrf.mxu0  ;;  %v2393_v57 = vpop.f32.mrf.mxu1 }
 0x8c3   :  { %v2398_v53 = vadd.f32 %v2322_v17, %v1993_v25  ;;  %v2106_v19 = vadd.f32 %v2105_v22, %v6405_v63 }
 0x8c4   :  { %v2324_v55 = vpop.f32.mrf.mxu0  ;;  %v2395_v25 = vpop.f32.mrf.mxu1 }
 0x8c5   :  { %v3722_v20 = vmul.f32 -1.442695, %v2398_v53  ;;  %v2399_v59 = vadd.f32 %v2324_v55, %v1995_v14  ;;  %v2400_v17 = vadd.f32 %v2393_v57, %v2106_v19  ;;  %v2108_v55 = vadd.f32 %v2107_v24, %v6410_v58 }
 0x8c7   :  { %3879 = vpow2.f32 %v3722_v20  ;;  %v3723_v33 = vmul.f32 -1.442695, %v2399_v59  ;;  %v3724_v14 = vmul.f32 -1.442695, %v2400_v17  ;;  %v2401_v20 = vadd.f32 %v2395_v25, %v2108_v55 }
 0x8c9   :  { %3881 = vpow2.f32 %v3723_v33 }
 0x8ca   :  { %3883 = vpow2.f32 %v3724_v14  ;;  %v7717_v14 = vld [vmem:[#allocation35_spill] sm:$0xff] }
 0x8d4   :  { %v3880_v53 = vpop.eup %3879 }
 0x8d5   :  { %v2411_v59 = vadd.f32 1.0, %v3880_v53  ;;  %v7718_v53 = vld [vmem:[#allocation36_spill] sm:$0xff] }
 0x8d6   :  { %v3882_v52 = vpop.eup %3881 }
 0x8d7   :  { %3885 = vrcp.f32 %v2411_v59  ;;  %v2412_v51 = vadd.f32 1.0, %v3882_v52  ;;  %v3884_v33 = vpop.eup %3883  ;;  %v7720_v59 = vld [vmem:[#allocation37_spill] sm:$0xff] }
 0x8d8   :  { %3887 = vtanh.f32 %v2401_v20  ;;  %v2413_v57 = vadd.f32 1.0, %v3884_v33  ;;  %v7719_v20 = vld [vmem:[#allocation38_spill] sm:$0xff]  ;;  %v7722_v33 = vld [vmem:[#allocation5_spill] sm:$0xff] }
 0x8d9   :  { %3889 = vrcp.f32 %v2412_v51  ;;  %v7721_v51 = vld [vmem:[#allocation39_spill] sm:$0xff] }
 0x8da   :  { %3891 = vrcp.f32 %v2413_v57  ;;  %v7727_v57 = vld [vmem:[#allocation43_spill] sm:$0xff] }
 0x8e4   :  { %v3886_v22 = vpop.eup %3885 }
 0x8e5   :  { %v3888_v19 = vpop.eup %3887 }
 0x8e6   :  { %v3890_v15 = vpop.eup %3889  ;;  %v2422_v30 = vmul.f32 %v3888_v19, %v3886_v22  ;;  %v7723_v22 = vld [vmem:[#allocation6_spill] sm:$0xff] }
 0x8e7   :  { %v2421_v24 = vmul.f32 %v3890_v15, %v3721_v23  ;;  %v3892_v25 = vpop.eup %3891  ;;  %v7724_v23 = vld [vmem:[#allocation40_spill] sm:$0xff]  ;;  %v7725_v19 = vld [vmem:[#allocation42_spill] sm:$0xff]  ;;  %v7726_v15 = vld [vmem:[#allocation41_spill] sm:$0xff] }
 0x8e9   :  { %v6416_v17 = vadd.f32 %v2422_v30, %v2421_v24  ;;  %v7728_v24 = vld [vmem:[#allocation8_spill] sm:$0xff]  ;;  %v7729_v30 = vld [vmem:[#allocation9_spill] sm:$0xff] }
 0x8eb   :  { %3893 = vtanh.f32 %v6416_v17 }
 0x8f8   :  { %v3894_v52 = vpop.eup %3893 }
 0x8f9   :  { %v2425_v55 = vmul.f32 %v3894_v52, %v3892_v25  ;;  %v7730_v25 = vld [vmem:[#allocation44_spill] sm:$0xff]  ;;  %v7731_v52 = vld [vmem:[#allocation46_spill] sm:$0xff] }
 0x8fb   :  { %2495 = vmatmul.mubr.f32.vlgmr.msra.gmra.mxu0 %v2425_v55  ;;  %2566 = vmatmul.mubr.f32.vlgmr.msra.gmra.mxu1 %v2425_v55  ;;  %v7732_v55 = vld [vmem:[#allocation45_spill] sm:$0xff] }
 0x8fc   :  { %2605 = vmatpush1.msra.mxu0 %v5881_v32  ;;  %2676 = vmatpush1.msra.mxu1 %v5886_v21 }
 0x8fd   :  { %2606 = vmatprep.subr.mxu0 %v5893_v12  ;;  %2677 = vmatprep.subr.mxu1 %v5898_v13 }
 0x8fe   :  { %2607 = vmatpush1.msra.mxu0 %v5905_v9  ;;  %2678 = vmatpush1.msra.mxu1 %v5910_v60 }
 0x8ff   :  { %2608 = vmatprep.subr.mxu0 %v5917_v5  ;;  %2679 = vmatprep.subr.mxu1 %v5922_v39 }
 0x900   :  { %2609 = vmatpush1.msra.mxu0 %v5929_v40  ;;  %2680 = vmatpush1.msra.mxu1 %v5934_v1 }
 0x901   :  { %2610 = vmatprep.subr.mxu0 %v5941_v41  ;;  %2681 = vmatprep.subr.mxu1 %v5946_v42 }
 0x902   :  { %2611 = vmatpush1.msra.mxu0 %v5953_v11  ;;  %2682 = vmatpush1.msra.mxu1 %v5958_v7 }
 0x903   :  { %2612 = vmatprep.subr.mxu0 %v5965_v45  ;;  %2683 = vmatprep.subr.mxu1 %v5970_v62 }
 0x904   :  { %2613 = vmatpush1.msra.mxu0 %v5977_v0  ;;  %2684 = vmatpush1.msra.mxu1 %v5982_v8 }
 0x905   :  { %2614 = vmatprep.subr.mxu0 %v5989_v54  ;;  %2685 = vmatprep.subr.mxu1 %v5994_v2 }
 0x906   :  { %2615 = vmatpush1.msra.mxu0 %v6001_v36  ;;  %2686 = vmatpush1.msra.mxu1 %v6006_v3 }
 0x907   :  { %2616 = vmatprep.subr.mxu0 %v6013_v61  ;;  %2687 = vmatprep.subr.mxu1 %v6018_v10 }
 0x908   :  { %2617 = vmatpush1.msra.mxu0 %v6025_v4  ;;  %2688 = vmatpush1.msra.mxu1 %v6030_v18 }
 0x909   :  { %2618 = vmatprep.subr.mxu0 %v6037_v6  ;;  %2689 = vmatprep.subr.mxu1 %v6042_v27 }
 0x90a   :  { %2619 = vmatpush1.msra.mxu0 %v6049_v34  ;;  %2690 = vmatpush1.msra.mxu1 %v6054_v37 }
 0x90b   :  { %2620 = vmatprep.subr.mxu0 %v6061_v38  ;;  %2691 = vmatprep.subr.mxu1 %v6066_v26 }
 0x90c   :  { %2621 = vmatpush1.msra.mxu0 %v6073_v28  ;;  %2692 = vmatpush1.msra.mxu1 %v6078_v29 }
 0x90d   :  { %2622 = vmatprep.subr.mxu0 %v6085_v31  ;;  %2693 = vmatprep.subr.mxu1 %v6090_v35 }
 0x90e   :  { %2623 = vmatpush1.msra.mxu0 %v6097_v43  ;;  %2694 = vmatpush1.msra.mxu1 %v6102_v44 }
 0x90f   :  { %2624 = vmatprep.subr.mxu0 %v6109_v46  ;;  %2695 = vmatprep.subr.mxu1 %v6114_v47 }
 0x910   :  { %2625 = vmatpush1.msra.mxu0 %v6121_v48  ;;  %2696 = vmatpush1.msra.mxu1 %v6126_v49 }
 0x911   :  { %2626 = vmatprep.subr.mxu0 %v6133_v50  ;;  %2697 = vmatprep.subr.mxu1 %v7717_v14  ;;  %v7743_v14 = vld [vmem:[#allocation15_spill] sm:$0xff] }
 0x912   :  { %2627 = vmatpush1.msra.mxu0 %v7718_v53  ;;  %2698 = vmatpush1.msra.mxu1 %v7719_v20 }
 0x913   :  { %2628 = vmatprep.subr.mxu0 %v7720_v59  ;;  %2699 = vmatprep.subr.mxu1 %v7721_v51 }
 0x914   :  { %2629 = vmatpush1.msra.mxu0 %v7722_v33  ;;  %2700 = vmatpush1.msra.mxu1 %v7723_v22  ;;  %v7734_v22 = vld [vmem:[#allocation29_spill] sm:$0xff] }
 0x915   :  { %2630 = vmatprep.subr.mxu0 %v7724_v23  ;;  %2701 = vmatprep.subr.mxu1 %v7725_v19  ;;  %v7735_v23 = vmov 0.0   ;;  %v7736_v19 = vld [vmem:[#allocation31_spill] sm:$0xff] }
 0x916   :  { %2631 = vmatpush1.msra.mxu0 %v7726_v15  ;;  %2702 = vmatpush1.msra.mxu1 %v7727_v57  ;;  %v7737_v57 = vld [vmem:[#allocation27_spill] sm:$0xff]  ;;  %v7740_v15 = vld [vmem:[#allocation54_spill] sm:$0xff] }
 0x917   :  { %2632 = vmatprep.subr.mxu0 %v7728_v24  ;;  %2703 = vmatprep.subr.mxu1 %v7729_v30  ;;  %v7738_v24 = vld [vmem:[#allocation32_spill] sm:$0xff] }
 0x918   :  { %2633 = vmatpush1.msra.mxu0 %v7730_v25  ;;  %2704 = vmatpush1.msra.mxu1 %v7731_v52  ;;  %v7739_v25 = vld [vmem:[#allocation11_spill] sm:$0xff] }
 0x919   :  { %2634 = vmatprep.subr.mxu0 %v7732_v55  ;;  %2705 = vmatprep.subr.mxu1 %v7733_v56  ;;  %v1999_v30 = vadd.f32 %v7739_v25, %v6383_v16  ;;  %v7741_v55 = vld [vmem:[#allocation12_spill] sm:$0xff]  ;;  %v2114_v25 = vadd.f32 %v7743_v14, %v6410_v58 }
 0x91a   :  { %2635 = vmatpush1.msra.mxu0 %v7734_v22  ;;  %2668 = vmatprep.mubr.f32.mxu0 %v7735_v23  ;;  %v2001_v33 = vadd.f32 %v7741_v55, %v7740_v15 }
 0x91b   :  { %2706 = vmatpush1.msra.mxu1 %v7736_v19  ;;  %2739 = vmatprep.mubr.f32.mxu1 %v7735_v23  ;;  %v7742_v23 = vld [vmem:[#allocation13_spill] sm:$0xff] }
 0x91c   :  { %2778 = vmatprep.subr.mxu0 %v7737_v57  ;;  %2849 = vmatprep.subr.mxu1 %v7738_v24  ;;  %v2112_v57 = vadd.f32 %v7742_v23, %v6405_v63 }
 0x9bb   :  { %v2496_v52 = vpop.f32.mrf.mxu0  ;;  %v2567_v19 = vpop.f32.mrf.mxu1 }
 0x9bc   :  { %v2572_v56 = vadd.f32 %v2496_v52, %v1999_v30  ;;  %v2574_v53 = vadd.f32 %v2567_v19, %v2112_v57  ;;  %v7766_v52 = vld [vmem:[#allocation27_spill] sm:$0xff] }
 0x9bd   :  { %v2498_v51 = vpop.f32.mrf.mxu0  ;;  %v2569_v24 = vpop.f32.mrf.mxu1 }
 0x9be   :  { %v3725_v22 = vmul.f32 -1.442695, %v2572_v56  ;;  %v2573_v59 = vadd.f32 %v2498_v51, %v2001_v33  ;;  %v3727_v16 = vmul.f32 -1.442695, %v2574_v53  ;;  %v2575_v50 = vadd.f32 %v2569_v24, %v2114_v25  ;;  %v7765_v24 = vld [vmem:[#allocation31_spill] sm:$0xff]  ;;  %v7767_v25 = vld [vmem:[#allocation32_spill] sm:$0xff] }
 0x9bf   :  { %v7764_v53 = vmov 0.0  }
 0x9c0   :  { %3895 = vpow2.f32 %v3725_v22  ;;  %v3726_v20 = vmul.f32 -1.442695, %v2573_v59 }
 0x9c2   :  { %3897 = vpow2.f32 %v3726_v20 }
 0x9c3   :  { %3899 = vpow2.f32 %v3727_v16 }
 0x9c4   :  { %3901 = vtanh.f32 %v2575_v50  ;;  %v7762_v50 = vld [vmem:[#allocation47_spill] sm:$0xff] }
 0x9cd   :  { %v3896_v49 = vpop.eup %3895 }
 0x9ce   :  { %v2585_v55 = vadd.f32 1.0, %v3896_v49 }
 0x9cf   :  { %v3898_v30 = vpop.eup %3897 }
 0x9d0   :  { %3903 = vrcp.f32 %v2585_v55  ;;  %v2586_v56 = vadd.f32 1.0, %v3898_v30  ;;  %v3900_v20 = vpop.eup %3899  ;;  %v7768_v55 = vld [vmem:[#allocation30_spill] sm:$0xff] }
 0x9d1   :  { %v3902_v59 = vpop.eup %3901  ;;  %v2587_v23 = vadd.f32 1.0, %v3900_v20  ;;  %v7769_v30 = vld [vmem:[#allocation14_spill] sm:$0xff] }
 0x9d2   :  { %3905 = vrcp.f32 %v2586_v56  ;;  %v2005_v56 = vadd.f32 %v7769_v30, %v7768_v55 }
 0x9d3   :  { %3907 = vrcp.f32 %v2587_v23 }
 0x9dd   :  { %v3904_v51 = vpop.eup %3903 }
 0x9de   :  { %v2596_v33 = vmul.f32 %v3904_v51, %v3902_v59  ;;  %v7770_v59 = vld [vmem:[#allocation16_spill] sm:$0xff] }
 0x9df   :  { %v3906_v22 = vpop.eup %3905  ;;  %v2007_v51 = vadd.f32 %v7770_v59, %v7740_v15 }
 0x9e0   :  { %v2595_v19 = vmul.f32 %v3906_v22, %v6416_v17  ;;  %v3908_v49 = vpop.eup %3907  ;;  %v7763_v17 = vld [vmem:[#allocation29_spill] sm:$0xff] }
 0x9e2   :  { %v6494_v57 = vadd.f32 %v2596_v33, %v2595_v19 }
 0x9e4   :  { %3909 = vtanh.f32 %v6494_v57 }
 0x9f1   :  { %v3910_v16 = vpop.eup %3909 }
 0x9f2   :  { %v2599_v14 = vmul.f32 %v3910_v16, %v3908_v49 }
 0x9f4   :  { %2669 = vmatmul.mubr.f32.vlgmr.msra.gmra.mxu0 %v2599_v14  ;;  %2740 = vmatmul.mubr.f32.vlgmr.msra.gmra.mxu1 %v2599_v14  ;;  %v7771_v14 = vld [vmem:[#allocation17_spill] sm:$0xff] }
 0x9f5   :  { %2779 = vmatpush1.msra.mxu0 %v5881_v32  ;;  %2850 = vmatpush1.msra.mxu1 %v5886_v21  ;;  %v7744_v32 = vld [vmem:[#allocation34_spill] sm:$0xff]  ;;  %v7745_v21 = vld [vmem:[#allocation33_spill] sm:$0xff] }
 0x9f6   :  { %2780 = vmatprep.subr.mxu0 %v5893_v12  ;;  %2851 = vmatprep.subr.mxu1 %v5898_v13  ;;  %v7746_v12 = vld [vmem:[#allocation35_spill] sm:$0xff]  ;;  %v7747_v13 = vld [vmem:[#allocation36_spill] sm:$0xff] }
 0x9f7   :  { %2781 = vmatpush1.msra.mxu0 %v5905_v9  ;;  %2852 = vmatpush1.msra.mxu1 %v5910_v60  ;;  %v7748_v9 = vld [vmem:[#allocation38_spill] sm:$0xff]  ;;  %v7749_v60 = vld [vmem:[#allocation37_spill] sm:$0xff] }
 0x9f8   :  { %2782 = vmatprep.subr.mxu0 %v5917_v5  ;;  %2853 = vmatprep.subr.mxu1 %v5922_v39  ;;  %v7750_v5 = vld [vmem:[#allocation39_spill] sm:$0xff]  ;;  %v7751_v39 = vld [vmem:[#allocation5_spill] sm:$0xff] }
 0x9f9   :  { %2783 = vmatpush1.msra.mxu0 %v5929_v40  ;;  %2854 = vmatpush1.msra.mxu1 %v5934_v1  ;;  %v7752_v40 = vld [vmem:[#allocation6_spill] sm:$0xff]  ;;  %v7753_v1 = vld [vmem:[#allocation40_spill] sm:$0xff] }
 0x9fa   :  { %2784 = vmatprep.subr.mxu0 %v5941_v41  ;;  %2855 = vmatprep.subr.mxu1 %v5946_v42  ;;  %v7754_v41 = vld [vmem:[#allocation42_spill] sm:$0xff]  ;;  %v7755_v42 = vld [vmem:[#allocation41_spill] sm:$0xff] }
 0x9fb   :  { %2785 = vmatpush1.msra.mxu0 %v5953_v11  ;;  %2856 = vmatpush1.msra.mxu1 %v5958_v7  ;;  %v7756_v11 = vld [vmem:[#allocation43_spill] sm:$0xff]  ;;  %v7757_v7 = vld [vmem:[#allocation8_spill] sm:$0xff] }
 0x9fc   :  { %2786 = vmatprep.subr.mxu0 %v5965_v45  ;;  %2857 = vmatprep.subr.mxu1 %v5970_v62  ;;  %v7758_v45 = vld [vmem:[#allocation9_spill] sm:$0xff]  ;;  %v7759_v62 = vld [vmem:[#allocation44_spill] sm:$0xff] }
 0x9fd   :  { %2787 = vmatpush1.msra.mxu0 %v5977_v0  ;;  %2858 = vmatpush1.msra.mxu1 %v5982_v8  ;;  %v7760_v0 = vld [vmem:[#allocation46_spill] sm:$0xff]  ;;  %v7761_v8 = vld [vmem:[#allocation45_spill] sm:$0xff] }
 0x9fe   :  { %2788 = vmatprep.subr.mxu0 %v5989_v54  ;;  %2859 = vmatprep.subr.mxu1 %v5994_v2 }
 0x9ff   :  { %2789 = vmatpush1.msra.mxu0 %v6001_v36  ;;  %2860 = vmatpush1.msra.mxu1 %v6006_v3 }
 0xa00   :  { %2790 = vmatprep.subr.mxu0 %v6013_v61  ;;  %2861 = vmatprep.subr.mxu1 %v6018_v10 }
 0xa01   :  { %2791 = vmatpush1.msra.mxu0 %v6025_v4  ;;  %2862 = vmatpush1.msra.mxu1 %v6030_v18 }
 0xa02   :  { %2792 = vmatprep.subr.mxu0 %v6037_v6  ;;  %2863 = vmatprep.subr.mxu1 %v6042_v27 }
 0xa03   :  { %2793 = vmatpush1.msra.mxu0 %v6049_v34  ;;  %2864 = vmatpush1.msra.mxu1 %v6054_v37 }
 0xa04   :  { %2794 = vmatprep.subr.mxu0 %v6061_v38  ;;  %2865 = vmatprep.subr.mxu1 %v6066_v26 }
 0xa05   :  { %2795 = vmatpush1.msra.mxu0 %v6073_v28  ;;  %2866 = vmatpush1.msra.mxu1 %v6078_v29 }
 0xa06   :  { %2796 = vmatprep.subr.mxu0 %v6085_v31  ;;  %2867 = vmatprep.subr.mxu1 %v6090_v35 }
 0xa07   :  { %2797 = vmatpush1.msra.mxu0 %v6097_v43  ;;  %2868 = vmatpush1.msra.mxu1 %v6102_v44 }
 0xa08   :  { %2798 = vmatprep.subr.mxu0 %v6109_v46  ;;  %2869 = vmatprep.subr.mxu1 %v6114_v47 }
 0xa09   :  { %2799 = vmatpush1.msra.mxu0 %v6121_v48  ;;  %2870 = vmatpush1.msra.mxu1 %v7744_v32 }
 0xa0a   :  { %2800 = vmatprep.subr.mxu0 %v7745_v21  ;;  %2871 = vmatprep.subr.mxu1 %v7746_v12 }
 0xa0b   :  { %2801 = vmatpush1.msra.mxu0 %v7747_v13  ;;  %2872 = vmatpush1.msra.mxu1 %v7748_v9 }
 0xa0c   :  { %2802 = vmatprep.subr.mxu0 %v7749_v60  ;;  %2873 = vmatprep.subr.mxu1 %v7750_v5 }
 0xa0d   :  { %2803 = vmatpush1.msra.mxu0 %v7751_v39  ;;  %2874 = vmatpush1.msra.mxu1 %v7752_v40 }
 0xa0e   :  { %2804 = vmatprep.subr.mxu0 %v7753_v1  ;;  %2875 = vmatprep.subr.mxu1 %v7754_v41 }
 0xa0f   :  { %2805 = vmatpush1.msra.mxu0 %v7755_v42  ;;  %2876 = vmatpush1.msra.mxu1 %v7756_v11 }
 0xa10   :  { %2806 = vmatprep.subr.mxu0 %v7757_v7  ;;  %2877 = vmatprep.subr.mxu1 %v7758_v45 }
 0xa11   :  { %2807 = vmatpush1.msra.mxu0 %v7759_v62  ;;  %2878 = vmatpush1.msra.mxu1 %v7760_v0 }
 0xa12   :  { %2808 = vmatprep.subr.mxu0 %v7761_v8  ;;  %2879 = vmatprep.subr.mxu1 %v7762_v50 }
 0xa13   :  { %2809 = vmatpush1.msra.mxu0 %v7763_v17  ;;  %2842 = vmatprep.mubr.f32.mxu0 %v7764_v53 }
 0xa14   :  { %2880 = vmatpush1.msra.mxu1 %v7765_v24  ;;  %2913 = vmatprep.mubr.f32.mxu1 %v7764_v53  ;;  %v7772_v53 = vld [vmem:[#allocation19_spill] sm:$0xff] }
 0xa15   :  { %2952 = vmatprep.subr.mxu0 %v7766_v52  ;;  %3023 = vmatprep.subr.mxu1 %v7767_v25  ;;  %v2118_v52 = vadd.f32 %v7771_v14, %v6405_v63  ;;  %v2120_v30 = vadd.f32 %v7772_v53, %v6410_v58 }
 0xab4   :  { %v2670_v20 = vpop.f32.mrf.mxu0  ;;  %v2741_v16 = vpop.f32.mrf.mxu1 }
 0xab5   :  { %v2746_v33 = vadd.f32 %v2670_v20, %v2005_v56  ;;  %v2748_v24 = vadd.f32 %v2741_v16, %v2118_v52  ;;  %v6596_v52 = vld [vmem:[%s7232_s7 + $0x1d8] sm:$0xff] }
 0xab6   :  { %v2672_v22 = vpop.f32.mrf.mxu0  ;;  %v2743_v25 = vpop.f32.mrf.mxu1 }
 0xab7   :  { %v3728_v23 = vmul.f32 -1.442695, %v2746_v33  ;;  %v2747_v19 = vadd.f32 %v2672_v22, %v2007_v51  ;;  %v3730_v55 = vmul.f32 -1.442695, %v2748_v24  ;;  %v2749_v17 = vadd.f32 %v2743_v25, %v2120_v30  ;;  %v6602_v25 = vld [vmem:[%s7232_s7 + $0x1c0] sm:$0xff]  ;;  %v6608_v30 = vld [vmem:[%s7232_s7 + $0x1d0] sm:$0xff] }
 0xab9   :  { %3911 = vpow2.f32 %v3728_v23  ;;  %v3729_v49 = vmul.f32 -1.442695, %v2747_v19 }
 0xabb   :  { %3913 = vpow2.f32 %v3729_v49 }
 0xabc   :  { %3915 = vpow2.f32 %v3730_v55  ;;  %v6590_v55 = vld [vmem:[%s7232_s7 + $0x1c8] sm:$0xff] }
 0xabd   :  { %3917 = vtanh.f32 %v2749_v17  ;;  %v6578_v17 = vld [vmem:[%s7232_s7 + $0x1e0] sm:$0xff] }
 0xac6   :  { %v3912_v50 = vpop.eup %3911 }
 0xac7   :  { %v2759_v59 = vadd.f32 1.0, %v3912_v50 }
 0xac8   :  { %v3914_v56 = vpop.eup %3913 }
 0xac9   :  { %3919 = vrcp.f32 %v2759_v59  ;;  %v2760_v20 = vadd.f32 1.0, %v3914_v56  ;;  %v3916_v51 = vpop.eup %3915  ;;  %v6614_v59 = vld [vmem:[%s7232_s7 + $0x1a8] sm:$0xff]  ;;  %v6620_v56 = vld [vmem:[%s7232_s7 + $0x1b8] sm:$0xff] }
 0xaca   :  { %v3918_v33 = vpop.eup %3917  ;;  %v2761_v49 = vadd.f32 1.0, %v3916_v51  ;;  %v6632_v51 = vld [vmem:[%s7232_s7 + $0x1b0] sm:$0xff] }
 0xacb   :  { %3921 = vrcp.f32 %v2760_v20  ;;  %v6626_v20 = vld [vmem:[%s7232_s7 + $0x1a0] sm:$0xff] }
 0xacc   :  { %3923 = vrcp.f32 %v2761_v49  ;;  %v6662_v49 = vld [vmem:[%s7232_s7 + $0x168] sm:$0xff] }
 0xad6   :  { %v3920_v22 = vpop.eup %3919 }
 0xad7   :  { %v2770_v23 = vmul.f32 %v3920_v22, %v3918_v33  ;;  %v6638_v33 = vld [vmem:[%s7232_s7 + $0x188] sm:$0xff]  ;;  %v6644_v22 = vld [vmem:[%s7232_s7 + $0x198] sm:$0xff] }
 0xad8   :  { %v3922_v19 = vpop.eup %3921 }
 0xad9   :  { %v2769_v16 = vmul.f32 %v3922_v19, %v6494_v57  ;;  %v3924_v50 = vpop.eup %3923  ;;  %v6584_v57 = vld [vmem:[%s7232_s7 + $0x1f0] sm:$0xff] }
 0xada   :  { %v6656_v19 = vld [vmem:[%s7232_s7 + $0x190] sm:$0xff] }
 0xadb   :  { %v6572_v14 = vadd.f32 %v2770_v23, %v2769_v16  ;;  %v6650_v23 = vld [vmem:[%s7232_s7 + $0x180] sm:$0xff]  ;;  %v6668_v16 = vld [vmem:[%s7232_s7 + $0x178] sm:$0xff] }
 0xadd   :  { %3925 = vtanh.f32 %v6572_v14 }
 0xaea   :  { %v3926_v53 = vpop.eup %3925 }
 0xaeb   :  { %v2773_v24 = vmul.f32 %v3926_v53, %v3924_v50  ;;  %v6674_v50 = vld [vmem:[%s7232_s7 + $0x160] sm:$0xff]  ;;  %v6680_v53 = vld [vmem:[%s7232_s7 + $0x170] sm:$0xff] }
 0xaed   :  { %2843 = vmatmul.mubr.f32.vlgmr.msra.gmra.mxu0 %v2773_v24  ;;  %2914 = vmatmul.mubr.f32.vlgmr.msra.gmra.mxu1 %v2773_v24  ;;  %v6780_v24 = vld [vmem:[%s7232_s7 + $0x158] sm:$0xff] }
 0xaee   :  { %2953 = vmatpush1.msra.mxu0 %v6578_v17  ;;  %3024 = vmatpush1.msra.mxu1 %v6584_v57 }
 0xaef   :  { %2954 = vmatprep.subr.mxu0 %v6590_v55  ;;  %3025 = vmatprep.subr.mxu1 %v6596_v52 }
 0xaf0   :  { %2955 = vmatpush1.msra.mxu0 %v6602_v25  ;;  %3026 = vmatpush1.msra.mxu1 %v6608_v30 }
 0xaf1   :  { %2956 = vmatprep.subr.mxu0 %v6614_v59  ;;  %3027 = vmatprep.subr.mxu1 %v6620_v56 }
 0xaf2   :  { %2957 = vmatpush1.msra.mxu0 %v6626_v20  ;;  %3028 = vmatpush1.msra.mxu1 %v6632_v51 }
 0xaf3   :  { %2958 = vmatprep.subr.mxu0 %v6638_v33  ;;  %3029 = vmatprep.subr.mxu1 %v6644_v22 }
 0xaf4   :  { %2959 = vmatpush1.msra.mxu0 %v6650_v23  ;;  %3030 = vmatpush1.msra.mxu1 %v6656_v19 }
 0xaf5   :  { %2960 = vmatprep.subr.mxu0 %v6662_v49  ;;  %3031 = vmatprep.subr.mxu1 %v6668_v16 }
 0xaf6   :  { %2961 = vmatpush1.msra.mxu0 %v6674_v50  ;;  %3032 = vmatpush1.msra.mxu1 %v6680_v53 }
 0xaf7   :  { %2962 = vmatprep.subr.mxu0 %v5989_v54  ;;  %3033 = vmatprep.subr.mxu1 %v5994_v2  ;;  %v7773_v54 = vld [vmem:[#allocation47_spill] sm:$0xff]  ;;  %v7774_v2 = vld [vmem:[#allocation29_spill] sm:$0xff] }
 0xaf8   :  { %2963 = vmatpush1.msra.mxu0 %v6001_v36  ;;  %3034 = vmatpush1.msra.mxu1 %v6006_v3  ;;  %v7775_v36 = vmov 0.0   ;;  %v7776_v3 = vld [vmem:[#allocation31_spill] sm:$0xff] }
 0xaf9   :  { %2964 = vmatprep.subr.mxu0 %v6013_v61  ;;  %3035 = vmatprep.subr.mxu1 %v6018_v10  ;;  %v6732_v61 = vld [vmem:[%s7232_s7 + $0x1e8] sm:$0xff]  ;;  %v6738_v10 = vld [vmem:[%s7232_s7 + $0x1f8] sm:$0xff] }
 0xafa   :  { %2965 = vmatpush1.msra.mxu0 %v6025_v4  ;;  %3036 = vmatpush1.msra.mxu1 %v6030_v18  ;;  %7777 = vst [vmem:[#allocation11_spill] sm:$0xff] %v6732_v61  ;;  %7778 = vst [vmem:[#allocation54_spill] sm:$0xff] %v6738_v10  ;;  %v7779_v4 = vld [vmem:[#allocation30_spill] sm:$0xff] }
 0xafb   :  { %2966 = vmatprep.subr.mxu0 %v6037_v6  ;;  %3037 = vmatprep.subr.mxu1 %v6042_v27  ;;  %v7780_v18 = vld [vmem:[#allocation18_spill] sm:$0xff] }
 0xafc   :  { %2967 = vmatpush1.msra.mxu0 %v6049_v34  ;;  %3038 = vmatpush1.msra.mxu1 %v6054_v37  ;;  %v2011_v6 = vadd.f32 %v7780_v18, %v7779_v4  ;;  %v7781_v34 = vld [vmem:[#allocation20_spill] sm:$0xff] }
 0xafd   :  { %2968 = vmatprep.subr.mxu0 %v6061_v38  ;;  %3039 = vmatprep.subr.mxu1 %v6066_v26  ;;  %v2013_v37 = vadd.f32 %v7781_v34, %v7740_v15  ;;  %v6804_v18 = vld [vmem:[%s7232_s7 + $0x138] sm:$0xff]  ;;  %v6822_v34 = vld [vmem:[%s7232_s7 + $0x108] sm:$0xff] }
 0xafe   :  { %2969 = vmatpush1.msra.mxu0 %v6073_v28  ;;  %3040 = vmatpush1.msra.mxu1 %v6078_v29 }
 0xaff   :  { %2970 = vmatprep.subr.mxu0 %v6085_v31  ;;  %3041 = vmatprep.subr.mxu1 %v6090_v35 }
 0xb00   :  { %2971 = vmatpush1.msra.mxu0 %v6097_v43  ;;  %3042 = vmatpush1.msra.mxu1 %v6102_v44  ;;  %v7782_v43 = vld [vmem:[#allocation21_spill] sm:$0xff] }
 0xb01   :  { %2972 = vmatprep.subr.mxu0 %v6109_v46  ;;  %3043 = vmatprep.subr.mxu1 %v6114_v47  ;;  %v2124_v44 = vadd.f32 %v7782_v43, %v6405_v63  ;;  %v6870_v43 = vld [vmem:[%s7232_s7 + $0xc8] sm:$0xff] }
 0xb02   :  { %2973 = vmatpush1.msra.mxu0 %v6121_v48  ;;  %3044 = vmatpush1.msra.mxu1 %v7744_v32  ;;  %v7783_v48 = vld [vmem:[#allocation23_spill] sm:$0xff] }
 0xb03   :  { %2974 = vmatprep.subr.mxu0 %v7745_v21  ;;  %3045 = vmatprep.subr.mxu1 %v7746_v12  ;;  %v2126_v32 = vadd.f32 %v7783_v48, %v6410_v58  ;;  %v6894_v48 = vld [vmem:[%s7232_s7 + $0xa8] sm:$0xff] }
 0xb04   :  { %2975 = vmatpush1.msra.mxu0 %v7747_v13  ;;  %3046 = vmatpush1.msra.mxu1 %v7748_v9 }
 0xb05   :  { %2976 = vmatprep.subr.mxu0 %v7749_v60  ;;  %3047 = vmatprep.subr.mxu1 %v7750_v5 }
 0xb06   :  { %2977 = vmatpush1.msra.mxu0 %v7751_v39  ;;  %3048 = vmatpush1.msra.mxu1 %v7752_v40 }
 0xb07   :  { %2978 = vmatprep.subr.mxu0 %v7753_v1  ;;  %3049 = vmatprep.subr.mxu1 %v7754_v41 }
 0xb08   :  { %2979 = vmatpush1.msra.mxu0 %v7755_v42  ;;  %3050 = vmatpush1.msra.mxu1 %v7756_v11 }
 0xb09   :  { %2980 = vmatprep.subr.mxu0 %v7757_v7  ;;  %3051 = vmatprep.subr.mxu1 %v7758_v45 }
 0xb0a   :  { %2981 = vmatpush1.msra.mxu0 %v7759_v62  ;;  %3052 = vmatpush1.msra.mxu1 %v7760_v0 }
 0xb0b   :  { %2982 = vmatprep.subr.mxu0 %v7761_v8  ;;  %3053 = vmatprep.subr.mxu1 %v7773_v54  ;;  %v6786_v54 = vld [vmem:[%s7232_s7 + $0x140] sm:$0xff] }
 0xb0c   :  { %2983 = vmatpush1.msra.mxu0 %v7774_v2  ;;  %3016 = vmatprep.mubr.f32.mxu0 %v7775_v36  ;;  %v6792_v2 = vld [vmem:[%s7232_s7 + $0x150] sm:$0xff] }
 0xb0d   :  { %3054 = vmatpush1.msra.mxu1 %v7776_v3  ;;  %3087 = vmatprep.mubr.f32.mxu1 %v7775_v36  ;;  %v6798_v3 = vld [vmem:[%s7232_s7 + $0x128] sm:$0xff] }
 0xb0e   :  { %3126 = vmatprep.subr.mxu0 %v6732_v61  ;;  %3197 = vmatprep.subr.mxu1 %v6738_v10 }
 0xbad   :  { %v2844_v27 = vpop.f32.mrf.mxu0  ;;  %v2915_v35 = vpop.f32.mrf.mxu1 }
 0xbae   :  { %v2920_v38 = vadd.f32 %v2844_v27, %v2011_v6  ;;  %v2922_v46 = vadd.f32 %v2915_v35, %v2124_v44  ;;  %v6810_v6 = vld [vmem:[%s7232_s7 + $0x120] sm:$0xff]  ;;  %v6816_v27 = vld [vmem:[%s7232_s7 + $0x130] sm:$0xff]  ;;  %v6876_v44 = vld [vmem:[%s7232_s7 + $0xd8] sm:$0xff] }
 0xbaf   :  { %v2846_v26 = vpop.f32.mrf.mxu0  ;;  %v2917_v47 = vpop.f32.mrf.mxu1  ;;  %v6864_v35 = vld [vmem:[%s7232_s7 + $0xf0] sm:$0xff] }
 0xbb0   :  { %v3731_v28 = vmul.f32 -1.442695, %v2920_v38  ;;  %v2921_v29 = vadd.f32 %v2846_v26, %v2013_v37  ;;  %v3733_v21 = vmul.f32 -1.442695, %v2922_v46  ;;  %v2923_v12 = vadd.f32 %v2917_v47, %v2126_v32  ;;  %v6828_v37 = vld [vmem:[%s7232_s7 + $0x118] sm:$0xff]  ;;  %v6834_v38 = vld [vmem:[%s7232_s7 + $0x100] sm:$0xff] }
 0xbb1   :  { %v6840_v26 = vld [vmem:[%s7232_s7 + $0x110] sm:$0xff]  ;;  %v6882_v46 = vld [vmem:[%s7232_s7 + $0xc0] sm:$0xff]  ;;  %v6900_v32 = vld [vmem:[%s7232_s7 + $0xb8] sm:$0xff] }
 0xbb2   :  { %3927 = vpow2.f32 %v3731_v28  ;;  %v3732_v31 = vmul.f32 -1.442695, %v2921_v29  ;;  %v6846_v28 = vld [vmem:[%s7232_s7 + $0xe8] sm:$0xff]  ;;  %v6852_v29 = vld [vmem:[%s7232_s7 + $0xf8] sm:$0xff]  ;;  %v6888_v47 = vld [vmem:[%s7232_s7 + $0xd0] sm:$0xff] }
 0xbb4   :  { %3929 = vpow2.f32 %v3732_v31  ;;  %v6858_v31 = vld [vmem:[%s7232_s7 + $0xe0] sm:$0xff] }
 0xbb5   :  { %3931 = vpow2.f32 %v3733_v21  ;;  %v6906_v21 = vld [vmem:[%s7232_s7 + $0xa0] sm:$0xff] }
 0xbb6   :  { %3933 = vtanh.f32 %v2923_v12  ;;  %v6912_v12 = vld [vmem:[%s7232_s7 + $0xb0] sm:$0xff] }
 0xbb7   :  { %7784 = vst [vmem:[#allocation12_spill] sm:$0xff] %v6912_v12 }
 0xbbf   :  { %v3928_v13 = vpop.eup %3927 }
 0xbc0   :  { %v2933_v9 = vadd.f32 1.0, %v3928_v13  ;;  %v6918_v13 = vld [vmem:[%s7232_s7 + $0x88] sm:$0xff] }
 0xbc1   :  { %v3930_v60 = vpop.eup %3929  ;;  %7785 = vst [vmem:[#allocation13_spill] sm:$0xff] %v6918_v13 }
 0xbc2   :  { %3935 = vrcp.f32 %v2933_v9  ;;  %v2934_v5 = vadd.f32 1.0, %v3930_v60  ;;  %v3932_v39 = vpop.eup %3931  ;;  %v6924_v9 = vld [vmem:[%s7232_s7 + $0x98] sm:$0xff]  ;;  %v6930_v60 = vld [vmem:[%s7232_s7 + $0x80] sm:$0xff] }
 0xbc3   :  { %v3934_v40 = vpop.eup %3933  ;;  %v2935_v11 = vadd.f32 1.0, %v3932_v39  ;;  %7786 = vst [vmem:[#allocation15_spill] sm:$0xff] %v6924_v9  ;;  %7787 = vst [vmem:[#allocation34_spill] sm:$0xff] %v6930_v60  ;;  %v6942_v39 = vld [vmem:[%s7232_s7 + $0x68] sm:$0xff] }
 0xbc4   :  { %3937 = vrcp.f32 %v2934_v5  ;;  %v6936_v5 = vld [vmem:[%s7232_s7 + $0x90] sm:$0xff]  ;;  %7789 = vst [vmem:[#allocation35_spill] sm:$0xff] %v6942_v39 }
 0xbc5   :  { %3939 = vrcp.f32 %v2935_v11  ;;  %7788 = vst [vmem:[#allocation33_spill] sm:$0xff] %v6936_v5  ;;  %v6972_v11 = vld [vmem:[%s7232_s7 + $0x58] sm:$0xff] }
 0xbc6   :  { %7794 = vst [vmem:[#allocation5_spill] sm:$0xff] %v6972_v11 }
 0xbcf   :  { %v3936_v1 = vpop.eup %3935 }
 0xbd0   :  { %v2944_v41 = vmul.f32 %v3936_v1, %v3934_v40  ;;  %v6948_v40 = vld [vmem:[%s7232_s7 + $0x78] sm:$0xff]  ;;  %v6954_v1 = vld [vmem:[%s7232_s7 + $0x60] sm:$0xff] }
 0xbd1   :  { %v3938_v42 = vpop.eup %3937  ;;  %7790 = vst [vmem:[#allocation36_spill] sm:$0xff] %v6948_v40  ;;  %7791 = vst [vmem:[#allocation38_spill] sm:$0xff] %v6954_v1 }
 0xbd2   :  { %v2943_v7 = vmul.f32 %v3938_v42, %v6572_v14  ;;  %v3940_v62 = vpop.eup %3939  ;;  %v6774_v14 = vld [vmem:[%s7232_s7 + $0x148] sm:$0xff] }
 0xbd3   :  { %v6966_v42 = vld [vmem:[%s7232_s7 + $0x48] sm:$0xff] }
 0xbd4   :  { %v6750_v45 = vadd.f32 %v2944_v41, %v2943_v7  ;;  %v6960_v41 = vld [vmem:[%s7232_s7 + $0x70] sm:$0xff]  ;;  %7793 = vst [vmem:[#allocation39_spill] sm:$0xff] %v6966_v42  ;;  %v6978_v7 = vld [vmem:[%s7232_s7 + $0x40] sm:$0xff] }
 0xbd5   :  { %7792 = vst [vmem:[#allocation37_spill] sm:$0xff] %v6960_v41  ;;  %7795 = vst [vmem:[#allocation6_spill] sm:$0xff] %v6978_v7 }
 0xbd6   :  { %3941 = vtanh.f32 %v6750_v45 }
 0xbe3   :  { %v3942_v0 = vpop.eup %3941 }
 0xbe4   :  { %v2947_v8 = vmul.f32 %v3942_v0, %v3940_v62  ;;  %v6984_v62 = vld [vmem:[%s7232_s7 + $0x50] sm:$0xff]  ;;  %v6990_v0 = vld [vmem:[%s7232_s7 + $0x28] sm:$0xff] }
 0xbe5   :  { %7796 = vst [vmem:[#allocation40_spill] sm:$0xff] %v6984_v62  ;;  %7797 = vst [vmem:[#allocation42_spill] sm:$0xff] %v6990_v0 }
 0xbe6   :  { %3017 = vmatmul.mubr.f32.vlgmr.msra.gmra.mxu0 %v2947_v8  ;;  %3088 = vmatmul.mubr.f32.vlgmr.msra.gmra.mxu1 %v2947_v8  ;;  %v6996_v8 = vld [vmem:[%s7232_s7 + $0x38] sm:$0xff] }
 0xbe7   :  { %3127 = vmatpush1.msra.mxu0 %v6578_v17  ;;  %3198 = vmatpush1.msra.mxu1 %v6584_v57  ;;  %7798 = vst [vmem:[#allocation41_spill] sm:$0xff] %v6996_v8 }
 0xbe8   :  { %3128 = vmatprep.subr.mxu0 %v6590_v55  ;;  %3199 = vmatprep.subr.mxu1 %v6596_v52 }
 0xbe9   :  { %3129 = vmatpush1.msra.mxu0 %v6602_v25  ;;  %3200 = vmatpush1.msra.mxu1 %v6608_v30 }
 0xbea   :  { %3130 = vmatprep.subr.mxu0 %v6614_v59  ;;  %3201 = vmatprep.subr.mxu1 %v6620_v56 }
 0xbeb   :  { %3131 = vmatpush1.msra.mxu0 %v6626_v20  ;;  %3202 = vmatpush1.msra.mxu1 %v6632_v51 }
 0xbec   :  { %3132 = vmatprep.subr.mxu0 %v6638_v33  ;;  %3203 = vmatprep.subr.mxu1 %v6644_v22 }
 0xbed   :  { %3133 = vmatpush1.msra.mxu0 %v6650_v23  ;;  %3204 = vmatpush1.msra.mxu1 %v6656_v19 }
 0xbee   :  { %3134 = vmatprep.subr.mxu0 %v6662_v49  ;;  %3205 = vmatprep.subr.mxu1 %v6668_v16 }
 0xbef   :  { %3135 = vmatpush1.msra.mxu0 %v6674_v50  ;;  %3206 = vmatpush1.msra.mxu1 %v6680_v53 }
 0xbf0   :  { %3136 = vmatprep.subr.mxu0 %v6774_v14  ;;  %3207 = vmatprep.subr.mxu1 %v6780_v24 }
 0xbf1   :  { %3137 = vmatpush1.msra.mxu0 %v6786_v54  ;;  %3208 = vmatpush1.msra.mxu1 %v6792_v2 }
 0xbf2   :  { %3138 = vmatprep.subr.mxu0 %v6798_v3  ;;  %3209 = vmatprep.subr.mxu1 %v6804_v18 }
 0xbf3   :  { %3139 = vmatpush1.msra.mxu0 %v6810_v6  ;;  %3210 = vmatpush1.msra.mxu1 %v6816_v27 }
 0xbf4   :  { %3140 = vmatprep.subr.mxu0 %v6822_v34  ;;  %3211 = vmatprep.subr.mxu1 %v6828_v37 }
 0xbf5   :  { %3141 = vmatpush1.msra.mxu0 %v6834_v38  ;;  %3212 = vmatpush1.msra.mxu1 %v6840_v26 }
 0xbf6   :  { %3142 = vmatprep.subr.mxu0 %v6846_v28  ;;  %3213 = vmatprep.subr.mxu1 %v6852_v29 }
 0xbf7   :  { %3143 = vmatpush1.msra.mxu0 %v6858_v31  ;;  %3214 = vmatpush1.msra.mxu1 %v6864_v35 }
 0xbf8   :  { %3144 = vmatprep.subr.mxu0 %v6870_v43  ;;  %3215 = vmatprep.subr.mxu1 %v6876_v44 }
 0xbf9   :  { %3145 = vmatpush1.msra.mxu0 %v6882_v46  ;;  %3216 = vmatpush1.msra.mxu1 %v6888_v47 }
 0xbfa   :  { %3146 = vmatprep.subr.mxu0 %v6894_v48  ;;  %3217 = vmatprep.subr.mxu1 %v6900_v32 }
 0xbfb   :  { %3147 = vmatpush1.msra.mxu0 %v6906_v21  ;;  %3218 = vmatpush1.msra.mxu1 %v6912_v12 }
 0xbfc   :  { %3148 = vmatprep.subr.mxu0 %v6918_v13  ;;  %3219 = vmatprep.subr.mxu1 %v6924_v9  ;;  %v7808_v9 = vld [vmem:[#allocation50_spill] sm:$0xff] }
 0xbfd   :  { %3149 = vmatpush1.msra.mxu0 %v6930_v60  ;;  %3220 = vmatpush1.msra.mxu1 %v6936_v5 }
 0xbfe   :  { %3150 = vmatprep.subr.mxu0 %v6942_v39  ;;  %3221 = vmatprep.subr.mxu1 %v6948_v40 }
 0xbff   :  { %3151 = vmatpush1.msra.mxu0 %v6954_v1  ;;  %3222 = vmatpush1.msra.mxu1 %v6960_v41 }
 0xc00   :  { %3152 = vmatprep.subr.mxu0 %v6966_v42  ;;  %3223 = vmatprep.subr.mxu1 %v6972_v11 }
 0xc01   :  { %3153 = vmatpush1.msra.mxu0 %v6978_v7  ;;  %3224 = vmatpush1.msra.mxu1 %v6984_v62  ;;  %v7002_v7 = vld [vmem:[%s7232_s7 + $0x20] sm:$0xff]  ;;  %v7008_v62 = vld [vmem:[%s7232_s7 + $0x30] sm:$0xff] }
 0xc02   :  { %3154 = vmatprep.subr.mxu0 %v6990_v0  ;;  %3225 = vmatprep.subr.mxu1 %v6996_v8  ;;  %7799 = vst [vmem:[#allocation43_spill] sm:$0xff] %v7002_v7  ;;  %7800 = vst [vmem:[#allocation8_spill] sm:$0xff] %v7008_v62  ;;  %v7014_v0 = vld [vmem:[%s7232_s7 + $0x8] sm:$0xff]  ;;  %v7020_v8 = vld [vmem:[%s7232_s7 + $0x18] sm:$0xff] }
 0xc03   :  { %3155 = vmatpush1.msra.mxu0 %v7002_v7  ;;  %3226 = vmatpush1.msra.mxu1 %v7008_v62  ;;  %7801 = vst [vmem:[#allocation9_spill] sm:$0xff] %v7014_v0  ;;  %7802 = vst [vmem:[#allocation44_spill] sm:$0xff] %v7020_v8  ;;  %v7026_v7 = vld [vmem:[%s7232_s7] sm:$0xff] }
 0xc04   :  { %3156 = vmatprep.subr.mxu0 %v7014_v0  ;;  %3227 = vmatprep.subr.mxu1 %v7020_v8  ;;  %7803 = vst [vmem:[#allocation46_spill] sm:$0xff] %v7026_v7  ;;  %v7033_v0 = vld [vmem:[%s7232_s7 + $0x10] sm:$0xff] }
 0xc05   :  { %3157 = vmatpush1.msra.mxu0 %v7026_v7  ;;  %3190 = vmatprep.mubr.f32.mxu0 %v7775_v36  ;;  %7804 = vst [vmem:[#allocation45_spill] sm:$0xff] %v7033_v0  ;;  %v7805_v8 = vld [vmem:[#allocation22_spill] sm:$0xff]  ;;  %v7806_v7 = vld [vmem:[#allocation24_spill] sm:$0xff] }
 0xc06   :  { %3228 = vmatpush1.msra.mxu1 %v7033_v0  ;;  %3261 = vmatprep.mubr.f32.mxu1 %v7775_v36  ;;  %v2017_v62 = vadd.f32 %v7805_v8, %v7779_v4  ;;  %v2019_v42 = vadd.f32 %v7806_v7, %v7740_v15  ;;  %v7807_v36 = vld [vmem:[#allocation25_spill] sm:$0xff]  ;;  %v2132_v8 = vadd.f32 %v7808_v9, %v6410_v58  ;;  %v7811_v9 = vld [vmem:[#allocation15_spill] sm:$0xff] }
 0xc07   :  { %3300 = vmatprep.subr.mxu0 %v6732_v61  ;;  %3371 = vmatprep.subr.mxu1 %v6738_v10  ;;  %v2130_v61 = vadd.f32 %v7807_v36, %v6405_v63 }
 0xca6   :  { %v3018_v11 = vpop.f32.mrf.mxu0  ;;  %v3089_v0 = vpop.f32.mrf.mxu1 }
 0xca7   :  { %v3094_v41 = vadd.f32 %v3018_v11, %v2017_v62  ;;  %v3096_v60 = vadd.f32 %v3089_v0, %v2130_v61  ;;  %v7813_v0 = vld [vmem:[#allocation33_spill] sm:$0xff] }
 0xca8   :  { %v3020_v1 = vpop.f32.mrf.mxu0  ;;  %v3091_v10 = vpop.f32.mrf.mxu1 }
 0xca9   :  { %v3734_v40 = vmul.f32 -1.442695, %v3094_v41  ;;  %v3095_v39 = vadd.f32 %v3020_v1, %v2019_v42  ;;  %v3736_v4 = vmul.f32 -1.442695, %v3096_v60  ;;  %v3097_v13 = vadd.f32 %v3091_v10, %v2132_v8  ;;  %v7812_v60 = vld [vmem:[#allocation34_spill] sm:$0xff]  ;;  %v7814_v8 = vld [vmem:[#allocation35_spill] sm:$0xff] }
 0xcab   :  { %3943 = vpow2.f32 %v3734_v40  ;;  %v3735_v5 = vmul.f32 -1.442695, %v3095_v39 }
 0xcad   :  { %3945 = vpow2.f32 %v3735_v5 }
 0xcae   :  { %3947 = vpow2.f32 %v3736_v4 }
 0xcaf   :  { %3949 = vtanh.f32 %v3097_v13  ;;  %v7810_v13 = vld [vmem:[#allocation13_spill] sm:$0xff] }
 0xcb8   :  { %v3944_v12 = vpop.eup %3943 }
 0xcb9   :  { %v3107_v7 = vadd.f32 1.0, %v3944_v12 }
 0xcba   :  { %v3946_v11 = vpop.eup %3945 }
 0xcbb   :  { %3951 = vrcp.f32 %v3107_v7  ;;  %v3108_v40 = vadd.f32 1.0, %v3946_v11  ;;  %v3948_v5 = vpop.eup %3947  ;;  %v7815_v7 = vld [vmem:[#allocation36_spill] sm:$0xff]  ;;  %v7816_v11 = vld [vmem:[#allocation38_spill] sm:$0xff] }
 0xcbc   :  { %v3950_v39 = vpop.eup %3949  ;;  %v3109_v61 = vadd.f32 1.0, %v3948_v5  ;;  %v7818_v5 = vld [vmem:[#allocation39_spill] sm:$0xff] }
 0xcbd   :  { %3953 = vrcp.f32 %v3108_v40  ;;  %v7817_v40 = vld [vmem:[#allocation37_spill] sm:$0xff] }
 0xcbe   :  { %3955 = vrcp.f32 %v3109_v61  ;;  %v7823_v61 = vld [vmem:[#allocation41_spill] sm:$0xff] }
 0xcc8   :  { %v3952_v1 = vpop.eup %3951 }
 0xcc9   :  { %v3118_v41 = vmul.f32 %v3952_v1, %v3950_v39  ;;  %v7819_v39 = vld [vmem:[#allocation5_spill] sm:$0xff]  ;;  %v7820_v1 = vld [vmem:[#allocation6_spill] sm:$0xff] }
 0xcca   :  { %v3954_v36 = vpop.eup %3953 }
 0xccb   :  { %v3117_v42 = vmul.f32 %v3954_v36, %v6750_v45  ;;  %v3956_v10 = vpop.eup %3955  ;;  %v7809_v45 = vld [vmem:[#allocation12_spill] sm:$0xff]  ;;  %v7822_v36 = vld [vmem:[#allocation42_spill] sm:$0xff] }
 0xccd   :  { %v7048_v62 = vadd.f32 %v3118_v41, %v3117_v42  ;;  %v7821_v41 = vld [vmem:[#allocation40_spill] sm:$0xff]  ;;  %v7824_v42 = vld [vmem:[#allocation43_spill] sm:$0xff] }
 0xccf   :  { %3957 = vtanh.f32 %v7048_v62 }
 0xcdc   :  { %v3958_v4 = vpop.eup %3957 }
 0xcdd   :  { %v3121_v12 = vmul.f32 %v3958_v4, %v3956_v10  ;;  %v7825_v10 = vld [vmem:[#allocation8_spill] sm:$0xff]  ;;  %v7826_v4 = vld [vmem:[#allocation9_spill] sm:$0xff] }
 0xcdf   :  { %3191 = vmatmul.mubr.f32.vlgmr.msra.gmra.mxu0 %v3121_v12  ;;  %3262 = vmatmul.mubr.f32.vlgmr.msra.gmra.mxu1 %v3121_v12  ;;  %v7827_v12 = vld [vmem:[#allocation44_spill] sm:$0xff] }
 0xce0   :  { %3301 = vmatpush1.msra.mxu0 %v6578_v17  ;;  %3372 = vmatpush1.msra.mxu1 %v6584_v57 }
 0xce1   :  { %3302 = vmatprep.subr.mxu0 %v6590_v55  ;;  %3373 = vmatprep.subr.mxu1 %v6596_v52 }
 0xce2   :  { %3303 = vmatpush1.msra.mxu0 %v6602_v25  ;;  %3374 = vmatpush1.msra.mxu1 %v6608_v30 }
 0xce3   :  { %3304 = vmatprep.subr.mxu0 %v6614_v59  ;;  %3375 = vmatprep.subr.mxu1 %v6620_v56 }
 0xce4   :  { %3305 = vmatpush1.msra.mxu0 %v6626_v20  ;;  %3376 = vmatpush1.msra.mxu1 %v6632_v51 }
 0xce5   :  { %3306 = vmatprep.subr.mxu0 %v6638_v33  ;;  %3377 = vmatprep.subr.mxu1 %v6644_v22 }
 0xce6   :  { %3307 = vmatpush1.msra.mxu0 %v6650_v23  ;;  %3378 = vmatpush1.msra.mxu1 %v6656_v19 }
 0xce7   :  { %3308 = vmatprep.subr.mxu0 %v6662_v49  ;;  %3379 = vmatprep.subr.mxu1 %v6668_v16 }
 0xce8   :  { %3309 = vmatpush1.msra.mxu0 %v6674_v50  ;;  %3380 = vmatpush1.msra.mxu1 %v6680_v53 }
 0xce9   :  { %3310 = vmatprep.subr.mxu0 %v6774_v14  ;;  %3381 = vmatprep.subr.mxu1 %v6780_v24 }
 0xcea   :  { %3311 = vmatpush1.msra.mxu0 %v6786_v54  ;;  %3382 = vmatpush1.msra.mxu1 %v6792_v2 }
 0xceb   :  { %3312 = vmatprep.subr.mxu0 %v6798_v3  ;;  %3383 = vmatprep.subr.mxu1 %v6804_v18 }
 0xcec   :  { %3313 = vmatpush1.msra.mxu0 %v6810_v6  ;;  %3384 = vmatpush1.msra.mxu1 %v6816_v27 }
 0xced   :  { %3314 = vmatprep.subr.mxu0 %v6822_v34  ;;  %3385 = vmatprep.subr.mxu1 %v6828_v37 }
 0xcee   :  { %3315 = vmatpush1.msra.mxu0 %v6834_v38  ;;  %3386 = vmatpush1.msra.mxu1 %v6840_v26 }
 0xcef   :  { %3316 = vmatprep.subr.mxu0 %v6846_v28  ;;  %3387 = vmatprep.subr.mxu1 %v6852_v29 }
 0xcf0   :  { %3317 = vmatpush1.msra.mxu0 %v6858_v31  ;;  %3388 = vmatpush1.msra.mxu1 %v6864_v35 }
 0xcf1   :  { %3318 = vmatprep.subr.mxu0 %v6870_v43  ;;  %3389 = vmatprep.subr.mxu1 %v6876_v44 }
 0xcf2   :  { %3319 = vmatpush1.msra.mxu0 %v6882_v46  ;;  %3390 = vmatpush1.msra.mxu1 %v6888_v47 }
 0xcf3   :  { %3320 = vmatprep.subr.mxu0 %v6894_v48  ;;  %3391 = vmatprep.subr.mxu1 %v6900_v32 }
 0xcf4   :  { %3321 = vmatpush1.msra.mxu0 %v6906_v21  ;;  %3392 = vmatpush1.msra.mxu1 %v7809_v45 }
 0xcf5   :  { %3322 = vmatprep.subr.mxu0 %v7810_v13  ;;  %3393 = vmatprep.subr.mxu1 %v7811_v9  ;;  %v7837_v9 = vld [vmem:[#allocation7_spill] sm:$0xff] }
 0xcf6   :  { %3323 = vmatpush1.msra.mxu0 %v7812_v60  ;;  %3394 = vmatpush1.msra.mxu1 %v7813_v0 }
 0xcf7   :  { %3324 = vmatprep.subr.mxu0 %v7814_v8  ;;  %3395 = vmatprep.subr.mxu1 %v7815_v7 }
 0xcf8   :  { %3325 = vmatpush1.msra.mxu0 %v7816_v11  ;;  %3396 = vmatpush1.msra.mxu1 %v7817_v40  ;;  %v7828_v40 = vld [vmem:[#allocation46_spill] sm:$0xff] }
 0xcf9   :  { %3326 = vmatprep.subr.mxu0 %v7818_v5  ;;  %3397 = vmatprep.subr.mxu1 %v7819_v39  ;;  %v7829_v5 = vmov 0.0   ;;  %v7830_v39 = vld [vmem:[#allocation45_spill] sm:$0xff] }
 0xcfa   :  { %3327 = vmatpush1.msra.mxu0 %v7820_v1  ;;  %3398 = vmatpush1.msra.mxu1 %v7821_v41  ;;  %v7831_v41 = vld [vmem:[#allocation11_spill] sm:$0xff] }
 0xcfb   :  { %3328 = vmatprep.subr.mxu0 %v7822_v36  ;;  %3399 = vmatprep.subr.mxu1 %v7823_v61  ;;  %v7832_v36 = vld [vmem:[#allocation54_spill] sm:$0xff] }
 0xcfc   :  { %3329 = vmatpush1.msra.mxu0 %v7824_v42  ;;  %3400 = vmatpush1.msra.mxu1 %v7825_v10  ;;  %v7833_v61 = vld [vmem:[#allocation30_spill] sm:$0xff]  ;;  %v7834_v42 = vld [vmem:[#allocation48_spill] sm:$0xff] }
 0xcfd   :  { %3330 = vmatprep.subr.mxu0 %v7826_v4  ;;  %3401 = vmatprep.subr.mxu1 %v7827_v12  ;;  %v2023_v1 = vadd.f32 %v7834_v42, %v7833_v61  ;;  %v7835_v4 = vld [vmem:[#allocation49_spill] sm:$0xff]  ;;  %v2138_v42 = vadd.f32 %v7837_v9, %v6410_v58 }
 0xcfe   :  { %3331 = vmatpush1.msra.mxu0 %v7828_v40  ;;  %3364 = vmatprep.mubr.f32.mxu0 %v7829_v5  ;;  %v2025_v11 = vadd.f32 %v7835_v4, %v7740_v15 }
 0xcff   :  { %3402 = vmatpush1.msra.mxu1 %v7830_v39  ;;  %3435 = vmatprep.mubr.f32.mxu1 %v7829_v5  ;;  %v7836_v5 = vld [vmem:[#allocation51_spill] sm:$0xff] }
 0xd00   :  { %3474 = vmatprep.subr.mxu0 %v7831_v41  ;;  %3545 = vmatprep.subr.mxu1 %v7832_v36  ;;  %v2136_v41 = vadd.f32 %v7836_v5, %v6405_v63 }
 0xd9f   :  { %v3192_v10 = vpop.f32.mrf.mxu0  ;;  %v3263_v39 = vpop.f32.mrf.mxu1 }
 0xda0   :  { %v3268_v12 = vadd.f32 %v3192_v10, %v2023_v1  ;;  %v3270_v60 = vadd.f32 %v3263_v39, %v2136_v41 }
 0xda1   :  { %v3194_v7 = vpop.f32.mrf.mxu0  ;;  %v3265_v36 = vpop.f32.mrf.mxu1 }
 0xda2   :  { %v3737_v40 = vmul.f32 -1.442695, %v3268_v12  ;;  %v3269_v8 = vadd.f32 %v3194_v7, %v2025_v11  ;;  %v3739_v61 = vmul.f32 -1.442695, %v3270_v60  ;;  %v3271_v13 = vadd.f32 %v3265_v36, %v2138_v42 }
 0xda4   :  { %3959 = vpow2.f32 %v3737_v40  ;;  %v3738_v0 = vmul.f32 -1.442695, %v3269_v8 }
 0xda6   :  { %3961 = vpow2.f32 %v3738_v0 }
 0xda7   :  { %3963 = vpow2.f32 %v3739_v61 }
 0xda8   :  { %3965 = vtanh.f32 %v3271_v13 }
 0xdb1   :  { %v3960_v45 = vpop.eup %3959 }
 0xdb2   :  { %v3281_v4 = vadd.f32 1.0, %v3960_v45 }
 0xdb3   :  { %v3962_v1 = vpop.eup %3961 }
 0xdb4   :  { %3967 = vrcp.f32 %v3281_v4  ;;  %v3282_v7 = vadd.f32 1.0, %v3962_v1  ;;  %v3964_v0 = vpop.eup %3963 }
 0xdb5   :  { %v3966_v8 = vpop.eup %3965  ;;  %v3283_v39 = vadd.f32 1.0, %v3964_v0 }
 0xdb6   :  { %3969 = vrcp.f32 %v3282_v7 }
 0xdb7   :  { %3971 = vrcp.f32 %v3283_v39 }
 0xdc1   :  { %v3968_v11 = vpop.eup %3967 }
 0xdc2   :  { %v3292_v40 = vmul.f32 %v3968_v11, %v3966_v8 }
 0xdc3   :  { %v3970_v5 = vpop.eup %3969 }
 0xdc4   :  { %v3291_v10 = vmul.f32 %v3970_v5, %v7048_v62  ;;  %v3972_v45 = vpop.eup %3971 }
 0xdc6   :  { %v7126_v12 = vadd.f32 %v3292_v40, %v3291_v10 }
 0xdc8   :  { %3973 = vtanh.f32 %v7126_v12 }
 0xdd5   :  { %v3974_v9 = vpop.eup %3973 }
 0xdd6   :  { %v3295_v60 = vmul.f32 %v3974_v9, %v3972_v45  ;;  %v19_v45 = vstv %s7236_s10  ;;  %v7865_v9 = vld [vmem:[#allocation52_spill] sm:$0xff] }
 0xdd7   :  { %20 = vst [vmem:[#allocation4] sm:$0x1] %v19_v45 }
 0xdd8   :  { %3365 = vmatmul.mubr.f32.vlgmr.msra.gmra.mxu0 %v3295_v60  ;;  %3436 = vmatmul.mubr.f32.vlgmr.msra.gmra.mxu1 %v3295_v60 }
 0xdd9   :  { %3475 = vmatpush1.msra.mxu0 %v6578_v17  ;;  %3546 = vmatpush1.msra.mxu1 %v6584_v57  ;;  %v7838_v17 = vld [vmem:[#allocation12_spill] sm:$0xff]  ;;  %v7839_v57 = vld [vmem:[#allocation13_spill] sm:$0xff] }
 0xdda   :  { %3476 = vmatprep.subr.mxu0 %v6590_v55  ;;  %3547 = vmatprep.subr.mxu1 %v6596_v52  ;;  %v7840_v55 = vld [vmem:[#allocation15_spill] sm:$0xff]  ;;  %v7841_v52 = vld [vmem:[#allocation34_spill] sm:$0xff] }
 0xddb   :  { %3477 = vmatpush1.msra.mxu0 %v6602_v25  ;;  %3548 = vmatpush1.msra.mxu1 %v6608_v30  ;;  %v7842_v25 = vld [vmem:[#allocation33_spill] sm:$0xff]  ;;  %v7843_v30 = vld [vmem:[#allocation35_spill] sm:$0xff] }
 0xddc   :  { %3478 = vmatprep.subr.mxu0 %v6614_v59  ;;  %3549 = vmatprep.subr.mxu1 %v6620_v56  ;;  %v7844_v59 = vld [vmem:[#allocation36_spill] sm:$0xff]  ;;  %v7845_v56 = vld [vmem:[#allocation38_spill] sm:$0xff] }
 0xddd   :  { %3479 = vmatpush1.msra.mxu0 %v6626_v20  ;;  %3550 = vmatpush1.msra.mxu1 %v6632_v51  ;;  %v7846_v20 = vld [vmem:[#allocation37_spill] sm:$0xff]  ;;  %v7847_v51 = vld [vmem:[#allocation39_spill] sm:$0xff] }
 0xdde   :  { %3480 = vmatprep.subr.mxu0 %v6638_v33  ;;  %3551 = vmatprep.subr.mxu1 %v6644_v22  ;;  %v7848_v33 = vld [vmem:[#allocation5_spill] sm:$0xff]  ;;  %v7849_v22 = vld [vmem:[#allocation6_spill] sm:$0xff] }
 0xddf   :  { %3481 = vmatpush1.msra.mxu0 %v6650_v23  ;;  %3552 = vmatpush1.msra.mxu1 %v6656_v19  ;;  %v7850_v23 = vld [vmem:[#allocation40_spill] sm:$0xff]  ;;  %v7851_v19 = vld [vmem:[#allocation42_spill] sm:$0xff] }
 0xde0   :  { %3482 = vmatprep.subr.mxu0 %v6662_v49  ;;  %3553 = vmatprep.subr.mxu1 %v6668_v16  ;;  %v7852_v49 = vld [vmem:[#allocation41_spill] sm:$0xff]  ;;  %v7853_v16 = vld [vmem:[#allocation43_spill] sm:$0xff] }
 0xde1   :  { %3483 = vmatpush1.msra.mxu0 %v6674_v50  ;;  %3554 = vmatpush1.msra.mxu1 %v6680_v53  ;;  %v7854_v50 = vld [vmem:[#allocation8_spill] sm:$0xff]  ;;  %v7855_v53 = vld [vmem:[#allocation9_spill] sm:$0xff] }
 0xde2   :  { %3484 = vmatprep.subr.mxu0 %v6774_v14  ;;  %3555 = vmatprep.subr.mxu1 %v6780_v24  ;;  %v7856_v14 = vld [vmem:[#allocation44_spill] sm:$0xff]  ;;  %v7857_v24 = vld [vmem:[#allocation46_spill] sm:$0xff] }
 0xde3   :  { %3485 = vmatpush1.msra.mxu0 %v6786_v54  ;;  %3556 = vmatpush1.msra.mxu1 %v6792_v2  ;;  %v7858_v54 = vmov 0.0   ;;  %v7859_v2 = vld [vmem:[#allocation45_spill] sm:$0xff] }
 0xde4   :  { %3486 = vmatprep.subr.mxu0 %v6798_v3  ;;  %3557 = vmatprep.subr.mxu1 %v6804_v18  ;;  %v7860_v3 = vld [vmem:[#allocation30_spill] sm:$0xff]  ;;  %v7861_v18 = vld [vmem:[#allocation56_spill] sm:$0xff] }
 0xde5   :  { %3487 = vmatpush1.msra.mxu0 %v6810_v6  ;;  %3558 = vmatpush1.msra.mxu1 %v6816_v27  ;;  %v2029_v6 = vadd.f32 %v7861_v18, %v7860_v3  ;;  %v2035_v60 = vadd.f32 %v7865_v9, %v7860_v3 }
 0xde6   :  { %3488 = vmatprep.subr.mxu0 %v6822_v34  ;;  %3559 = vmatprep.subr.mxu1 %v6828_v37  ;;  %v7862_v34 = vld [vmem:[#allocation10_spill] sm:$0xff] }
 0xde7   :  { %3489 = vmatpush1.msra.mxu0 %v6834_v38  ;;  %3560 = vmatpush1.msra.mxu1 %v6840_v26  ;;  %v2031_v37 = vadd.f32 %v7862_v34, %v7740_v15 }
 0xde8   :  { %3490 = vmatprep.subr.mxu0 %v6846_v28  ;;  %3561 = vmatprep.subr.mxu1 %v6852_v29 }
 0xde9   :  { %3491 = vmatpush1.msra.mxu0 %v6858_v31  ;;  %3562 = vmatpush1.msra.mxu1 %v6864_v35 }
 0xdea   :  { %3492 = vmatprep.subr.mxu0 %v6870_v43  ;;  %3563 = vmatprep.subr.mxu1 %v6876_v44  ;;  %v7863_v43 = vld [vmem:[#allocation26_spill] sm:$0xff] }
 0xdeb   :  { %3493 = vmatpush1.msra.mxu0 %v6882_v46  ;;  %3564 = vmatpush1.msra.mxu1 %v6888_v47  ;;  %v2142_v44 = vadd.f32 %v7863_v43, %v6405_v63 }
 0xdec   :  { %3494 = vmatprep.subr.mxu0 %v6894_v48  ;;  %3565 = vmatprep.subr.mxu1 %v6900_v32  ;;  %v7864_v48 = vld [vmem:[#allocation55_spill] sm:$0xff] }
 0xded   :  { %3495 = vmatpush1.msra.mxu0 %v6906_v21  ;;  %3566 = vmatpush1.msra.mxu1 %v7838_v17  ;;  %v2144_v32 = vadd.f32 %v7864_v48, %v6410_v58 }
 0xdee   :  { %3496 = vmatprep.subr.mxu0 %v7839_v57  ;;  %3567 = vmatprep.subr.mxu1 %v7840_v55 }
 0xdef   :  { %3497 = vmatpush1.msra.mxu0 %v7841_v52  ;;  %3568 = vmatpush1.msra.mxu1 %v7842_v25 }
 0xdf0   :  { %3498 = vmatprep.subr.mxu0 %v7843_v30  ;;  %3569 = vmatprep.subr.mxu1 %v7844_v59 }
 0xdf1   :  { %3499 = vmatpush1.msra.mxu0 %v7845_v56  ;;  %3570 = vmatpush1.msra.mxu1 %v7846_v20  ;;  %v7867_v20 = vld [vmem:[#allocation28_spill] sm:$0xff] }
 0xdf2   :  { %3500 = vmatprep.subr.mxu0 %v7847_v51  ;;  %3571 = vmatprep.subr.mxu1 %v7848_v33  ;;  %v2148_v51 = vadd.f32 %v7867_v20, %v6405_v63 }
 0xdf3   :  { %3501 = vmatpush1.msra.mxu0 %v7849_v22  ;;  %3572 = vmatpush1.msra.mxu1 %v7850_v23  ;;  %v7868_v23 = vld [vmem:[#allocation57_spill] sm:$0xff] }
 0xdf4   :  { %3502 = vmatprep.subr.mxu0 %v7851_v19  ;;  %3573 = vmatprep.subr.mxu1 %v7852_v49  ;;  %v2150_v19 = vadd.f32 %v7868_v23, %v6410_v58 }
 0xdf5   :  { %3503 = vmatpush1.msra.mxu0 %v7853_v16  ;;  %3574 = vmatpush1.msra.mxu1 %v7854_v50 }
 0xdf6   :  { %3504 = vmatprep.subr.mxu0 %v7855_v53  ;;  %3575 = vmatprep.subr.mxu1 %v7856_v14 }
 0xdf7   :  { %3505 = vmatpush1.msra.mxu0 %v7857_v24  ;;  %3538 = vmatprep.mubr.f32.mxu0 %v7858_v54 }
 0xdf8   :  { %3576 = vmatpush1.msra.mxu1 %v7859_v2  ;;  %3609 = vmatprep.mubr.f32.mxu1 %v7858_v54 }
 0xe98   :  { %v3366_v27 = vpop.f32.mrf.mxu0  ;;  %v3437_v35 = vpop.f32.mrf.mxu1 }
 0xe99   :  { %v3442_v38 = vadd.f32 %v3366_v27, %v2029_v6  ;;  %v3444_v46 = vadd.f32 %v3437_v35, %v2142_v44 }
 0xe9a   :  { %v3368_v26 = vpop.f32.mrf.mxu0  ;;  %v3439_v47 = vpop.f32.mrf.mxu1 }
 0xe9b   :  { %v3740_v28 = vmul.f32 -1.442695, %v3442_v38  ;;  %v3443_v29 = vadd.f32 %v3368_v26, %v2031_v37  ;;  %v3742_v21 = vmul.f32 -1.442695, %v3444_v46  ;;  %v3445_v13 = vadd.f32 %v3439_v47, %v2144_v32  ;;  %v3748_v37 = vld [vmem:[%s7237_s9] ss:$0 sm:$0xff] }
 0xe9d   :  { %3975 = vpow2.f32 %v3740_v28  ;;  %v3741_v31 = vmul.f32 -1.442695, %v3443_v29  ;;  %v3749_v28 = vld [vmem:[#allocation4] ss:$0 sm:$0xff] }
 0xe9f   :  { %3977 = vpow2.f32 %v3741_v31 }
 0xea0   :  { %3979 = vpow2.f32 %v3742_v21 }
 0xeaa   :  { %v3976_v62 = vpop.eup %3975 }
 0xeab   :  { %v3455_v61 = vadd.f32 1.0, %v3976_v62 }
 0xeac   :  { %v3978_v41 = vpop.eup %3977 }
 0xead   :  { %3981 = vrcp.f32 %v3455_v61  ;;  %v3456_v36 = vadd.f32 1.0, %v3978_v41  ;;  %v3980_v42 = vpop.eup %3979 }
 0xeae   :  { %3983 = vtanh.f32 %v3445_v13  ;;  %v3457_v0 = vadd.f32 1.0, %v3980_v42 }
 0xeaf   :  { %3985 = vrcp.f32 %v3456_v36 }
 0xeb0   :  { %3987 = vrcp.f32 %v3457_v0 }
 0xeba   :  { %v3982_v4 = vpop.eup %3981 }
 0xebb   :  { %v3984_v1 = vpop.eup %3983 }
 0xebc   :  { %v3986_v7 = vpop.eup %3985  ;;  %v3466_v11 = vmul.f32 %v3984_v1, %v3982_v4 }
 0xebd   :  { %v3465_v8 = vmul.f32 %v3986_v7, %v7126_v12  ;;  %v3988_v5 = vpop.eup %3987  ;;  %v7866_v12 = vld [vmem:[#allocation53_spill] sm:$0xff] }
 0xebe   :  { %v2037_v57 = vadd.f32 %v7866_v12, %v7740_v15 }
 0xebf   :  { %v3467_v40 = vadd.f32 %v3466_v11, %v3465_v8 }
 0xec1   :  { %3989 = vtanh.f32 %v3467_v40 }
 0xece   :  { %v3990_v39 = vpop.eup %3989 }
 0xecf   :  { %v3469_v10 = vmul.f32 %v3990_v39, %v3988_v5 }
 0xed1   :  { %3539 = vmatmul.mubr.f32.vlgmr.msra.gmra.mxu0 %v3469_v10  ;;  %3610 = vmatmul.mubr.f32.vlgmr.msra.gmra.mxu1 %v3469_v10 }
 0xf91   :  { %v3540_v17 = vpop.f32.mrf.mxu0  ;;  %v3611_v56 = vpop.f32.mrf.mxu1 }
 0xf92   :  { %v3616_v55 = vadd.f32 %v3540_v17, %v2035_v60  ;;  %v3618_v33 = vadd.f32 %v3611_v56, %v2148_v51 }
 0xf93   :  { %v3542_v52 = vpop.f32.mrf.mxu0  ;;  %v3613_v22 = vpop.f32.mrf.mxu1 }
 0xf94   :  { %v3743_v25 = vmul.f32 -1.442695, %v3616_v55  ;;  %v3617_v30 = vadd.f32 %v3542_v52, %v2037_v57  ;;  %v3745_v49 = vmul.f32 -1.442695, %v3618_v33  ;;  %v3619_v16 = vadd.f32 %v3613_v22, %v2150_v19 }
 0xf96   :  { %3991 = vpow2.f32 %v3743_v25  ;;  %v3744_v59 = vmul.f32 -1.442695, %v3617_v30 }
 0xf98   :  { %3993 = vpow2.f32 %v3744_v59 }
 0xf99   :  { %3995 = vpow2.f32 %v3745_v49 }
 0xf9a   :  { %3997 = vtanh.f32 %v3619_v16 }
 0xfa3   :  { %v3992_v50 = vpop.eup %3991 }
 0xfa4   :  { %v3629_v15 = vadd.f32 1.0, %v3992_v50 }
 0xfa5   :  { %v3994_v53 = vpop.eup %3993 }
 0xfa6   :  { %3999 = vrcp.f32 %v3629_v15  ;;  %v3630_v14 = vadd.f32 1.0, %v3994_v53  ;;  %v3996_v24 = vpop.eup %3995 }
 0xfa7   :  { %v3998_v54 = vpop.eup %3997  ;;  %v3631_v18 = vadd.f32 1.0, %v3996_v24 }
 0xfa8   :  { %4001 = vrcp.f32 %v3630_v14 }
 0xfa9   :  { %4003 = vrcp.f32 %v3631_v18 }
 0xfb3   :  { %v4000_v2 = vpop.eup %3999 }
 0xfb4   :  { %v3640_v3 = vmul.f32 %v4000_v2, %v3998_v54 }
 0xfb5   :  { %v4002_v63 = vpop.eup %4001 }
 0xfb6   :  { %v3639_v6 = vmul.f32 %v4002_v63, %v3467_v40  ;;  %v4004_v58 = vpop.eup %4003 }
 0xfb8   :  { %v3641_v27 = vadd.f32 %v3640_v3, %v3639_v6 }
 0xfba   :  { %3747 = vst [vmem:[%s7233_s13 + $0x8] sm:$0xff] %v3641_v27  ;;  %4005 = vtanh.f32 %v3641_v27 }
 0xfc7   :  { %v4006_v34 = vpop.eup %4005 }
 0xfc8   :  { %v3643_v38 = vmul.f32 %v4006_v34, %v4004_v58 }
 0xfca   :  { %3746 = vst [vmem:[%s7234_s12 + $0x8] sm:$0xff] %v3643_v38  ;;  %v3655_v26 = vmul.f32 %v3748_v37, %v3643_v38 }
 0xfcc   :  { %3656 = vadd.xlane.f32.xlu0 %v3655_v26 }
0x1055   :  { %v3657_v29 = vpop.xlane.xlu0 %3656 }
0x1056   :  { %v3665_v31 = vadd.f32 %v3749_v28, %v3657_v29 }
0x1058   :  { %3667 = vst.msk [vmem:[%s7238_s11] sm:$0xff] %vm3666_vm1, %v3665_v31 }

</bundles_post_ra>
